<compile_context>
chip_gen: v7x
topology: tpu7x:2x2x1
jax: 0.10.0
libtpu: 0.0.40
codegen_flags: <defaults>
</compile_context>

<pallas_src>
import jax
import jax.numpy as jnp
from jax.experimental import pallas as pl
from jax.experimental.pallas import tpu as pltpu

# ----- small, self-consistent stand-in sizes for the original config -----
D = 32            # d_model
V = 256           # trg_vocab (stand-in for 21129)
SPECIAL = V - 1   # stand-in for the special token id 21128 (== vocab-1)
S2A_VOCAB = V - 1 # s2a_embed vocabulary (stand-in for 21128)
APAD = 128        # action logits padded 3 -> 128 lanes (pad cols get -1e30 bias)
LB = 0.1          # label smoothing
LB_NEG = LB / V
LB_POS = 1.0 - LB
ALPHA = 0.5       # config['alpha']
NEG_INF = -1e30   # finite: exp underflows to 0 without producing NaN
IGNORE = -1       # ignore index used by the model's criteria


def _s2a_head_kernel(cat_ref, tok_ref, w12_ref, b12_ref, wo_ref, bo_ref,
                     wsum_ref, bsum_ref, out_ref,
                     m_acc, se_acc, lbl_acc, xh_acc):
    j = pl.program_id(1)
    nv = pl.num_programs(1)
    tm = cat_ref.shape[0]
    tv = wo_ref.shape[1]

    @pl.when(j == 0)
    def _():
        m_acc[...] = jnp.full_like(m_acc, NEG_INF)
        se_acc[...] = jnp.zeros_like(se_acc)
        lbl_acc[...] = jnp.zeros_like(lbl_acc)
        xh_acc[...] = jnp.zeros_like(xh_acc)

    cat = cat_ref[...]                              # (tm, 2D) bf16 = [dropout(hidden) | s2a_embed]
    hid = cat[:, 0:D]                               # (tm, D)  bf16

    # --- output projection tile: Linear(D, tv) on the MXU, f32 accumulate ---
    logits = jnp.dot(hid, wo_ref[...], preferred_element_type=jnp.float32) + bo_ref[...]  # (tm,tv)

    tok = tok_ref[...]                              # (tm, 2) int32 = [x_hat | label]
    xhat = tok[:, 0:1]
    lbl = tok[:, 1:2]
    lbl_safe = jnp.where(lbl == IGNORE, 0, lbl)

    # one iota, reused for both scatter-column masks
    col = jax.lax.broadcasted_iota(jnp.int32, (tm, tv), 1) + j * tv

    # --- online log-sum-exp over the vocab axis ---
    m_prev = m_acc[...]
    tile_max = jnp.max(logits, axis=-1, keepdims=True)
    m_new = jnp.maximum(m_prev, tile_max)
    se_new = se_acc[...] * jnp.exp(m_prev - m_new) + \
        jnp.sum(jnp.exp(logits - m_new), axis=-1, keepdims=True)
    m_acc[...] = m_new
    se_acc[...] = se_new

    # label / x_hat logit extraction (each column lives in exactly one V tile)
    lbl_new = lbl_acc[...] + jnp.sum(jnp.where(col == lbl_safe, logits, 0.0),
                                     axis=-1, keepdims=True)
    xh_new = xh_acc[...] + jnp.sum(jnp.where(col == xhat, logits, 0.0),
                                   axis=-1, keepdims=True)
    lbl_acc[...] = lbl_new
    xh_acc[...] = xh_new

    # --- finalize: closed-form losses + lane-dense (8,128) partial-sum slab ---
    @pl.when(j == nv - 1)
    def _():
        # SPECIAL == V-1 sits in the last lane of the last V tile (static slice)
        logit_sp = logits[:, tv - 1:tv]

        m = m_new
        sumexp = se_new
        lse_full = m + jnp.log(sumexp)              # logsumexp(logits)
        logit_lbl = lbl_new
        logit_xh = xh_new
        ignore = lbl == IGNORE

        # sum over the full vocab of logits: MXU matmul against the precomputed
        # wo row-sum (lane-broadcast (D,128) slab) + bias sum — no XLU pass.
        sl = jnp.dot(hid, wsum_ref[...], preferred_element_type=jnp.float32)
        sum_logits = sl[:, 0:1] + bsum_ref[...]     # (tm,1)

        # --- loss_s2s: LabelSmoothSoftmaxCEV1, closed form ---
        loss_s2s = -(LB_NEG * (sum_logits - V * lse_full)
                     + (LB_POS - LB_NEG) * (logit_lbl - lse_full))
        loss_s2s = jnp.where(ignore, 0.0, loss_s2s)

        # --- action head: single fused matmul (w12 = w1@w2p, b12 = b1@w2p+b2p) ---
        al = jnp.dot(cat, w12_ref[...], preferred_element_type=jnp.float32) + b12_ref[...]
        a_m = jnp.max(al, axis=-1, keepdims=True)
        a_sh = al - a_m
        a_lse = jnp.log(jnp.sum(jnp.exp(a_sh), axis=-1, keepdims=True))
        log_a0 = a_sh[:, 0:1] - a_lse
        log_a1 = a_sh[:, 1:2] - a_lse
        log_a2 = a_sh[:, 2:3] - a_lse

        # --- loss_s2a: LabelSmoothCEV1 on d_a_output, fully analytic ---
        # d_a_output: zero special & x_hat cols, softmax, *a2, scatter special->a0,
        # x_hat->a1 (x_hat write wins if equal).  dp is never materialized.
        is_same = xhat == SPECIAL
        m_pr = jnp.maximum(m, 0.0)                  # valid LSE shift for da (da <= max(logits,0))
        e_sp = jnp.exp(logit_sp - m)
        e_xh = jnp.exp(logit_xh - m)
        sum_e_reg = sumexp - e_sp - jnp.where(is_same, 0.0, e_xh)
        n_scat = jnp.where(is_same, 1.0, 2.0)
        sumexp_da = jnp.exp(m - m_pr) * sum_e_reg + n_scat * jnp.exp(-m_pr)
        lse_da = m_pr + jnp.log(sumexp_da)
        n_reg = V - n_scat
        sum_reg_logits = sum_logits - logit_sp - jnp.where(is_same, 0.0, logit_xh)
        scat_logs = jnp.where(is_same, log_a1, log_a0 + log_a1)
        s_all = sum_reg_logits + n_reg * (log_a2 - lse_da) + scat_logs
        l_lbl = jnp.where(lbl_safe == xhat, log_a1,
                          jnp.where(lbl_safe == SPECIAL, log_a0,
                                    log_a2 + logit_lbl - lse_da))
        loss_s2a = -(LB_NEG * s_all + (LB_POS - LB_NEG) * l_lbl)
        loss_s2a = jnp.where(ignore, 0.0, loss_s2a)

        valid = jnp.where(ignore, 0.0, 1.0)

        s2s_sum = jnp.sum(loss_s2s, axis=0, keepdims=True)      # (1,1)
        s2a_sum = jnp.sum(loss_s2a, axis=0, keepdims=True)
        v_sum = jnp.sum(valid, axis=0, keepdims=True)
        rowc = jax.lax.broadcasted_iota(jnp.int32, (8, 128), 0)
        colc = jax.lax.broadcasted_iota(jnp.int32, (8, 128), 1)
        sel = rowc == 0
        slab = jnp.where(sel & (colc == 0), s2s_sum, 0.0)
        slab = jnp.where(sel & (colc == 1), s2a_sum, slab)
        slab = jnp.where(sel & (colc == 2), v_sum, slab)
        out_ref[...] = slab


def s2a_head_loss(hidden, s2a_emb, x_hat, labels, params, *, tm=128, tv=128):
    """hidden/s2a_emb: (N, D) f32; x_hat/labels: (N,) int. Returns (loss_s2s, loss_s2a)."""
    N = hidden.shape[0]
    assert tm % 8 == 0 and tv % 128 == 0
    assert V % tv == 0 and SPECIAL == V - 1
    num_m = -(-N // tm)
    num_v = V // tv
    n_pad = num_m * tm - N

    # concat once in the wrapper; cast activations to bf16 for the MXU
    cat = jnp.concatenate([hidden, s2a_emb], axis=-1).astype(jnp.bfloat16)     # (N, 2D)
    tok = jnp.concatenate([x_hat.reshape(N, 1), labels.reshape(N, 1)],
                          axis=-1).astype(jnp.int32)                           # (N, 2)
    if n_pad:
        cat = jnp.concatenate([cat, jnp.zeros((n_pad, 2 * D), cat.dtype)], axis=0)
        pad_tok = jnp.concatenate([jnp.zeros((n_pad, 1), jnp.int32),
                                   jnp.full((n_pad, 1), IGNORE, jnp.int32)], axis=-1)
        tok = jnp.concatenate([tok, pad_tok], axis=0)

    w1, b1, w2p, b2p, wo, bo = params
    # --- trace-time fusion of the two action-head Linears (no nonlinearity between) ---
    w12 = (w1 @ w2p).astype(jnp.bfloat16)                        # (2D, APAD)
    b12 = (b1 @ w2p + b2p).astype(jnp.float32)                   # (1, APAD); pad lanes stay -1e30
    wo_bf = wo.astype(jnp.bfloat16)                              # dominant weight stream in bf16
    # --- precomputed wo row-sum for the MXU sum(logits) (lane-broadcast, lane-dense) ---
    rowsum = jnp.sum(wo_bf.astype(jnp.float32), axis=1, keepdims=True)         # (D, 1)
    wsum = jnp.broadcast_to(rowsum, (D, 128)).astype(jnp.float32)              # (D, 128)
    bsum = jnp.sum(bo).reshape(1, 1).astype(jnp.float32)                       # (1, 1)

    out = pl.pallas_call(
        _s2a_head_kernel,
        out_shape=jax.ShapeDtypeStruct((num_m * 8, 128), jnp.float32),
        grid_spec=pltpu.PrefetchScalarGridSpec(
            num_scalar_prefetch=0,
            grid=(num_m, num_v),                                   # V axis last (reduction)
            in_specs=[
                pl.BlockSpec((tm, 2 * D), lambda i, j: (i, 0)),    # [hidden | s2a_embed]
                pl.BlockSpec((tm, 2), lambda i, j: (i, 0)),        # [x_hat | label]
                pl.BlockSpec((2 * D, APAD), lambda i, j: (0, 0)),  # fused action W
                pl.BlockSpec((1, APAD), lambda i, j: (0, 0)),      # fused action b
                pl.BlockSpec((D, tv), lambda i, j: (0, j)),        # out W, tiled over V
                pl.BlockSpec((1, tv), lambda i, j: (0, j)),        # out b, tiled over V
                pl.BlockSpec((D, 128), lambda i, j: (0, 0)),       # wo row-sum (broadcast)
                pl.BlockSpec((1, 1), lambda i, j: (0, 0)),         # bo sum
            ],
            out_specs=pl.BlockSpec((8, 128), lambda i, j: (i, 0)), # written only on last V step
            scratch_shapes=[pltpu.VMEM((tm, 1), jnp.float32),      # running max
                            pltpu.VMEM((tm, 1), jnp.float32),      # running sumexp
                            pltpu.VMEM((tm, 1), jnp.float32),      # logit[label]
                            pltpu.VMEM((tm, 1), jnp.float32)],     # logit[x_hat]
        ),
        compiler_params=pltpu.CompilerParams(
            dimension_semantics=("parallel", "arbitrary")),
    )(cat, tok, w12, b12, wo_bf, bo, wsum, bsum)

    sums = jnp.sum(out[:, :3], axis=0)          # tiny (num_m*8, 3) reduction
    n_valid = sums[2]
    return sums[0] / n_valid, sums[1] / n_valid


def init_params(key):
    ks = jax.random.split(key, 10)
    scale = 0.02
    p = {
        # --- tiny BART stub (glue) ---
        "enc_embed": scale * jax.random.normal(ks[0], (V, D), jnp.float32),
        "dec_embed": scale * jax.random.normal(ks[1], (V, D), jnp.float32),
        "w_enc": scale * jax.random.normal(ks[2], (D, D), jnp.float32),
        "w_dec": scale * jax.random.normal(ks[3], (D, D), jnp.float32),
        # --- S2A head ---
        "s2a_embed": scale * jax.random.normal(ks[4], (S2A_VOCAB, D), jnp.float32),
        "w1": scale * jax.random.normal(ks[5], (2 * D, 2 * D), jnp.float32),
        "b1": jnp.zeros((1, 2 * D), jnp.float32),
        "wo": scale * jax.random.normal(ks[6], (D, V), jnp.float32),
        "bo": jnp.zeros((1, V), jnp.float32),
    }
    w2 = scale * jax.random.normal(ks[7], (2 * D, 3), jnp.float32)
    b2 = jnp.zeros((3,), jnp.float32)
    # pad the 3-way action head to 128 lanes; padded logits forced to -1e30
    p["w2p"] = jnp.concatenate([w2, jnp.zeros((2 * D, APAD - 3), jnp.float32)], axis=1)
    p["b2p"] = jnp.concatenate([b2, jnp.full((APAD - 3,), NEG_INF, jnp.float32)]).reshape(1, APAD)
    return p


def s2a_model_bart_forward(params, encoder_input, decoder_input,
                           encoder_input_mask, decoder_input_mask,
                           x_hat, decoder_output, alpha=ALPHA):
    assert x_hat.shape[1] == decoder_input.shape[1] == decoder_output.shape[1]
    if decoder_output is None:
        return None

    # TODO(synk): BartModel.from_pretrained has no synthetic Pallas equivalent;
    # replaced by a deterministic tiny encoder/decoder stub producing
    # last_hidden_state of shape (B, T, D).
    enc = params["enc_embed"][encoder_input]                         # (B, S, D)
    enc_m = encoder_input_mask[..., None].astype(jnp.float32)
    pooled = (enc * enc_m).sum(1) / jnp.maximum(enc_m.sum(1), 1.0)   # (B, D)
    dec = params["dec_embed"][decoder_input]                         # (B, T, D)
    dec = dec * decoder_input_mask[..., None].astype(jnp.float32)
    last_hidden = jnp.tanh(dec @ params["w_dec"] + (pooled @ params["w_enc"])[:, None, :])

    # nn.Dropout: identity (eval mode).
    B, T, _ = last_hidden.shape
    hidden = last_hidden.reshape(B * T, D).astype(jnp.float32)
    s2a_emb = params["s2a_embed"][x_hat].reshape(B * T, D).astype(jnp.float32)
    xh = x_hat.reshape(B * T)
    lbl = decoder_output.reshape(B * T)

    loss_s2s, loss_s2a = s2a_head_loss(
        hidden, s2a_emb, xh, lbl,
        (params["w1"], params["b1"], params["w2p"], params["b2p"],
         params["wo"], params["bo"]))
    return (1.0 - alpha) * loss_s2a + alpha * loss_s2s


if __name__ == "__main__":
    key = jax.random.PRNGKey(0)
    kp, k1, k2, k3, k4 = jax.random.split(key, 5)
    params = init_params(kp)

    # N = B*T = 256 -> 2 row-tiles at tm=128 (both megacore TCs busy), 2 V tiles at tv=128
    B, S, T = 2, 16, 128
    encoder_input = jax.random.randint(k1, (B, S), 0, V, dtype=jnp.int32)
    decoder_input = jax.random.randint(k2, (B, T), 0, V, dtype=jnp.int32)
    encoder_input_mask = jnp.ones((B, S), jnp.int32)
    decoder_input_mask = jnp.ones((B, T), jnp.int32)
    x_hat = jax.random.randint(k3, (B, T), 0, S2A_VOCAB, dtype=jnp.int32)
    decoder_output = jax.random.randint(k4, (B, T), 0, V, dtype=jnp.int32)
    # a few ignored (-1) target positions, like padding
    decoder_output = decoder_output.at[:, -4:].set(IGNORE)

    loss = s2a_model_bart_forward(params, encoder_input, decoder_input,
                                  encoder_input_mask, decoder_input_mask,
                                  x_hat, decoder_output)
    loss = jax.block_until_ready(loss)
    assert loss.shape == () and bool(jnp.isfinite(loss))
    print("KERNEL_OK")
</pallas_src>

<mosaic_0001>
module attributes {stable_mosaic.version = 11 : i64} {
  func.func @_s2a_head_kernel(%arg0: i32, %arg1: i32, %arg2: memref<128x64xbf16, #tpu.memory_space<vmem>>, %arg3: memref<128x2xi32, #tpu.memory_space<vmem>>, %arg4: memref<64x128xbf16, #tpu.memory_space<vmem>>, %arg5: memref<1x128xf32, #tpu.memory_space<vmem>>, %arg6: memref<32x128xbf16, #tpu.memory_space<vmem>>, %arg7: memref<1x128xf32, #tpu.memory_space<vmem>>, %arg8: memref<32x128xf32, #tpu.memory_space<vmem>>, %arg9: memref<1x1xf32, #tpu.memory_space<vmem>>, %arg10: memref<8x128xf32, #tpu.memory_space<vmem>>, %arg11: memref<128x1xf32, #tpu.memory_space<vmem>>, %arg12: memref<128x1xf32, #tpu.memory_space<vmem>>, %arg13: memref<128x1xf32, #tpu.memory_space<vmem>>, %arg14: memref<128x1xf32, #tpu.memory_space<vmem>>) attributes {dimension_semantics = [#tpu.dimension_semantics<parallel>, #tpu.dimension_semantics<arbitrary>], iteration_bounds = array<i64: 2, 2>, scalar_prefetch = 0 : i64, scratch_operands = 4 : i64, tpu.core_type = #tpu.core_type<tc>, window_params = [{transform_indices = @transform_0, window_bounds = array<i64: 128, 64>}, {transform_indices = @transform_1, window_bounds = array<i64: 128, 2>}, {pipeline_mode = #tpu.pipeline_mode<synchronous>, transform_indices = @transform_2, window_bounds = array<i64: 64, 128>}, {pipeline_mode = #tpu.pipeline_mode<synchronous>, transform_indices = @transform_3, window_bounds = array<i64: 1, 128>}, {transform_indices = @transform_4, window_bounds = array<i64: 32, 128>}, {transform_indices = @transform_5, window_bounds = array<i64: 1, 128>}, {pipeline_mode = #tpu.pipeline_mode<synchronous>, transform_indices = @transform_6, window_bounds = array<i64: 32, 128>}, {pipeline_mode = #tpu.pipeline_mode<synchronous>, transform_indices = @transform_7, window_bounds = array<i64: 1, 1>}, {transform_indices = @transform_8, window_bounds = array<i64: 8, 128>}]} {
    %c0_i32 = arith.constant 0 : i32
    %0 = arith.cmpi eq, %arg1, %c0_i32 : i32
    %1 = arith.extui %0 : i1 to i32
    %c0_i32_0 = arith.constant 0 : i32
    %2 = arith.cmpi ne, %1, %c0_i32_0 : i32
    scf.if %2 {
      %cst_32 = arith.constant -1.000000e+30 : f32
      %58 = vector.broadcast %cst_32 : f32 to vector<128x1xf32>
      %c0_33 = arith.constant 0 : index
      %c0_34 = arith.constant 0 : index
      %59 = vector.load %arg11[%c0_33, %c0_34] : memref<128x1xf32, #tpu.memory_space<vmem>>, vector<128x1xf32>
      tpu.vector_store %arg11[%c0_33, %c0_34], %58 {strides = array<i32>} : memref<128x1xf32, #tpu.memory_space<vmem>>, vector<128x1xf32>,
      %cst_35 = arith.constant 0.000000e+00 : f32
      %60 = vector.broadcast %cst_35 : f32 to vector<128x1xf32>
      %c0_36 = arith.constant 0 : index
      %c0_37 = arith.constant 0 : index
      %61 = vector.load %arg12[%c0_36, %c0_37] : memref<128x1xf32, #tpu.memory_space<vmem>>, vector<128x1xf32>
      tpu.vector_store %arg12[%c0_36, %c0_37], %60 {strides = array<i32>} : memref<128x1xf32, #tpu.memory_space<vmem>>, vector<128x1xf32>,
      %cst_38 = arith.constant 0.000000e+00 : f32
      %62 = vector.broadcast %cst_38 : f32 to vector<128x1xf32>
      %c0_39 = arith.constant 0 : index
      %c0_40 = arith.constant 0 : index
      %63 = vector.load %arg13[%c0_39, %c0_40] : memref<128x1xf32, #tpu.memory_space<vmem>>, vector<128x1xf32>
      tpu.vector_store %arg13[%c0_39, %c0_40], %62 {strides = array<i32>} : memref<128x1xf32, #tpu.memory_space<vmem>>, vector<128x1xf32>,
      %cst_41 = arith.constant 0.000000e+00 : f32
      %64 = vector.broadcast %cst_41 : f32 to vector<128x1xf32>
      %c0_42 = arith.constant 0 : index
      %c0_43 = arith.constant 0 : index
      %65 = vector.load %arg14[%c0_42, %c0_43] : memref<128x1xf32, #tpu.memory_space<vmem>>, vector<128x1xf32>
      tpu.vector_store %arg14[%c0_42, %c0_43], %64 {strides = array<i32>} : memref<128x1xf32, #tpu.memory_space<vmem>>, vector<128x1xf32>,
    } else {
    }
    %c0 = arith.constant 0 : index
    %c0_1 = arith.constant 0 : index
    %3 = vector.load %arg2[%c0, %c0_1] : memref<128x64xbf16, #tpu.memory_space<vmem>>, vector<128x64xbf16>
    %4 = vector.extract_strided_slice %3 {offsets = [0, 0], sizes = [128, 32], strides = [1, 1]} : vector<128x64xbf16> to vector<128x32xbf16>
    %c0_2 = arith.constant 0 : index
    %c0_3 = arith.constant 0 : index
    %5 = vector.load %arg6[%c0_2, %c0_3] : memref<32x128xbf16, #tpu.memory_space<vmem>>, vector<32x128xbf16>
    %cst = arith.constant dense<0.000000e+00> : vector<128x128xf32>
    %6 = tpu.matmul %4, %5, %cst {dimension_numbers = #tpu.dot_dimension_numbers<[1], [0], [0], [1], [0, 0, 1, 1], [], []>} : vector<128x32xbf16>, vector<32x128xbf16>, vector<128x128xf32> -> vector<128x128xf32>
    %c0_4 = arith.constant 0 : index
    %c0_5 = arith.constant 0 : index
    %7 = vector.load %arg7[%c0_4, %c0_5] : memref<1x128xf32, #tpu.memory_space<vmem>>, vector<1x128xf32>
    %8 = vector.broadcast %7 : vector<1x128xf32> to vector<128x128xf32>
    %9 = arith.addf %6, %8 : vector<128x128xf32>
    %c0_6 = arith.constant 0 : index
    %c0_7 = arith.constant 0 : index
    %10 = vector.load %arg3[%c0_6, %c0_7] : memref<128x2xi32, #tpu.memory_space<vmem>>, vector<128x2xi32>
    %11 = vector.extract_strided_slice %10 {offsets = [0, 0], sizes = [128, 1], strides = [1, 1]} : vector<128x2xi32> to vector<128x1xi32>
    %12 = vector.extract_strided_slice %10 {offsets = [0, 1], sizes = [128, 1], strides = [1, 1]} : vector<128x2xi32> to vector<128x1xi32>
    %c-1_i32 = arith.constant -1 : i32
    %13 = vector.broadcast %c-1_i32 : i32 to vector<128x1xi32>
    %14 = arith.cmpi eq, %12, %13 : vector<128x1xi32>
    %c0_i32_8 = arith.constant 0 : i32
    %15 = vector.broadcast %c0_i32_8 : i32 to vector<128x1xi32>
    %16 = arith.select %14, %15, %12 : vector<128x1xi1>, vector<128x1xi32>
    %17 = tpu.iota {dimensions = array<i32: 1>} : vector<128x128xi32>
    %c128_i32 = arith.constant 128 : i32
    %18 = arith.muli %arg1, %c128_i32 : i32
    %19 = vector.broadcast %18 : i32 to vector<128x128xi32>
    %20 = arith.addi %17, %19 : vector<128x128xi32>
    %c0_9 = arith.constant 0 : index
    %c0_10 = arith.constant 0 : index
    %21 = vector.load %arg11[%c0_9, %c0_10] : memref<128x1xf32, #tpu.memory_space<vmem>>, vector<128x1xf32>
    %cst_11 = arith.constant dense<0xFF800000> : vector<128xf32>
    %22 = vector.multi_reduction <maximumf>, %9, %cst_11 [1] : vector<128x128xf32> to vector<128xf32>
    %23 = vector.shape_cast %22 : vector<128xf32> to vector<128x1xf32>
    %24 = arith.maximumf %21, %23 : vector<128x1xf32>
    %c0_12 = arith.constant 0 : index
    %c0_13 = arith.constant 0 : index
    %25 = vector.load %arg12[%c0_12, %c0_13] : memref<128x1xf32, #tpu.memory_space<vmem>>, vector<128x1xf32>
    %26 = arith.subf %21, %24 : vector<128x1xf32>
    %27 = math.exp %26 : vector<128x1xf32>
    %28 = arith.mulf %25, %27 : vector<128x1xf32>
    %29 = vector.broadcast %24 : vector<128x1xf32> to vector<128x128xf32>
    %30 = arith.subf %9, %29 : vector<128x128xf32>
    %31 = math.exp %30 : vector<128x128xf32>
    %cst_14 = arith.constant dense<0.000000e+00> : vector<128xf32>
    %32 = vector.multi_reduction <add>, %31, %cst_14 [1] : vector<128x128xf32> to vector<128xf32>
    %33 = vector.shape_cast %32 : vector<128xf32> to vector<128x1xf32>
    %34 = arith.addf %28, %33 : vector<128x1xf32>
    %c0_15 = arith.constant 0 : index
    %c0_16 = arith.constant 0 : index
    %35 = vector.load %arg11[%c0_15, %c0_16] : memref<128x1xf32, #tpu.memory_space<vmem>>, vector<128x1xf32>
    tpu.vector_store %arg11[%c0_15, %c0_16], %24 {strides = array<i32>} : memref<128x1xf32, #tpu.memory_space<vmem>>, vector<128x1xf32>,
    %c0_17 = arith.constant 0 : index
    %c0_18 = arith.constant 0 : index
    %36 = vector.load %arg12[%c0_17, %c0_18] : memref<128x1xf32, #tpu.memory_space<vmem>>, vector<128x1xf32>
    tpu.vector_store %arg12[%c0_17, %c0_18], %34 {strides = array<i32>} : memref<128x1xf32, #tpu.memory_space<vmem>>, vector<128x1xf32>,
    %c0_19 = arith.constant 0 : index
    %c0_20 = arith.constant 0 : index
    %37 = vector.load %arg13[%c0_19, %c0_20] : memref<128x1xf32, #tpu.memory_space<vmem>>, vector<128x1xf32>
    %38 = vector.broadcast %16 : vector<128x1xi32> to vector<128x128xi32>
    %39 = arith.cmpi eq, %20, %38 : vector<128x128xi32>
    %cst_21 = arith.constant 0.000000e+00 : f32
    %40 = vector.broadcast %cst_21 : f32 to vector<128x128xf32>
    %41 = arith.select %39, %9, %40 : vector<128x128xi1>, vector<128x128xf32>
    %cst_22 = arith.constant dense<0.000000e+00> : vector<128xf32>
    %42 = vector.multi_reduction <add>, %41, %cst_22 [1] : vector<128x128xf32> to vector<128xf32>
    %43 = vector.shape_cast %42 : vector<128xf32> to vector<128x1xf32>
    %44 = arith.addf %37, %43 : vector<128x1xf32>
    %c0_23 = arith.constant 0 : index
    %c0_24 = arith.constant 0 : index
    %45 = vector.load %arg14[%c0_23, %c0_24] : memref<128x1xf32, #tpu.memory_space<vmem>>, vector<128x1xf32>
    %46 = vector.broadcast %11 : vector<128x1xi32> to vector<128x128xi32>
    %47 = arith.cmpi eq, %20, %46 : vector<128x128xi32>
    %cst_25 = arith.constant 0.000000e+00 : f32
    %48 = vector.broadcast %cst_25 : f32 to vector<128x128xf32>
    %49 = arith.select %47, %9, %48 : vector<128x128xi1>, vector<128x128xf32>
    %cst_26 = arith.constant dense<0.000000e+00> : vector<128xf32>
    %50 = vector.multi_reduction <add>, %49, %cst_26 [1] : vector<128x128xf32> to vector<128xf32>
    %51 = vector.shape_cast %50 : vector<128xf32> to vector<128x1xf32>
    %52 = arith.addf %45, %51 : vector<128x1xf32>
    %c0_27 = arith.constant 0 : index
    %c0_28 = arith.constant 0 : index
    %53 = vector.load %arg13[%c0_27, %c0_28] : memref<128x1xf32, #tpu.memory_space<vmem>>, vector<128x1xf32>
    tpu.vector_store %arg13[%c0_27, %c0_28], %44 {strides = array<i32>} : memref<128x1xf32, #tpu.memory_space<vmem>>, vector<128x1xf32>,
    %c0_29 = arith.constant 0 : index
    %c0_30 = arith.constant 0 : index
    %54 = vector.load %arg14[%c0_29, %c0_30] : memref<128x1xf32, #tpu.memory_space<vmem>>, vector<128x1xf32>
    tpu.vector_store %arg14[%c0_29, %c0_30], %52 {strides = array<i32>} : memref<128x1xf32, #tpu.memory_space<vmem>>, vector<128x1xf32>,
    %c1_i32 = arith.constant 1 : i32
    %55 = arith.cmpi eq, %arg1, %c1_i32 : i32
    %56 = arith.extui %55 : i1 to i32
    %c0_i32_31 = arith.constant 0 : i32
    %57 = arith.cmpi ne, %56, %c0_i32_31 : i32
    scf.if %57 {
      %58 = vector.extract_strided_slice %9 {offsets = [0, 127], sizes = [128, 1], strides = [1, 1]} : vector<128x128xf32> to vector<128x1xf32>
      %59 = math.log %34 : vector<128x1xf32>
      %60 = arith.addf %24, %59 : vector<128x1xf32>
      %c-1_i32_32 = arith.constant -1 : i32
      %61 = vector.broadcast %c-1_i32_32 : i32 to vector<128x1xi32>
      %62 = arith.cmpi eq, %12, %61 : vector<128x1xi32>
      %c0_33 = arith.constant 0 : index
      %c0_34 = arith.constant 0 : index
      %63 = vector.load %arg8[%c0_33, %c0_34] : memref<32x128xf32, #tpu.memory_space<vmem>>, vector<32x128xf32>
      %cst_35 = arith.constant dense<0.000000e+00> : vector<128x128xf32>
      %64 = tpu.matmul %4, %63, %cst_35 {dimension_numbers = #tpu.dot_dimension_numbers<[1], [0], [0], [1], [0, 0, 1, 1], [], []>} : vector<128x32xbf16>, vector<32x128xf32>, vector<128x128xf32> -> vector<128x128xf32>
      %65 = vector.extract_strided_slice %64 {offsets = [0, 0], sizes = [128, 1], strides = [1, 1]} : vector<128x128xf32> to vector<128x1xf32>
      %c0_36 = arith.constant 0 : index
      %c0_37 = arith.constant 0 : index
      %66 = vector.load %arg9[%c0_36, %c0_37] : memref<1x1xf32, #tpu.memory_space<vmem>>, vector<1x1xf32>
      %67 = vector.broadcast %66 : vector<1x1xf32> to vector<128x1xf32>
      %68 = arith.addf %65, %67 : vector<128x1xf32>
      %cst_38 = arith.constant 2.560000e+02 : f32
      %69 = vector.broadcast %cst_38 : f32 to vector<128x1xf32>
      %70 = arith.mulf %69, %60 : vector<128x1xf32>
      %71 = arith.subf %68, %70 : vector<128x1xf32>
      %cst_39 = arith.constant 3.906250e-04 : f32
      %72 = vector.broadcast %cst_39 : f32 to vector<128x1xf32>
      %73 = arith.mulf %72, %71 : vector<128x1xf32>
      %74 = arith.subf %44, %60 : vector<128x1xf32>
      %cst_40 = arith.constant 0.899609386 : f32
      %75 = vector.broadcast %cst_40 : f32 to vector<128x1xf32>
      %76 = arith.mulf %75, %74 : vector<128x1xf32>
      %77 = arith.addf %73, %76 : vector<128x1xf32>
      %cst_41 = arith.constant 0.000000e+00 : f32
      %78 = vector.broadcast %cst_41 : f32 to vector<128x1xf32>
      %79 = arith.subf %78, %77 : vector<128x1xf32>
      %cst_42 = arith.constant 0.000000e+00 : f32
      %80 = vector.broadcast %cst_42 : f32 to vector<128x1xf32>
      %81 = arith.select %62, %80, %79 : vector<128x1xi1>, vector<128x1xf32>
      %c0_43 = arith.constant 0 : index
      %c0_44 = arith.constant 0 : index
      %82 = vector.load %arg4[%c0_43, %c0_44] : memref<64x128xbf16, #tpu.memory_space<vmem>>, vector<64x128xbf16>
      %cst_45 = arith.constant dense<0.000000e+00> : vector<128x128xf32>
      %83 = tpu.matmul %3, %82, %cst_45 {dimension_numbers = #tpu.dot_dimension_numbers<[1], [0], [0], [1], [0, 0, 1, 1], [], []>} : vector<128x64xbf16>, vector<64x128xbf16>, vector<128x128xf32> -> vector<128x128xf32>
      %c0_46 = arith.constant 0 : index
      %c0_47 = arith.constant 0 : index
      %84 = vector.load %arg5[%c0_46, %c0_47] : memref<1x128xf32, #tpu.memory_space<vmem>>, vector<1x128xf32>
      %85 = vector.broadcast %84 : vector<1x128xf32> to vector<128x128xf32>
      %86 = arith.addf %83, %85 : vector<128x128xf32>
      %cst_48 = arith.constant dense<0xFF800000> : vector<128xf32>
      %87 = vector.multi_reduction <maximumf>, %86, %cst_48 [1] : vector<128x128xf32> to vector<128xf32>
      %88 = vector.shape_cast %87 : vector<128xf32> to vector<128x1xf32>
      %89 = vector.broadcast %88 : vector<128x1xf32> to vector<128x128xf32>
      %90 = arith.subf %86, %89 : vector<128x128xf32>
      %91 = math.exp %90 : vector<128x128xf32>
      %cst_49 = arith.constant dense<0.000000e+00> : vector<128xf32>
      %92 = vector.multi_reduction <add>, %91, %cst_49 [1] : vector<128x128xf32> to vector<128xf32>
      %93 = vector.shape_cast %92 : vector<128xf32> to vector<128x1xf32>
      %94 = math.log %93 : vector<128x1xf32>
      %95 = vector.extract_strided_slice %90 {offsets = [0, 0], sizes = [128, 1], strides = [1, 1]} : vector<128x128xf32> to vector<128x1xf32>
      %96 = arith.subf %95, %94 : vector<128x1xf32>
      %97 = vector.extract_strided_slice %90 {offsets = [0, 1], sizes = [128, 1], strides = [1, 1]} : vector<128x128xf32> to vector<128x1xf32>
      %98 = arith.subf %97, %94 : vector<128x1xf32>
      %99 = vector.extract_strided_slice %90 {offsets = [0, 2], sizes = [128, 1], strides = [1, 1]} : vector<128x128xf32> to vector<128x1xf32>
      %100 = arith.subf %99, %94 : vector<128x1xf32>
      %c255_i32 = arith.constant 255 : i32
      %101 = vector.broadcast %c255_i32 : i32 to vector<128x1xi32>
      %102 = arith.cmpi eq, %11, %101 : vector<128x1xi32>
      %cst_50 = arith.constant 0.000000e+00 : f32
      %103 = vector.broadcast %cst_50 : f32 to vector<128x1xf32>
      %104 = arith.maximumf %24, %103 : vector<128x1xf32>
      %105 = arith.subf %58, %24 : vector<128x1xf32>
      %106 = math.exp %105 : vector<128x1xf32>
      %107 = arith.subf %52, %24 : vector<128x1xf32>
      %108 = math.exp %107 : vector<128x1xf32>
      %109 = arith.subf %34, %106 : vector<128x1xf32>
      %cst_51 = arith.constant 0.000000e+00 : f32
      %110 = vector.broadcast %cst_51 : f32 to vector<128x1xf32>
      %111 = arith.select %102, %110, %108 : vector<128x1xi1>, vector<128x1xf32>
      %112 = arith.subf %109, %111 : vector<128x1xf32>
      %cst_52 = arith.constant 1.000000e+00 : f32
      %cst_53 = arith.constant 2.000000e+00 : f32
      %113 = vector.broadcast %cst_52 : f32 to vector<128x1xf32>
      %114 = vector.broadcast %cst_53 : f32 to vector<128x1xf32>
      %115 = arith.select %102, %113, %114 : vector<128x1xi1>, vector<128x1xf32>
      %116 = arith.subf %24, %104 : vector<128x1xf32>
      %117 = math.exp %116 : vector<128x1xf32>
      %118 = arith.mulf %117, %112 : vector<128x1xf32>
      %cst_54 = arith.constant 0.000000e+00 : f32
      %119 = vector.broadcast %cst_54 : f32 to vector<128x1xf32>
      %120 = arith.subf %119, %104 : vector<128x1xf32>
      %121 = math.exp %120 : vector<128x1xf32>
      %122 = arith.mulf %115, %121 : vector<128x1xf32>
      %123 = arith.addf %118, %122 : vector<128x1xf32>
      %124 = math.log %123 : vector<128x1xf32>
      %125 = arith.addf %104, %124 : vector<128x1xf32>
      %cst_55 = arith.constant 2.560000e+02 : f32
      %126 = vector.broadcast %cst_55 : f32 to vector<128x1xf32>
      %127 = arith.subf %126, %115 : vector<128x1xf32>
      %128 = arith.subf %68, %58 : vector<128x1xf32>
      %cst_56 = arith.constant 0.000000e+00 : f32
      %129 = vector.broadcast %cst_56 : f32 to vector<128x1xf32>
      %130 = arith.select %102, %129, %52 : vector<128x1xi1>, vector<128x1xf32>
      %131 = arith.subf %128, %130 : vector<128x1xf32>
      %132 = arith.addf %96, %98 : vector<128x1xf32>
      %133 = arith.select %102, %98, %132 : vector<128x1xi1>, vector<128x1xf32>
      %134 = arith.subf %100, %125 : vector<128x1xf32>
      %135 = arith.mulf %127, %134 : vector<128x1xf32>
      %136 = arith.addf %131, %135 : vector<128x1xf32>
      %137 = arith.addf %136, %133 : vector<128x1xf32>
      %138 = arith.cmpi eq, %16, %11 : vector<128x1xi32>
      %c255_i32_57 = arith.constant 255 : i32
      %139 = vector.broadcast %c255_i32_57 : i32 to vector<128x1xi32>
      %140 = arith.cmpi eq, %16, %139 : vector<128x1xi32>
      %141 = arith.addf %100, %44 : vector<128x1xf32>
      %142 = arith.subf %141, %125 : vector<128x1xf32>
      %143 = arith.select %140, %96, %142 : vector<128x1xi1>, vector<128x1xf32>
      %144 = arith.select %138, %98, %143 : vector<128x1xi1>, vector<128x1xf32>
      %cst_58 = arith.constant 3.906250e-04 : f32
      %145 = vector.broadcast %cst_58 : f32 to vector<128x1xf32>
      %146 = arith.mulf %145, %137 : vector<128x1xf32>
      %cst_59 = arith.constant 0.899609386 : f32
      %147 = vector.broadcast %cst_59 : f32 to vector<128x1xf32>
      %148 = arith.mulf %147, %144 : vector<128x1xf32>
      %149 = arith.addf %146, %148 : vector<128x1xf32>
      %cst_60 = arith.constant 0.000000e+00 : f32
      %150 = vector.broadcast %cst_60 : f32 to vector<128x1xf32>
      %151 = arith.subf %150, %149 : vector<128x1xf32>
      %cst_61 = arith.constant 0.000000e+00 : f32
      %152 = vector.broadcast %cst_61 : f32 to vector<128x1xf32>
      %153 = arith.select %62, %152, %151 : vector<128x1xi1>, vector<128x1xf32>
      %cst_62 = arith.constant 0.000000e+00 : f32
      %cst_63 = arith.constant 1.000000e+00 : f32
      %154 = vector.broadcast %cst_62 : f32 to vector<128x1xf32>
      %155 = vector.broadcast %cst_63 : f32 to vector<128x1xf32>
      %156 = arith.select %62, %154, %155 : vector<128x1xi1>, vector<128x1xf32>
      %cst_64 = arith.constant dense<0.000000e+00> : vector<1xf32>
      %157 = vector.multi_reduction <add>, %81, %cst_64 [0] : vector<128x1xf32> to vector<1xf32>
      %158 = vector.shape_cast %157 : vector<1xf32> to vector<1x1xf32>
      %cst_65 = arith.constant dense<0.000000e+00> : vector<1xf32>
      %159 = vector.multi_reduction <add>, %153, %cst_65 [0] : vector<128x1xf32> to vector<1xf32>
      %160 = vector.shape_cast %159 : vector<1xf32> to vector<1x1xf32>
      %cst_66 = arith.constant dense<0.000000e+00> : vector<1xf32>
      %161 = vector.multi_reduction <add>, %156, %cst_66 [0] : vector<128x1xf32> to vector<1xf32>
      %162 = vector.shape_cast %161 : vector<1xf32> to vector<1x1xf32>
      %163 = tpu.iota {dimensions = array<i32: 0>} : vector<8x128xi32>
      %164 = tpu.iota {dimensions = array<i32: 1>} : vector<8x128xi32>
      %c0_i32_67 = arith.constant 0 : i32
      %165 = vector.broadcast %c0_i32_67 : i32 to vector<8x128xi32>
      %166 = arith.cmpi eq, %163, %165 : vector<8x128xi32>
      %c0_i32_68 = arith.constant 0 : i32
      %167 = vector.broadcast %c0_i32_68 : i32 to vector<8x128xi32>
      %168 = arith.cmpi eq, %164, %167 : vector<8x128xi32>
      %169 = arith.andi %166, %168 : vector<8x128xi1>
      %cst_69 = arith.constant 0.000000e+00 : f32
      %170 = vector.shape_cast %158 : vector<1x1xf32> to vector<1x1xf32>
      %171 = vector.broadcast %170 : vector<1x1xf32> to vector<8x128xf32>
      %172 = vector.broadcast %cst_69 : f32 to vector<8x128xf32>
      %173 = arith.select %169, %171, %172 : vector<8x128xi1>, vector<8x128xf32>
      %c1_i32_70 = arith.constant 1 : i32
      %174 = vector.broadcast %c1_i32_70 : i32 to vector<8x128xi32>
      %175 = arith.cmpi eq, %164, %174 : vector<8x128xi32>
      %176 = arith.andi %166, %175 : vector<8x128xi1>
      %177 = vector.shape_cast %160 : vector<1x1xf32> to vector<1x1xf32>
      %178 = vector.broadcast %177 : vector<1x1xf32> to vector<8x128xf32>
      %179 = arith.select %176, %178, %173 : vector<8x128xi1>, vector<8x128xf32>
      %c2_i32 = arith.constant 2 : i32
      %180 = vector.broadcast %c2_i32 : i32 to vector<8x128xi32>
      %181 = arith.cmpi eq, %164, %180 : vector<8x128xi32>
      %182 = arith.andi %166, %181 : vector<8x128xi1>
      %183 = vector.shape_cast %162 : vector<1x1xf32> to vector<1x1xf32>
      %184 = vector.broadcast %183 : vector<1x1xf32> to vector<8x128xf32>
      %185 = arith.select %182, %184, %179 : vector<8x128xi1>, vector<8x128xf32>
      %c0_71 = arith.constant 0 : index
      %c0_72 = arith.constant 0 : index
      %186 = vector.load %arg10[%c0_71, %c0_72] : memref<8x128xf32, #tpu.memory_space<vmem>>, vector<8x128xf32>
      tpu.vector_store %arg10[%c0_71, %c0_72], %185 {strides = array<i32>} : memref<8x128xf32, #tpu.memory_space<vmem>>, vector<8x128xf32>,
    } else {
    }
    return
  }
  func.func @transform_0(%arg0: i32, %arg1: i32) -> (i32, i32) {
    %c0_i32 = arith.constant 0 : i32
    %c0_i32_0 = arith.constant 0 : i32
    return %arg0, %c0_i32 : i32, i32
  }
  func.func @transform_1(%arg0: i32, %arg1: i32) -> (i32, i32) {
    %c0_i32 = arith.constant 0 : i32
    %c0_i32_0 = arith.constant 0 : i32
    return %arg0, %c0_i32 : i32, i32
  }
  func.func @transform_2(%arg0: i32, %arg1: i32) -> (i32, i32) {
    %c0_i32 = arith.constant 0 : i32
    %c0_i32_0 = arith.constant 0 : i32
    %c0_i32_1 = arith.constant 0 : i32
    return %c0_i32, %c0_i32_0 : i32, i32
  }
  func.func @transform_3(%arg0: i32, %arg1: i32) -> (i32, i32) {
    %c0_i32 = arith.constant 0 : i32
    %c0_i32_0 = arith.constant 0 : i32
    %c0_i32_1 = arith.constant 0 : i32
    return %c0_i32, %c0_i32_0 : i32, i32
  }
  func.func @transform_4(%arg0: i32, %arg1: i32) -> (i32, i32) {
    %c0_i32 = arith.constant 0 : i32
    %c0_i32_0 = arith.constant 0 : i32
    return %c0_i32, %arg1 : i32, i32
  }
  func.func @transform_5(%arg0: i32, %arg1: i32) -> (i32, i32) {
    %c0_i32 = arith.constant 0 : i32
    %c0_i32_0 = arith.constant 0 : i32
    return %c0_i32, %arg1 : i32, i32
  }
  func.func @transform_6(%arg0: i32, %arg1: i32) -> (i32, i32) {
    %c0_i32 = arith.constant 0 : i32
    %c0_i32_0 = arith.constant 0 : i32
    %c0_i32_1 = arith.constant 0 : i32
    return %c0_i32, %c0_i32_0 : i32, i32
  }
  func.func @transform_7(%arg0: i32, %arg1: i32) -> (i32, i32) {
    %c0_i32 = arith.constant 0 : i32
    %c0_i32_0 = arith.constant 0 : i32
    %c0_i32_1 = arith.constant 0 : i32
    return %c0_i32, %c0_i32_0 : i32, i32
  }
  func.func @transform_8(%arg0: i32, %arg1: i32) -> (i32, i32) {
    %c0_i32 = arith.constant 0 : i32
    %c0_i32_0 = arith.constant 0 : i32
    return %arg0, %c0_i32 : i32, i32
  }
}

</mosaic_0001>

<bundles_post_ra>
// kernel: tpu_custom_call.1
= control target key start
LH: loop header
LB: loop body
LE: loop exit
PB: predicated region body
PF: predicated region fallthrough
CT: control target
= control target key end

     0   :  { %s7576_s0 = inlined_call_operand.vmem [shape: bf16[256,64], index: 0, kind: input, shape index: {}]   ;;  %s7577_s1 = inlined_call_operand.vmem [shape: s32[256,2], index: 1, kind: input, shape index: {}]   ;;  %s7578_s2 = inlined_call_operand.vmem [shape: bf16[64,128], index: 2, kind: input, shape index: {}]   ;;  %s7579_s3 = inlined_call_operand.vmem [shape: f32[1,128], index: 3, kind: input, shape index: {}]   ;;  %s7580_s4 = inlined_call_operand.vmem [shape: bf16[32,256], index: 4, kind: input, shape index: {}]   ;;  %s7581_s5 = inlined_call_operand.vmem [shape: f32[1,256], index: 5, kind: input, shape index: {}]   ;;  %s7582_s6 = inlined_call_operand.vmem [shape: f32[32,128], index: 6, kind: input, shape index: {}]   ;;  %s7583_s7 = inlined_call_operand.<no memory space> [shape: f32[1,1], index: 7, kind: input, shape index: {}]   ;;  %s7584_s8 = inlined_call_operand.hbm [shape: f32[16,128], index: 8, kind: output, shape index: {}]  }
   0x1   :  { %7883 = sst [smem:[#allocation187_spill]] %s7580_s4  ;;  %v13_v0 = vstv %s7583_s7 }
   0x2   :  { %14 = vst [vmem:[#allocation6] sm:$0x1] %v13_v0 }
   0x3   :  { %15 = vsyncpa [#allocation9], 0 }
   0x4   :  { %17 = vsyncpa [#allocation9 + $0x1], 0  ;;  %s4628_s29 = smov 0   ;;  %s4630_s30 = smov 0  }
   0x5   :  { %s4632_s9 = smov 0   ;;  %s4634_s10 = smov 0  }
   0x6   :  { %s4636_s11 = smov 0   ;;  %s4638_s12 = smov 0  }
   0x7   :  { %s4640_s13 = smov 0   ;;  %s4642_s14 = smov 0  }
   0x8   :  { %s4644_s7 = smov 0   ;;  %s4646_s15 = smov 0  }
   0x9 LB: > { %7884 = sst [smem:[#allocation11_spill]] %s4538_s9  ;;  %s3842_s16 = sadd.s32 4294967295, %s4566_s15   ;;  %s4566_s15 = sphi %s4646_s15, %s23_s15   ;;  %s4562_s7 = sphi %s4644_s7, %s8450_s7   ;;  %s4558_s14 = sphi %s4642_s14, %s8449_s14   ;;  %s4554_s13 = sphi %s4640_s13, %s8448_s13   ;;  %s4550_s12 = sphi %s4638_s12, %s8447_s12   ;;  %s4546_s11 = sphi %s4636_s11, %s8446_s11   ;;  %s4542_s10 = sphi %s4634_s10, %s8445_s10   ;;  %s4538_s9 = sphi %s4632_s9, %s8444_s9   ;;  %s4534_s30 = sphi %s4630_s30, %s8452_s30   ;;  %s4530_s29 = sphi %s4628_s29, %s8451_s29  }
   0xa   : > { %7885 = sst [smem:[#allocation12_spill]] %s4546_s11  ;;  %s3843_s17 = sadd.s32 4294967294, %s4566_s15  }
   0xb   : > { %7886 = sst [smem:[#allocation13_spill]] %s4558_s14  ;;  %s32_s18 = sadd.s32 1, %s4558_s14 }
   0xc   : > { %7887 = sst [smem:[#allocation14_spill]] %s4562_s7  ;;  %s35_s19 = sadd.s32 1, %s4562_s7 }
   0xd   : > { %p33_p0 = scmp.ge.s32.totalorder %s32_s18, 2  ;;  %s136_s20 = sadd.s32 1, %s4546_s11 }
   0xe   : > { %p143_p1 = scmp.ne.s32.totalorder %s4546_s11, %s4542_s10  ;;  %p144_p2 = scmp.eq.s32.totalorder %s4566_s15, 0 }
   0xf   : > { %s8454_s18 = smov (%p33_p0, %s32_s18), 0  ;;  %s8456_s19 = smov (!%p33_p0, %s35_s19), %s4562_s7 }
  0x10   : > { %7888 = sst [smem:[#allocation15_spill]] %s8454_s18  ;;  %s133_s21 = ssub.s32 %s4558_s14, %s8454_s18 }
  0x11   : > { %p4691_p3 = por %p144_p2, %p143_p1  ;;  %p37_p4 = scmp.ge.s32.totalorder %s8456_s19, 2 }
  0x12   : > { %p134_p5 = scmp.eq.s32.totalorder %s133_s21, 0  ;;  %s230_s23 = sadd.s32 1, %s4538_s9 }
  0x13   : > { %p240_p6 = scmp.ne.s32.totalorder %s4538_s9, %s4534_s30  ;;  %s8458_s19 = smov (%p37_p4, %s8456_s19), 0 }
  0x14   : > { %7890 = sst [smem:[#allocation16_spill]] %s8458_s19  ;;  %s227_s25 = ssub.s32 %s4562_s7, %s8458_s19 }
  0x15   : > { %s4701_s24 = scalar_select %p134_p5, %s4546_s11, %s136_s20  }
  0x16   : > { %p241_p7 = scmp.eq.s32.totalorder %s3842_s16, 3  ;;  %p228_p8 = scmp.eq.s32.totalorder %s227_s25, 0 }
  0x17   : > { %7891 = sst [smem:[#allocation17_spill]] %s4701_s24  ;;  %p246_p9 = scmp.ne.s32.totalorder %s4534_s30, %s4530_s29 }
  0x18   : > { %p4707_p10 = por %p241_p7, %p240_p6  ;;  %p247_p11 = scmp.eq.s32.totalorder %s3843_s17, 3 }
  0x19   : > { %s4712_s27 = scalar_select %p228_p8, %s4538_s9, %s230_s23  }
  0x1a   : > { %p4714_p12 = por %p247_p11, %p246_p9  ;;  %p3845_p13 = scmp.ge.s32.totalorder %s4566_s15, 4 }
  0x1b   : > { %7893 = sst [smem:[#allocation18_spill]] %s4712_s27 }
  0x1c   : > { %275 = sbr.rel (%p3845_p13) target bundleno = 47 (0x2f), region = 32 }
  0x23   : > { %296 = sbr.rel (!%p4691_p3) target bundleno = 47 (0x2f), region = 44  ;;  %s298_s16 = sand.u32 (%p4691_p3), 1, %s4546_s11  }
  0x24   : > { %s3847_s20 = sshll.u32 (%p4691_p3), %s4558_s14, 2  ;;  %s3846_s21 = sshll.u32 (%p4691_p3), %s298_s16, 4 }
  0x25   : > { %s7895_s4 = sld [smem:[#allocation187_spill]] (%p4691_p3)  ;;  %s300_s23 = scalar_lea.vmem (%p4691_p3), [#allocation7], %s3846_s21 }
  0x2b   : > { %s302_s17 = scalar_lea.vmem %s7895_s4, %s3847_s20 }
  0x2c   : > { %v318_v1 = vld [vmem:[%s302_s17] sm:$0xf]  ;;  %v320_v2 = vld [vmem:[%s302_s17 + $0x8] sm:$0xf]  ;;  %v322_v3 = vld [vmem:[%s302_s17 + $0x10] sm:$0xf] }
  0x2d   : > { %319 = vst [vmem:[%s300_s23] sm:$0xf] %v318_v1  ;;  %321 = vst [vmem:[%s300_s23 + $0x4] sm:$0xf] %v320_v2  ;;  %v324_v4 = vld [vmem:[%s302_s17 + $0x18] sm:$0xf] }
  0x2e   : > { %323 = vst [vmem:[%s300_s23 + $0x8] sm:$0xf] %v322_v3  ;;  %325 = vst [vmem:[%s300_s23 + $0xc] sm:$0xf] %v324_v4 }
  0x2f PF: > { %p3848_p0 = scmp.ge.s32.totalorder %s4566_s15, 1  ;;  %p361_p1 = scmp.lt.s32.totalorder %s4566_s15, 5 }
  0x31   : > { %p362_p2 = pnand %p3848_p0, %p361_p1 }
  0x33   : > { %365 = sbr.rel (%p362_p2) target bundleno = 2183 (0x887), region = 89 }
  0x3a   : > { %s368_s19 = sand.u32 1, %s4542_s10   ;;  %s7589_s22 = sand.u32 1, %s4534_s30  }
  0x3b   : > { %s4730_s16 = sshll.u32 %s368_s19, 4  ;;  %s4734_s20 = sshll.u32 %s7589_s22, 3 }
  0x3c   : > { %s3851_s21 = sshll.u32 %s4554_s13, 4  ;;  %p426_p3 = scmp.lt.s32.totalorder %s4550_s12, 1 }
  0x3d   : > { %p415_p4 = scmp.lt.s32.totalorder %s3851_s21, 31  ;;  %s370_s27 = scalar_lea.vmem [#allocation7], %s4730_s16 }
  0x3e   : > { %s4739_s25 = scalar_select %p426_p3, %s4550_s12, 1 }
  0x3f   : > { %s8460_s21 = smov (!%p415_p4, %s3851_s21), 31  ;;  %s413_s9 = scalar_lea.vmem [#allocation8], %s4734_s20 }
  0x40   : > { %s428_s4 = scalar_lea.vmem %s7581_s5, %s4739_s25  ;;  %s3852_s10 = sshll.u32 %s8460_s21, 2 }
  0x41   : > { %s3854_s18 = sshll.u32 %s8460_s21, 3  ;;  %s4748_s14 = scalar_lea.vmem %s7576_s0, %s3852_s10 }
  0x42   : > { %s4753_s11 = scalar_lea.vmem %s7577_s1, %s3854_s18  ;;  %p3855_p5 = scmp.ne.s32.totalorder %s4550_s12, 0 }
  0x43   : > { %vm434_vm0 = vcmask (!%p3855_p5), 7168   ;;  %v4568_v5 = vmov (!%p3855_p5), -1e+30   ;;  %v4569_v6 = vmov (!%p3855_p5), 0.0  }
  0x44   : > { %433 = sbr.rel (%p3855_p5) target bundleno = 100 (0x64), region = 97  ;;  %435 = vst.msk [vmem:[#allocation2] sm:$0xff] (!%p3855_p5), %vm434_vm0, %v4568_v5  ;;  %436 = vst.msk [vmem:[#allocation2 + $0x8] sm:$0xff] (!%p3855_p5), %vm434_vm0, %v4568_v5 }
  0x45   : > { %437 = vst.msk [vmem:[#allocation2 + $0x10] sm:$0xff] (!%p3855_p5), %vm434_vm0, %v4568_v5  ;;  %438 = vst.msk [vmem:[#allocation2 + $0x18] sm:$0xff] (!%p3855_p5), %vm434_vm0, %v4568_v5 }
  0x46   : > { %439 = vst.msk [vmem:[#allocation2 + $0x20] sm:$0xff] (!%p3855_p5), %vm434_vm0, %v4568_v5  ;;  %440 = vst.msk [vmem:[#allocation2 + $0x28] sm:$0xff] (!%p3855_p5), %vm434_vm0, %v4568_v5 }
  0x47   : > { %441 = vst.msk [vmem:[#allocation2 + $0x30] sm:$0xff] (!%p3855_p5), %vm434_vm0, %v4568_v5  ;;  %442 = vst.msk [vmem:[#allocation2 + $0x38] sm:$0xff] (!%p3855_p5), %vm434_vm0, %v4568_v5 }
  0x48   : > { %443 = vst.msk [vmem:[#allocation2 + $0x40] sm:$0xff] (!%p3855_p5), %vm434_vm0, %v4568_v5  ;;  %444 = vst.msk [vmem:[#allocation2 + $0x48] sm:$0xff] (!%p3855_p5), %vm434_vm0, %v4568_v5 }
  0x49   : > { %445 = vst.msk [vmem:[#allocation2 + $0x50] sm:$0xff] (!%p3855_p5), %vm434_vm0, %v4568_v5  ;;  %446 = vst.msk [vmem:[#allocation2 + $0x58] sm:$0xff] (!%p3855_p5), %vm434_vm0, %v4568_v5 }
  0x4a   : > { %447 = vst.msk [vmem:[#allocation2 + $0x60] sm:$0xff] (!%p3855_p5), %vm434_vm0, %v4568_v5  ;;  %448 = vst.msk [vmem:[#allocation2 + $0x68] sm:$0xff] (!%p3855_p5), %vm434_vm0, %v4568_v5 }
  0x4b   : > { %449 = vst.msk [vmem:[#allocation2 + $0x70] sm:$0xff] %vm434_vm0, %v4568_v5  ;;  %450 = vst.msk [vmem:[#allocation2 + $0x78] sm:$0xff] %vm434_vm0, %v4568_v5 }
  0x4c   : > { %451 = vst.msk [vmem:[#allocation3] sm:$0xff] %vm434_vm0, %v4569_v6  ;;  %452 = vst.msk [vmem:[#allocation3 + $0x8] sm:$0xff] %vm434_vm0, %v4569_v6 }
  0x4d   : > { %453 = vst.msk [vmem:[#allocation3 + $0x10] sm:$0xff] %vm434_vm0, %v4569_v6  ;;  %454 = vst.msk [vmem:[#allocation3 + $0x18] sm:$0xff] %vm434_vm0, %v4569_v6 }
  0x4e   : > { %455 = vst.msk [vmem:[#allocation3 + $0x20] sm:$0xff] %vm434_vm0, %v4569_v6  ;;  %456 = vst.msk [vmem:[#allocation3 + $0x28] sm:$0xff] %vm434_vm0, %v4569_v6 }
  0x4f   : > { %457 = vst.msk [vmem:[#allocation3 + $0x30] sm:$0xff] %vm434_vm0, %v4569_v6  ;;  %458 = vst.msk [vmem:[#allocation3 + $0x38] sm:$0xff] %vm434_vm0, %v4569_v6 }
  0x50   : > { %459 = vst.msk [vmem:[#allocation3 + $0x40] sm:$0xff] %vm434_vm0, %v4569_v6  ;;  %460 = vst.msk [vmem:[#allocation3 + $0x48] sm:$0xff] %vm434_vm0, %v4569_v6 }
  0x51   : > { %461 = vst.msk [vmem:[#allocation3 + $0x50] sm:$0xff] %vm434_vm0, %v4569_v6  ;;  %462 = vst.msk [vmem:[#allocation3 + $0x58] sm:$0xff] %vm434_vm0, %v4569_v6 }
  0x52   : > { %463 = vst.msk [vmem:[#allocation3 + $0x60] sm:$0xff] %vm434_vm0, %v4569_v6  ;;  %464 = vst.msk [vmem:[#allocation3 + $0x68] sm:$0xff] %vm434_vm0, %v4569_v6 }
  0x53   : > { %465 = vst.msk [vmem:[#allocation3 + $0x70] sm:$0xff] %vm434_vm0, %v4569_v6  ;;  %466 = vst.msk [vmem:[#allocation3 + $0x78] sm:$0xff] %vm434_vm0, %v4569_v6 }
  0x54   : > { %467 = vst.msk [vmem:[#allocation4] sm:$0xff] %vm434_vm0, %v4569_v6  ;;  %468 = vst.msk [vmem:[#allocation4 + $0x8] sm:$0xff] %vm434_vm0, %v4569_v6 }
  0x55   : > { %469 = vst.msk [vmem:[#allocation4 + $0x10] sm:$0xff] %vm434_vm0, %v4569_v6  ;;  %470 = vst.msk [vmem:[#allocation4 + $0x18] sm:$0xff] %vm434_vm0, %v4569_v6 }
  0x56   : > { %471 = vst.msk [vmem:[#allocation4 + $0x20] sm:$0xff] %vm434_vm0, %v4569_v6  ;;  %472 = vst.msk [vmem:[#allocation4 + $0x28] sm:$0xff] %vm434_vm0, %v4569_v6 }
  0x57   : > { %473 = vst.msk [vmem:[#allocation4 + $0x30] sm:$0xff] %vm434_vm0, %v4569_v6  ;;  %474 = vst.msk [vmem:[#allocation4 + $0x38] sm:$0xff] %vm434_vm0, %v4569_v6 }
  0x58   : > { %475 = vst.msk [vmem:[#allocation4 + $0x40] sm:$0xff] %vm434_vm0, %v4569_v6  ;;  %476 = vst.msk [vmem:[#allocation4 + $0x48] sm:$0xff] %vm434_vm0, %v4569_v6 }
  0x59   : > { %477 = vst.msk [vmem:[#allocation4 + $0x50] sm:$0xff] %vm434_vm0, %v4569_v6  ;;  %478 = vst.msk [vmem:[#allocation4 + $0x58] sm:$0xff] %vm434_vm0, %v4569_v6 }
  0x5a   : > { %479 = vst.msk [vmem:[#allocation4 + $0x60] sm:$0xff] %vm434_vm0, %v4569_v6  ;;  %480 = vst.msk [vmem:[#allocation4 + $0x68] sm:$0xff] %vm434_vm0, %v4569_v6 }
  0x5b   : > { %481 = vst.msk [vmem:[#allocation4 + $0x70] sm:$0xff] %vm434_vm0, %v4569_v6  ;;  %482 = vst.msk [vmem:[#allocation4 + $0x78] sm:$0xff] %vm434_vm0, %v4569_v6 }
  0x5c   : > { %483 = vst.msk [vmem:[#allocation5] sm:$0xff] %vm434_vm0, %v4569_v6  ;;  %484 = vst.msk [vmem:[#allocation5 + $0x8] sm:$0xff] %vm434_vm0, %v4569_v6 }
  0x5d   : > { %485 = vst.msk [vmem:[#allocation5 + $0x10] sm:$0xff] %vm434_vm0, %v4569_v6  ;;  %486 = vst.msk [vmem:[#allocation5 + $0x18] sm:$0xff] %vm434_vm0, %v4569_v6 }
  0x5e   : > { %487 = vst.msk [vmem:[#allocation5 + $0x20] sm:$0xff] %vm434_vm0, %v4569_v6  ;;  %488 = vst.msk [vmem:[#allocation5 + $0x28] sm:$0xff] %vm434_vm0, %v4569_v6 }
  0x5f   : > { %489 = vst.msk [vmem:[#allocation5 + $0x30] sm:$0xff] %vm434_vm0, %v4569_v6  ;;  %490 = vst.msk [vmem:[#allocation5 + $0x38] sm:$0xff] %vm434_vm0, %v4569_v6 }
  0x60   : > { %491 = vst.msk [vmem:[#allocation5 + $0x40] sm:$0xff] %vm434_vm0, %v4569_v6  ;;  %492 = vst.msk [vmem:[#allocation5 + $0x48] sm:$0xff] %vm434_vm0, %v4569_v6 }
  0x61   : > { %493 = vst.msk [vmem:[#allocation5 + $0x50] sm:$0xff] %vm434_vm0, %v4569_v6  ;;  %494 = vst.msk [vmem:[#allocation5 + $0x58] sm:$0xff] %vm434_vm0, %v4569_v6 }
  0x62   : > { %495 = vst.msk [vmem:[#allocation5 + $0x60] sm:$0xff] %vm434_vm0, %v4569_v6  ;;  %496 = vst.msk [vmem:[#allocation5 + $0x68] sm:$0xff] %vm434_vm0, %v4569_v6 }
  0x63   : > { %497 = vst.msk [vmem:[#allocation5 + $0x70] sm:$0xff] %vm434_vm0, %v4569_v6  ;;  %498 = vst.msk [vmem:[#allocation5 + $0x78] sm:$0xff] %vm434_vm0, %v4569_v6 }
  0x64 PF: > { %v4119_v7 = vld [vmem:[%s370_s27] sm:$0xff]   ;;  %v4120_v8 = vld [vmem:[%s370_s27 + $0x8] sm:$0xff]   ;;  %vm578_vm1 = vcmask 261120   ;;  %v4570_v14 = vmov 1   ;;  %v4571_v45 = vmov 0   ;;  %v7597_v61 = vlaneseq  ;;  %s3875_s7 = sshll.u32 %s4550_s12, 7 }
  0x65   : > { %3937 = vmatprep.subr.bf16.mxu0 %v4119_v7  ;;  %4013 = vmatprep.subr.bf16.mxu1 %v4119_v7  ;;  %v4827_v9 = vld [vmem:[%s4748_s14] sm:$0xff]   ;;  %v4833_v11 = vld [vmem:[%s4748_s14 + $0x8] sm:$0xff]   ;;  %v4843_v13 = vld [vmem:[%s4748_s14 + $0x10] sm:$0xff]   ;;  %p3876_p6 = scmp.ne.s32.totalorder %s4550_s12, 1 }
  0x66   : > { %7896 = vst [vmem:[#allocation19_spill] sm:$0xff] %v4827_v9  ;;  %3938 = vmatpush3.bf16.msra.mxu0 %v4119_v7  ;;  %4015 = vmatpush3.bf16.msra.mxu1 %v4119_v7  ;;  %v4830_v10 = vld [vmem:[%s4748_s14 + $0x20] sm:$0xff]   ;;  %7898 = vst [vmem:[#allocation21_spill] sm:$0xff] %v4833_v11  ;;  %v4840_v12 = vld [vmem:[%s4748_s14 + $0x28] sm:$0xff]   ;;  %v5069_v6 = vand.u32 127, %v7597_v61 }
  0x67   : > { %7897 = vst [vmem:[#allocation20_spill] sm:$0xff] %v4830_v10  ;;  %3939 = vmatprep.subr.bf16.mxu0 %v4120_v8  ;;  %4014 = vmatprep.subr.bf16.mxu1 %v4120_v8  ;;  %7899 = vst [vmem:[#allocation22_spill] sm:$0xff] %v4840_v12  ;;  %v4846_v15 = vld [vmem:[%s4748_s14 + $0x30] sm:$0xff]   ;;  %v4853_v16 = vld [vmem:[%s4753_s11 + $0x8] sm:$0xff] }
  0x68   : > { %3941 = vmatprep.mubr.msk.bf16.mxu0 %vm578_vm1, %v4827_v9  ;;  %3949 = vmatprep.mubr.msk.bf16.mxu1 %vm578_vm1, %v4830_v10  ;;  %7900 = vst [vmem:[#allocation23_spill] sm:$0xff] %v4843_v13  ;;  %7901 = vst [vmem:[#allocation24_spill] sm:$0xff] %v4846_v15  ;;  %v4856_v17 = vld [vmem:[%s4753_s11 + $0x10] sm:$0xff]  ;;  %vm7857_vm2 = vcmp.eq.s32.totalorder %v4853_v16, 4294967295  ;;  %v4870_v19 = vld [vmem:[%s4753_s11 + $0x18] sm:$0xff] }
  0x69   : > { %4116 = vset.pattern.permute.xlu1 %v4570_v14  ;;  %4115 = vset.pattern.permute.xlu0 %v4570_v14  ;;  %7902 = vst [vmem:[#allocation25_spill] sm:$0xff] %v4853_v16  ;;  %7903 = vst [vmem:[#allocation26_spill] sm:$0xff] %v4856_v17  ;;  %vm7856_vm3 = vcmp.eq.s32.totalorder %v4856_v17, 4294967295  ;;  %v4867_v18 = vsel %vm7857_vm2, 0, %v4853_v16  ;;  %v4874_v20 = vld [vmem:[%s4748_s14 + $0x18] sm:$0xff]   ;;  %vm7854_vm4 = vcmp.eq.s32.totalorder %v4870_v19, 4294967295  ;;  %v751_v14 = vstv %s3875_s7 }
  0x6a   : > { %3940 = vmatpush3.bf16.msra.mxu0 %v4120_v8  ;;  %4016 = vmatpush3.bf16.msra.mxu1 %v4120_v8  ;;  %7904 = vst [vmem:[#allocation27_spill] sm:$0xff] %v4867_v18  ;;  %7905 = vst [vmem:[#allocation28_spill] sm:$0xff] %v4870_v19  ;;  %v4877_v21 = vld [vmem:[%s4748_s14 + $0x38] sm:$0xff]   ;;  %v4882_v22 = vsel %vm7856_vm3, 0, %v4856_v17  ;;  %v4886_v23 = vld [vmem:[%s4753_s11] sm:$0xff]  ;;  %v4909_v27 = vsel %vm7854_vm4, 0, %v4870_v19 }
  0x6b   : > { %1126 = vperm.xlu1 %4116, %v4867_v18   ;;  %7906 = vst [vmem:[#allocation29_spill] sm:$0xff] %v4874_v20  ;;  %7907 = vst [vmem:[#allocation30_spill] sm:$0xff] %v4877_v21  ;;  %v4889_v24 = vld [vmem:[%s4753_s11 + $0x48] sm:$0xff]  ;;  %v4892_v25 = vld [vmem:[%s4753_s11 + $0x20] sm:$0xff]  ;;  %vm7860_vm5 = vcmp.eq.s32.totalorder %v4886_v23, 4294967295 }
  0x6c   : > { %7908 = vst [vmem:[#allocation31_spill] sm:$0xff] %v4882_v22  ;;  %7909 = vst [vmem:[#allocation32_spill] sm:$0xff] %v4886_v23  ;;  %v4899_v26 = vsel %vm7860_vm5, 0, %v4886_v23  ;;  %vm7831_vm6 = vcmp.eq.s32.totalorder %v4889_v24, 4294967295  ;;  %v4912_v28 = vld [vmem:[%s4753_s11 + $0x58] sm:$0xff]  ;;  %vm7850_vm7 = vcmp.eq.s32.totalorder %v4892_v25, 4294967295 }
  0x6d   : > { %3942 = vmatmul.mubr.msk.bf16.vlgmr.msra.gmra.mrb[0].mxu0 %vm578_vm1, %v4833_v11  ;;  %3950 = vmatmul.mubr.msk.bf16.vlgmr.msra.gmra.mrb[0].mxu1 %vm578_vm1, %v4840_v12  ;;  %7910 = vst [vmem:[#allocation33_spill] sm:$0xff] %v4889_v24  ;;  %7911 = vst [vmem:[#allocation34_spill] sm:$0xff] %v4892_v25  ;;  %v4917_v29 = vld [vmem:[%s4753_s11 + $0x28] sm:$0xff]  ;;  %v4922_v30 = vsel %vm7831_vm6, 0, %v4889_v24  ;;  %vm7613_vm8 = vcmp.eq.s32.totalorder %v4912_v28, 4294967295  ;;  %v4929_v31 = vsel %vm7850_vm7, 0, %v4892_v25 }
  0x6e   : > { %3945 = vmatprep.mubr.msk.bf16.mxu0 %vm578_vm1, %v4843_v13  ;;  %3953 = vmatprep.mubr.msk.bf16.mxu1 %vm578_vm1, %v4846_v15  ;;  %7912 = vst [vmem:[#allocation35_spill] sm:$0xff] %v4899_v26  ;;  %7913 = vst [vmem:[#allocation36_spill] sm:$0xff] %v4909_v27  ;;  %v4932_v32 = vld [vmem:[%s4753_s11 + $0x68] sm:$0xff]  ;;  %vm7849_vm9 = vcmp.eq.s32.totalorder %v4917_v29, 4294967295  ;;  %v4937_v33 = vld [vmem:[%s4753_s11 + $0x30] sm:$0xff]  ;;  %v4942_v34 = vsel %vm7613_vm8, 0, %v4912_v28 }
  0x6f   : > { %1129 = vperm.xlu1 %4116, %v4882_v22   ;;  %7914 = vst [vmem:[#allocation37_spill] sm:$0xff] %v4912_v28  ;;  %1123 = vperm.xlu0 %4115, %v4899_v26   ;;  %7915 = vst [vmem:[#allocation38_spill] sm:$0xff] %v4917_v29  ;;  %vm7609_vm10 = vcmp.eq.s32.totalorder %v4932_v32, 4294967295  ;;  %v4949_v35 = vsel %vm7849_vm9, 0, %v4917_v29  ;;  %v4952_v36 = vld [vmem:[%s4753_s11 + $0x78] sm:$0xff]  ;;  %vm7840_vm11 = vcmp.eq.s32.totalorder %v4937_v33, 4294967295 }
  0x70   : > { %7916 = vst [vmem:[#allocation39_spill] sm:$0xff] %v4922_v30  ;;  %7917 = vst [vmem:[#allocation40_spill] sm:$0xff] %v4929_v31  ;;  %v4957_v37 = vld [vmem:[%s4753_s11 + $0x38] sm:$0xff]  ;;  %v4962_v38 = vsel %vm7609_vm10, 0, %v4932_v32  ;;  %vm7592_vm12 = vcmp.eq.s32.totalorder %v4952_v36, 4294967295  ;;  %v4969_v39 = vsel %vm7840_vm11, 0, %v4937_v33 }
  0x71   : > { %7918 = vst [vmem:[#allocation41_spill] sm:$0xff] %v4932_v32  ;;  %7919 = vst [vmem:[#allocation42_spill] sm:$0xff] %v4937_v33  ;;  %vm7836_vm13 = vcmp.eq.s32.totalorder %v4957_v37, 4294967295  ;;  %v4974_v40 = vld [vmem:[%s4753_s11 + $0x40] sm:$0xff]  ;;  %v4979_v41 = vsel %vm7592_vm12, 0, %v4952_v36  ;;  %v4990_v43 = vld [vmem:[%s4753_s11 + $0x50] sm:$0xff] }
  0x72   : > { %7920 = vst [vmem:[#allocation43_spill] sm:$0xff] %v4942_v34  ;;  %7921 = vst [vmem:[#allocation44_spill] sm:$0xff] %v4949_v35  ;;  %v4985_v42 = vsel %vm7836_vm13, 0, %v4957_v37  ;;  %vm7832_vm14 = vcmp.eq.s32.totalorder %v4974_v40, 4294967295  ;;  %vm7618_vm15 = vcmp.eq.s32.totalorder %v4990_v43, 4294967295  ;;  %v5000_v46 = vld [vmem:[%s4753_s11 + $0x60] sm:$0xff] }
  0x73   : > { %1132 = vperm.xlu1 %4116, %v4909_v27   ;;  %1150 = vperm.xlu0 %4115, %v4922_v30   ;;  %7922 = vst [vmem:[#allocation45_spill] sm:$0xff] %v4952_v36  ;;  %7923 = vst [vmem:[#allocation46_spill] sm:$0xff] %v4957_v37  ;;  %v4996_v44 = vsel %vm7832_vm14, 0, %v4974_v40  ;;  %v5007_v47 = vsel %vm7618_vm15, 0, %v4990_v43  ;;  %vm7612_vm0 = vcmp.eq.s32.totalorder %v5000_v46, 4294967295  ;;  %v5011_v48 = vld [vmem:[%s4753_s11 + $0x70] sm:$0xff] }
  0x74   : > { %7924 = vst [vmem:[#allocation47_spill] sm:$0xff] %v4962_v38  ;;  %7925 = vst [vmem:[#allocation48_spill] sm:$0xff] %v4969_v39  ;;  %v5018_v49 = vsel %vm7612_vm0, 0, %v5000_v46  ;;  %vm7604_vm12 = vcmp.eq.s32.totalorder %v5011_v48, 4294967295  ;;  %v5055_v57 = vld [vmem:[%s428_s4] ss:$0 sm:$0xff] }
  0x75   : > { %3946 = vmatmul.mubr.msk.bf16.gmra.mrb[4].mxu0 %vm578_vm1, %v4874_v20  ;;  %3954 = vmatmul.mubr.msk.bf16.gmra.mrb[4].mxu1 %vm578_vm1, %v4877_v21  ;;  %7926 = vst [vmem:[#allocation49_spill] sm:$0xff] %v4974_v40  ;;  %7927 = vst [vmem:[#allocation50_spill] sm:$0xff] %v4979_v41  ;;  %v5025_v50 = vsel %vm7604_vm12, 0, %v5011_v48  ;;  %v5206_v22 = vld [vmem:[#allocation2 + $0x18] sm:$0xff]  ;;  %v1112_v10 = vld [vmem:[#allocation4 + $0x30] sm:$0xff] }
  0x76   : > { %7928 = vst [vmem:[#allocation51_spill] sm:$0xff] %v4985_v42  ;;  %7929 = vst [vmem:[#allocation52_spill] sm:$0xff] %v4990_v43  ;;  %v1115_v9 = vld [vmem:[#allocation4 + $0x48] sm:$0xff] }
  0x77   : > { %1135 = vperm.xlu1 %4116, %v4929_v31   ;;  %1156 = vperm.xlu0 %4115, %v4942_v34   ;;  %7930 = vst [vmem:[#allocation53_spill] sm:$0xff] %v4996_v44  ;;  %7931 = vst [vmem:[#allocation54_spill] sm:$0xff] %v5000_v46  ;;  %v5196_v31 = vld [vmem:[#allocation2 + $0x50] sm:$0xff] }
  0x78   : > { %7932 = vst [vmem:[#allocation55_spill] sm:$0xff] %v5007_v47  ;;  %7933 = vst [vmem:[#allocation56_spill] sm:$0xff] %v5011_v48 }
  0x79   : > { %7934 = vst [vmem:[#allocation57_spill] sm:$0xff] %v5018_v49  ;;  %7935 = vst [vmem:[#allocation58_spill] sm:$0xff] %v5025_v50 }
  0x7a   : > { %7938 = vst [vmem:[#allocation61_spill] sm:$0xff] %v5069_v6  ;;  %7954 = vst [vmem:[#allocation77_spill] sm:$0xff] %v5206_v22 }
  0x7b   : > { %1138 = vperm.xlu1 %4116, %v4949_v35   ;;  %1162 = vperm.xlu0 %4115, %v4962_v38  }
  0x7f   : > { %1141 = vperm.xlu1 %4116, %v4969_v39   ;;  %1168 = vperm.xlu0 %4115, %v4979_v41  }
  0x83   : > { %1144 = vperm.xlu1 %4116, %v4985_v42   ;;  %4118 = vset.pattern.permute.xlu0 %v4571_v45  ;;  %v5198_v42 = vld [vmem:[#allocation2 + $0x10] sm:$0xff] }
  0x84   : > { %1270 = vperm.xlu0 %4118, %v4853_v16   ;;  %v1114_v16 = vld [vmem:[#allocation4 + $0x40] sm:$0xff] }
  0x87   : > { %1147 = vperm.xlu1 %4116, %v4996_v44  }
  0x88   : > { %1297 = vperm.xlu0 %4118, %v4990_v43   ;;  %v5208_v43 = vld [vmem:[#allocation2] sm:$0xff] }
  0x8b   : > { %1153 = vperm.xlu1 %4116, %v5007_v47  }
  0x8f   : > { %1159 = vperm.xlu1 %4116, %v5018_v49  }
  0x93   : > { %1165 = vperm.xlu1 %4116, %v5025_v50   ;;  %v5080_v50 = vadd.s32 %v751_v14, %v5069_v6 }
  0x97   : > { %4117 = vset.pattern.permute.xlu1 %v4571_v45 }
  0x98   : > { %1267 = vperm.xlu1 %4117, %v4886_v23   ;;  %v1116_v23 = vld [vmem:[#allocation4 + $0x50] sm:$0xff] }
  0x9c   : > { %1273 = vperm.xlu1 %4117, %v4856_v17  }
  0xa0   : > { %1276 = vperm.xlu1 %4117, %v4870_v19  }
  0xa4   : > { %1279 = vperm.xlu1 %4117, %v4892_v25  }
  0xa8   : > { %1282 = vperm.xlu1 %4117, %v4917_v29  }
  0xac   : > { %1285 = vperm.xlu1 %4117, %v4937_v33  }
  0xb0   : > { %1288 = vperm.xlu1 %4117, %v4957_v37  }
  0xb4   : > { %1291 = vperm.xlu1 %4117, %v4974_v40   ;;  %v5225_v40 = vld [vmem:[#allocation2 + $0x58] sm:$0xff] }
  0xb5   : > { %7957 = vst [vmem:[#allocation80_spill] sm:$0xff] %v5225_v40 }
  0xb8   : > { %1294 = vperm.xlu1 %4117, %v4889_v24   ;;  %v1106_v24 = vld [vmem:[#allocation4] sm:$0xff] }
  0xbc   : > { %1300 = vperm.xlu1 %4117, %v4912_v28   ;;  %v1108_v28 = vld [vmem:[#allocation4 + $0x10] sm:$0xff] }
  0xc0   : > { %1306 = vperm.xlu1 %4117, %v4932_v32  }
  0xc4   : > { %1312 = vperm.xlu1 %4117, %v4952_v36   ;;  %v5227_v36 = vld [vmem:[#allocation2 + $0x40] sm:$0xff] }
  0xea   : > { %v5040_v51 = vpop.permute.xlu1 %1126 }
  0xee   : > { %v1130_v52 = vpop.permute.xlu1 %1129 }
  0xef   : > { %vm1172_vm10 = vcmp.eq.s32.totalorder %v5080_v50, %v1130_v52 }
  0xf2   : > { %v5042_v53 = vpop.permute.xlu1 %1132 }
  0xf6   : > { %v5044_v54 = vpop.permute.xlu1 %1135 }
  0xfa   : > { %v5046_v55 = vpop.permute.xlu1 %1138 }
  0xfe   : > { %v5048_v56 = vpop.permute.xlu1 %1141 }
 0x102   : > { %v5057_v58 = vpop.permute.xlu1 %1144 }
 0x106   : > { %v1148_v45 = vpop.permute.xlu1 %1147 }
 0x107   : > { %vm1178_vm8 = vcmp.eq.s32.totalorder %v5080_v50, %v1148_v45 }
 0x140   : > { %v3943_v59 = vpop.f32.mrb[0].mxu0  ;;  %v3951_v60 = vpop.f32.mrb[0].mxu1 }
 0x141   : > { %v5060_v62 = vadd.f32 %v3943_v59, %v5055_v57  ;;  %v5063_v63 = vadd.f32 %v3951_v60, %v5055_v57  ;;  %v637_v0 = vpop.f32.mrb[1].mxu0  ;;  %v669_v1 = vpop.f32.mrb[1].mxu1 }
 0x142   : > { %v3944_v2 = vpop.f32.mrb[2].mxu0  ;;  %v3952_v3 = vpop.f32.mrb[2].mxu1  ;;  %v5072_v7 = vadd.f32 %v5055_v57, %v637_v0  ;;  %v5083_v61 = vadd.f32 %v5055_v57, %v669_v1 }
 0x143   : > { %7936 = vst [vmem:[#allocation59_spill] sm:$0xff] %v5060_v62  ;;  %7937 = vst [vmem:[#allocation60_spill] sm:$0xff] %v5063_v63  ;;  %789 = vmax.xlane.f32.xlu0 %v5063_v63  ;;  %773 = vmax.xlane.f32.xlu1 %v5060_v62  ;;  %v640_v4 = vpop.f32.mrb[3].mxu0  ;;  %v672_v5 = vpop.f32.mrb[3].mxu1  ;;  %v5075_v8 = vadd.f32 %v3944_v2, %v5055_v57  ;;  %v5086_v0 = vadd.f32 %v3952_v3, %v5055_v57  ;;  %v1188_v1 = vsel %vm1172_vm10, %v5060_v62, 0.0 }
 0x144   : > { %7939 = vst [vmem:[#allocation62_spill] sm:$0xff] %v5072_v7  ;;  %v1124_v59 = vpop.permute.xlu0 %1123  ;;  %7941 = vst [vmem:[#allocation64_spill] sm:$0xff] %v5083_v61  ;;  %v1154_v3 = vpop.permute.xlu1 %1153  ;;  %v1194_v34 = vsel %vm1178_vm8, %v5083_v61, 0.0  ;;  %v5099_v52 = vadd.f32 %v5055_v57, %v640_v4  ;;  %v5102_v35 = vadd.f32 %v5055_v57, %v672_v5  ;;  %vm1171_vm8 = vcmp.eq.s32.totalorder %v5080_v50, %v5040_v51 }
 0x145   : > { %7940 = vst [vmem:[#allocation63_spill] sm:$0xff] %v5075_v8  ;;  %7942 = vst [vmem:[#allocation65_spill] sm:$0xff] %v5086_v0  ;;  %vm1170_vm12 = vcmp.eq.s32.totalorder %v5080_v50, %v1124_v59  ;;  %vm1180_vm0 = vcmp.eq.s32.totalorder %v5080_v50, %v1154_v3 }
 0x146   : > { %v1186_v14 = vsel %vm1170_vm12, %v5072_v7, 0.0  ;;  %v1196_v59 = vsel %vm1180_vm0, %v5063_v63, 0.0  ;;  %7943 = vst [vmem:[#allocation66_spill] sm:$0xff] %v5099_v52  ;;  %7944 = vst [vmem:[#allocation67_spill] sm:$0xff] %v5102_v35  ;;  %vm1173_vm12 = vcmp.eq.s32.totalorder %v5080_v50, %v5042_v53  ;;  %vm1176_vm0 = vcmp.eq.s32.totalorder %v5080_v50, %v5048_v56 }
 0x147   : > { %775 = vmax.xlane.f32.xlu1 %v5075_v8  ;;  %769 = vmax.xlane.f32.xlu0 %v5072_v7  ;;  %v1187_v5 = vsel %vm1171_vm8, %v5099_v52, 0.0  ;;  %vm1175_vm8 = vcmp.eq.s32.totalorder %v5080_v50, %v5046_v55 }
 0x148   : > { %v3947_v60 = vpop.f32.mrb[4].mxu0  ;;  %v3955_v49 = vpop.f32.mrb[4].mxu1 }
 0x149   : > { %v653_v2 = vpop.f32.mrb[5].mxu0  ;;  %v685_v41 = vpop.f32.mrb[5].mxu1  ;;  %v5110_v45 = vadd.f32 %v3947_v60, %v5055_v57 }
 0x14a   : > { %v3948_v38 = vpop.f32.mrb[6].mxu0  ;;  %v3956_v44 = vpop.f32.mrb[6].mxu1  ;;  %v5130_v56 = vadd.f32 %v5055_v57, %v653_v2  ;;  %v5147_v2 = vadd.f32 %v5055_v57, %v685_v41 }
 0x14b   : > { %v688_v30 = vpop.f32.mrb[7].mxu1  ;;  %791 = vmax.xlane.f32.xlu1 %v5086_v0  ;;  %v656_v47 = vpop.f32.mrb[7].mxu0  ;;  %785 = vmax.xlane.f32.xlu0 %v5083_v61  ;;  %7945 = vst [vmem:[#allocation68_spill] sm:$0xff] %v5110_v45  ;;  %v5122_v53 = vadd.f32 %v3948_v38, %v5055_v57  ;;  %v5127_v51 = vadd.f32 %v3956_v44, %v5055_v57 }
 0x14c   : > { %v1151_v6 = vpop.permute.xlu0 %1150  ;;  %7948 = vst [vmem:[#allocation71_spill] sm:$0xff] %v5130_v56  ;;  %v5142_v44 = vadd.f32 %v5055_v57, %v656_v47  ;;  %7951 = vst [vmem:[#allocation74_spill] sm:$0xff] %v5147_v2 }
 0x14d   : > { %vm1179_vm15 = vcmp.eq.s32.totalorder %v5080_v50, %v1151_v6  ;;  %7946 = vst [vmem:[#allocation69_spill] sm:$0xff] %v5122_v53  ;;  %7947 = vst [vmem:[#allocation70_spill] sm:$0xff] %v5127_v51  ;;  %v5135_v6 = vadd.f32 %v3955_v49, %v5055_v57  ;;  %v5150_v49 = vadd.f32 %v5055_v57, %v688_v30 }
 0x14e   : > { %v1195_v60 = vsel %vm1179_vm15, %v5102_v35, 0.0  ;;  %7950 = vst [vmem:[#allocation73_spill] sm:$0xff] %v5142_v44  ;;  %v1191_v41 = vsel %vm1175_vm8, %v5142_v44, 0.0 }
 0x14f   : > { %1206 = vadd.xlane.f32.xlu0 %v1188_v1  ;;  %1202 = vadd.xlane.f32.xlu1 %v1186_v14  ;;  %v1192_v14 = vsel %vm1176_vm0, %v5110_v45, 0.0  ;;  %7949 = vst [vmem:[#allocation72_spill] sm:$0xff] %v5135_v6  ;;  %7952 = vst [vmem:[#allocation75_spill] sm:$0xff] %v5150_v49 }
 0x150   : > { %v1157_v1 = vpop.permute.xlu0 %1156 }
 0x151   : > { %vm1181_vm10 = vcmp.eq.s32.totalorder %v5080_v50, %v1157_v1 }
 0x152   : > { %v1197_v4 = vsel %vm1181_vm10, %v5086_v0, 0.0  ;;  %vm1174_vm10 = vcmp.eq.s32.totalorder %v5080_v50, %v5044_v54  ;;  %v1160_v54 = vpop.permute.xlu1 %1159 }
 0x153   : > { %1222 = vadd.xlane.f32.xlu0 %v1196_v59  ;;  %1218 = vadd.xlane.f32.xlu1 %v1194_v34  ;;  %v1189_v34 = vsel %vm1173_vm12, %v5075_v8, 0.0  ;;  %v1190_v38 = vsel %vm1174_vm10, %v5130_v56, 0.0  ;;  %vm1182_vm15 = vcmp.eq.s32.totalorder %v5080_v50, %v1160_v54  ;;  %vm1177_vm12 = vcmp.eq.s32.totalorder %v5080_v50, %v5057_v58 }
 0x154   : > { %v1198_v47 = vsel %vm1182_vm15, %v5147_v2, 0.0  ;;  %v1193_v3 = vsel %vm1177_vm12, %v5122_v53, 0.0  ;;  %v1163_v30 = vpop.permute.xlu0 %1162  ;;  %vm1073_vm10 = vcmask 7168  }
 0x155   : > { %vm1183_vm0 = vcmp.eq.s32.totalorder %v5080_v50, %v1163_v30 }
 0x156   : > { %v1199_v57 = vsel %vm1183_vm0, %v5150_v49, 0.0  ;;  %v5164_v59 = vpop.permute.xlu1 %1165 }
 0x157   : > { %771 = vmax.xlane.f32.xlu0 %v5099_v52  ;;  %787 = vmax.xlane.f32.xlu1 %v5102_v35 }
 0x158   : > { %v5184_v54 = vpop.permute.xlu0 %1168 }
 0x159   : > { %vm1185_vm15 = vcmp.eq.s32.totalorder %v5080_v50, %v5184_v54 }
 0x15a   : > { %v5166_v1 = vpop.permute.xlu1 %1267 }
 0x15b   : > { %1208 = vadd.xlane.f32.xlu0 %v1189_v34  ;;  %1224 = vadd.xlane.f32.xlu1 %v1197_v4 }
 0x15e   : > { %v5168_v58 = vpop.permute.xlu1 %1273 }
 0x15f   : > { %1204 = vadd.xlane.f32.xlu0 %v1187_v5  ;;  %1214 = vadd.xlane.f32.xlu1 %v1192_v14 }
 0x162   : > { %v5170_v34 = vpop.permute.xlu1 %1276 }
 0x163   : > { %1220 = vadd.xlane.f32.xlu0 %v1195_v60  ;;  %783 = vmax.xlane.f32.xlu1 %v5122_v53  ;;  %vm1317_vm8 = vcmp.eq.s32.totalorder %v5080_v50, %v5170_v34 }
 0x166   : > { %v5172_v4 = vpop.permute.xlu1 %1279 }
 0x167   : > { %781 = vmax.xlane.f32.xlu0 %v5110_v45  ;;  %799 = vmax.xlane.f32.xlu1 %v5127_v51 }
 0x16a   : > { %v5174_v55 = vpop.permute.xlu1 %1282 }
 0x16b   : > { %797 = vmax.xlane.f32.xlu0 %v5135_v6  ;;  %1210 = vadd.xlane.f32.xlu1 %v1190_v38  ;;  %vm1319_vm0 = vcmp.eq.s32.totalorder %v5080_v50, %v5174_v55 }
 0x16c   : > { %v1335_v54 = vsel %vm1319_vm0, %v5142_v44, 0.0  ;;  %vm1184_vm0 = vcmp.eq.s32.totalorder %v5080_v50, %v5164_v59 }
 0x16e   : > { %v5176_v5 = vpop.permute.xlu1 %1285 }
 0x16f   : > { %777 = vmax.xlane.f32.xlu0 %v5130_v56  ;;  %779 = vmax.xlane.f32.xlu1 %v5142_v44 }
 0x172   : > { %v5178_v14 = vpop.permute.xlu1 %1288 }
 0x173   : > { %793 = vmax.xlane.f32.xlu0 %v5147_v2  ;;  %795 = vmax.xlane.f32.xlu1 %v5150_v49 }
 0x176   : > { %v5180_v60 = vpop.permute.xlu1 %1291 }
 0x177   : > { %1226 = vadd.xlane.f32.xlu0 %v1198_v47 }
 0x17a   : > { %v5182_v38 = vpop.permute.xlu1 %1294 }
 0x17b   : > { %1216 = vadd.xlane.f32.xlu0 %v1193_v3  ;;  %v5188_v3 = vpop.permute.xlu0 %1270 }
 0x17c   : > { %vm1315_vm12 = vcmp.eq.s32.totalorder %v5080_v50, %v5188_v3 }
 0x17e   : > { %v5186_v47 = vpop.permute.xlu1 %1300 }
 0x17f   : > { %1212 = vadd.xlane.f32.xlu0 %v1191_v41  ;;  %v5192_v41 = vpop.permute.xlu0 %1297 }
 0x182   : > { %v5190_v30 = vpop.permute.xlu1 %1306 }
 0x183   : > { %1228 = vadd.xlane.f32.xlu0 %v1199_v57 }
 0x186   : > { %v5194_v57 = vpop.permute.xlu1 %1312 }
 0x1d0   : > { %v790_v39 = vpop.xlane.xlu0 %789  ;;  %v774_v26 = vpop.xlane.xlu1 %773 }
 0x1d1   : > { %v5201_v18 = vmax.f32 %v5196_v31, %v790_v39  ;;  %v5204_v27 = vmax.f32 %v5198_v42, %v774_v26 }
 0x1d3   : > { %7953 = vst [vmem:[#allocation76_spill] sm:$0xff] %v5201_v18  ;;  %1084 = vst.msk [vmem:[#allocation2 + $0x50] sm:$0xff] %vm1073_vm10, %v5201_v18  ;;  %909 = vperm.xlu1 %4117, %v5204_v27  }
 0x1d4   : > { %1076 = vst.msk [vmem:[#allocation2 + $0x10] sm:$0xff] %vm1073_vm10, %v5204_v27  ;;  %v776_v26 = vpop.xlane.xlu1 %775  ;;  %v770_v39 = vpop.xlane.xlu0 %769 }
 0x1d5   : > { %v5220_v25 = vmax.f32 %v5206_v22, %v776_v26  ;;  %v5223_v17 = vmax.f32 %v5208_v43, %v770_v39 }
 0x1d7   : > { %7955 = vst [vmem:[#allocation78_spill] sm:$0xff] %v5220_v25  ;;  %7956 = vst [vmem:[#allocation79_spill] sm:$0xff] %v5223_v17  ;;  %899 = vperm.xlu0 %4118, %v5223_v17   ;;  %949 = vperm.xlu1 %4117, %v5201_v18  }
 0x1d8   : > { %1077 = vst.msk [vmem:[#allocation2 + $0x18] sm:$0xff] %vm1073_vm10, %v5220_v25  ;;  %1074 = vst.msk [vmem:[#allocation2] sm:$0xff] %vm1073_vm10, %v5223_v17  ;;  %v792_v26 = vpop.xlane.xlu1 %791  ;;  %v786_v39 = vpop.xlane.xlu0 %785 }
 0x1d9   : > { %v5240_v32 = vmax.f32 %v5225_v40, %v792_v26  ;;  %v5243_v33 = vmax.f32 %v5227_v36, %v786_v39 }
 0x1db   : > { %7958 = vst [vmem:[#allocation81_spill] sm:$0xff] %v5240_v32  ;;  %7959 = vst [vmem:[#allocation82_spill] sm:$0xff] %v5243_v33  ;;  %954 = vperm.xlu0 %4118, %v5240_v32   ;;  %939 = vperm.xlu1 %4117, %v5243_v33  }
 0x1dc   : > { %1085 = vst.msk [vmem:[#allocation2 + $0x58] sm:$0xff] %vm1073_vm10, %v5240_v32  ;;  %1082 = vst.msk [vmem:[#allocation2 + $0x40] sm:$0xff] %vm1073_vm10, %v5243_v33  ;;  %v1207_v26 = vpop.xlane.xlu0 %1206  ;;  %v1203_v39 = vpop.xlane.xlu1 %1202 }
 0x1dd   : > { %v5255_v29 = vadd.f32 %v1207_v26, %v1108_v28  ;;  %v5257_v19 = vadd.f32 %v1203_v39, %v1106_v24  ;;  %v5268_v28 = vld [vmem:[#allocation2 + $0x8] sm:$0xff] }
 0x1de   : > { %v5270_v24 = vld [vmem:[#allocation2 + $0x48] sm:$0xff] }
 0x1df   : > { %7960 = vst [vmem:[#allocation83_spill] sm:$0xff] %v5255_v29  ;;  %7961 = vst [vmem:[#allocation84_spill] sm:$0xff] %v5257_v19  ;;  %914 = vperm.xlu1 %4117, %v5220_v25   ;;  %v1111_v25 = vld [vmem:[#allocation4 + $0x28] sm:$0xff] }
 0x1e0   : > { %1396 = vst.msk [vmem:[#allocation4 + $0x10] sm:$0xff] %vm1073_vm10, %v5255_v29  ;;  %1394 = vst.msk [vmem:[#allocation4] sm:$0xff] %vm1073_vm10, %v5257_v19  ;;  %v1223_v37 = vpop.xlane.xlu0 %1222  ;;  %v1219_v21 = vpop.xlane.xlu1 %1218 }
 0x1e1   : > { %v5264_v15 = vadd.f32 %v1223_v37, %v1116_v23  ;;  %v5266_v12 = vadd.f32 %v1219_v21, %v1114_v16  ;;  %7964 = vst [vmem:[#allocation87_spill] sm:$0xff] %v5270_v24  ;;  %v1109_v16 = vld [vmem:[#allocation4 + $0x18] sm:$0xff]  ;;  %v1107_v37 = vld [vmem:[#allocation4 + $0x8] sm:$0xff] }
 0x1e2   : > { %v1117_v21 = vld [vmem:[#allocation4 + $0x58] sm:$0xff] }
 0x1e3   : > { %7962 = vst [vmem:[#allocation85_spill] sm:$0xff] %v5264_v15  ;;  %7963 = vst [vmem:[#allocation86_spill] sm:$0xff] %v5266_v12 }
 0x1e4   : > { %1404 = vst.msk [vmem:[#allocation4 + $0x50] sm:$0xff] %vm1073_vm10, %v5264_v15  ;;  %1402 = vst.msk [vmem:[#allocation4 + $0x40] sm:$0xff] %vm1073_vm10, %v5266_v12  ;;  %v772_v26 = vpop.xlane.xlu0 %771  ;;  %v788_v39 = vpop.xlane.xlu1 %787 }
 0x1e5   : > { %v5277_v29 = vmax.f32 %v5268_v28, %v772_v26  ;;  %v5280_v23 = vmax.f32 %v5270_v24, %v788_v39  ;;  %v5367_v24 = vld [vmem:[#allocation2 + $0x68] sm:$0xff] }
 0x1e6   : > { %7979 = vst [vmem:[#allocation102_spill] sm:$0xff] %v5367_v24 }
 0x1e7   : > { %7965 = vst [vmem:[#allocation88_spill] sm:$0xff] %v5280_v23  ;;  %1075 = vst.msk [vmem:[#allocation2 + $0x8] sm:$0xff] %vm1073_vm10, %v5277_v29  ;;  %904 = vperm.xlu1 %4117, %v5277_v29   ;;  %944 = vperm.xlu0 %4118, %v5280_v23  }
 0x1e8   : > { %1083 = vst.msk [vmem:[#allocation2 + $0x48] sm:$0xff] %vm1073_vm10, %v5280_v23  ;;  %v1209_v26 = vpop.xlane.xlu0 %1208  ;;  %v1225_v39 = vpop.xlane.xlu1 %1224  ;;  %v5304_v23 = vld [vmem:[#allocation2 + $0x38] sm:$0xff] }
 0x1e9   : > { %v5292_v12 = vadd.f32 %v1209_v26, %v1109_v16  ;;  %v5294_v19 = vadd.f32 %v1225_v39, %v1117_v21  ;;  %7970 = vst [vmem:[#allocation93_spill] sm:$0xff] %v5304_v23 }
 0x1eb   : > { %7966 = vst [vmem:[#allocation89_spill] sm:$0xff] %v5292_v12  ;;  %7967 = vst [vmem:[#allocation90_spill] sm:$0xff] %v5294_v19 }
 0x1ec   : > { %1397 = vst.msk [vmem:[#allocation4 + $0x18] sm:$0xff] %vm1073_vm10, %v5292_v12  ;;  %1405 = vst.msk [vmem:[#allocation4 + $0x58] sm:$0xff] %vm1073_vm10, %v5294_v19  ;;  %v1205_v15 = vpop.xlane.xlu0 %1204  ;;  %v1215_v20 = vpop.xlane.xlu1 %1214 }
 0x1ed   : > { %v5300_v13 = vadd.f32 %v1205_v15, %v1107_v37  ;;  %v5302_v11 = vadd.f32 %v1215_v20, %v1112_v10  ;;  %v5315_v15 = vld [vmem:[#allocation2 + $0x30] sm:$0xff]  ;;  %v5317_v10 = vld [vmem:[#allocation2 + $0x78] sm:$0xff]  ;;  %v1118_v20 = vld [vmem:[#allocation4 + $0x60] sm:$0xff] }
 0x1ee   : > { %7973 = vst [vmem:[#allocation96_spill] sm:$0xff] %v5317_v10 }
 0x1ef   : > { %7968 = vst [vmem:[#allocation91_spill] sm:$0xff] %v5300_v13  ;;  %7969 = vst [vmem:[#allocation92_spill] sm:$0xff] %v5302_v11 }
 0x1f0   : > { %1395 = vst.msk [vmem:[#allocation4 + $0x8] sm:$0xff] %vm1073_vm10, %v5300_v13  ;;  %1400 = vst.msk [vmem:[#allocation4 + $0x30] sm:$0xff] %vm1073_vm10, %v5302_v11  ;;  %v1221_v16 = vpop.xlane.xlu0 %1220  ;;  %v784_v21 = vpop.xlane.xlu1 %783  ;;  %v1110_v11 = vld [vmem:[#allocation4 + $0x20] sm:$0xff] }
 0x1f1   : > { %v5310_v26 = vadd.f32 %v1221_v16, %v1115_v9  ;;  %v5313_v39 = vmax.f32 %v5304_v23, %v784_v21  ;;  %v5331_v21 = vld [vmem:[#allocation2 + $0x70] sm:$0xff]  ;;  %v5350_v23 = vld [vmem:[#allocation2 + $0x28] sm:$0xff] }
 0x1f2   : > { %7978 = vst [vmem:[#allocation101_spill] sm:$0xff] %v5350_v23 }
 0x1f3   : > { %7971 = vst [vmem:[#allocation94_spill] sm:$0xff] %v5310_v26  ;;  %7972 = vst [vmem:[#allocation95_spill] sm:$0xff] %v5313_v39 }
 0x1f4   : > { %1403 = vst.msk [vmem:[#allocation4 + $0x48] sm:$0xff] %vm1073_vm10, %v5310_v26  ;;  %1081 = vst.msk [vmem:[#allocation2 + $0x38] sm:$0xff] %vm1073_vm10, %v5313_v39  ;;  %v782_v37 = vpop.xlane.xlu0 %781  ;;  %v800_v19 = vpop.xlane.xlu1 %799  ;;  %v5348_v26 = vld [vmem:[#allocation2 + $0x20] sm:$0xff] }
 0x1f5   : > { %v5326_v9 = vmax.f32 %v5315_v15, %v782_v37  ;;  %v5329_v16 = vmax.f32 %v5317_v10, %v800_v19  ;;  %v5365_v10 = vld [vmem:[#allocation2 + $0x60] sm:$0xff] }
 0x1f7   : > { %7974 = vst [vmem:[#allocation97_spill] sm:$0xff] %v5326_v9  ;;  %7975 = vst [vmem:[#allocation98_spill] sm:$0xff] %v5329_v16  ;;  %929 = vperm.xlu1 %4117, %v5326_v9   ;;  %974 = vperm.xlu0 %4118, %v5329_v16  }
 0x1f8   : > { %1080 = vst.msk [vmem:[#allocation2 + $0x30] sm:$0xff] %vm1073_vm10, %v5326_v9  ;;  %1089 = vst.msk [vmem:[#allocation2 + $0x78] sm:$0xff] %vm1073_vm10, %v5329_v16  ;;  %v798_v19 = vpop.xlane.xlu0 %797  ;;  %v1211_v37 = vpop.xlane.xlu1 %1210 }
 0x1f9   : > { %v5344_v12 = vmax.f32 %v5331_v21, %v798_v19  ;;  %v5346_v13 = vadd.f32 %v1211_v37, %v1110_v11 }
 0x1fb   : > { %7976 = vst [vmem:[#allocation99_spill] sm:$0xff] %v5344_v12  ;;  %7977 = vst [vmem:[#allocation100_spill] sm:$0xff] %v5346_v13  ;;  %969 = vperm.xlu1 %4117, %v5344_v12  }
 0x1fc   : > { %1088 = vst.msk [vmem:[#allocation2 + $0x70] sm:$0xff] %vm1073_vm10, %v5344_v12  ;;  %1398 = vst.msk [vmem:[#allocation4 + $0x20] sm:$0xff] %vm1073_vm10, %v5346_v13  ;;  %v778_v16 = vpop.xlane.xlu0 %777  ;;  %v780_v19 = vpop.xlane.xlu1 %779 }
 0x1fd   : > { %v5360_v11 = vmax.f32 %v5348_v26, %v778_v16  ;;  %v5363_v37 = vmax.f32 %v5350_v23, %v780_v19 }
 0x1ff   : > { %1078 = vst.msk [vmem:[#allocation2 + $0x20] sm:$0xff] %vm1073_vm10, %v5360_v11  ;;  %1079 = vst.msk [vmem:[#allocation2 + $0x28] sm:$0xff] %vm1073_vm10, %v5363_v37  ;;  %919 = vperm.xlu1 %4117, %v5360_v11  }
 0x200   : > { %v794_v16 = vpop.xlane.xlu0 %793  ;;  %v796_v19 = vpop.xlane.xlu1 %795 }
 0x201   : > { %v5379_v32 = vmax.f32 %v5365_v10, %v794_v16  ;;  %v5382_v40 = vmax.f32 %v5367_v24, %v796_v19  ;;  %v1113_v16 = vld [vmem:[#allocation4 + $0x38] sm:$0xff] }
 0x203   : > { %7980 = vst [vmem:[#allocation103_spill] sm:$0xff] %v5379_v32  ;;  %7981 = vst [vmem:[#allocation104_spill] sm:$0xff] %v5382_v40  ;;  %959 = vperm.xlu1 %4117, %v5379_v32  }
 0x204   : > { %1086 = vst.msk [vmem:[#allocation2 + $0x60] sm:$0xff] %vm1073_vm10, %v5379_v32  ;;  %1087 = vst.msk [vmem:[#allocation2 + $0x68] sm:$0xff] %vm1073_vm10, %v5382_v40  ;;  %v1227_v13 = vpop.xlane.xlu0 %1226 }
 0x205   : > { %v5391_v23 = vadd.f32 %v1227_v13, %v1118_v20  ;;  %v1119_v13 = vld [vmem:[#allocation4 + $0x68] sm:$0xff] }
 0x207   : > { %7982 = vst [vmem:[#allocation105_spill] sm:$0xff] %v5391_v23  ;;  %1406 = vst.msk [vmem:[#allocation4 + $0x60] sm:$0xff] %vm1073_vm10, %v5391_v23  ;;  %934 = vperm.xlu1 %4117, %v5313_v39  }
 0x208   : > { %v1217_v19 = vpop.xlane.xlu0 %1216 }
 0x209   : > { %v5396_v24 = vadd.f32 %v1217_v19, %v1113_v16  ;;  %v1201_v16 = vsel %vm1185_vm15, %v5127_v51, 0.0  ;;  %vm1321_vm15 = vcmp.eq.s32.totalorder %v5080_v50, %v5178_v14  ;;  %v1200_v14 = vsel %vm1184_vm0, %v5135_v6, 0.0 }
 0x20a   : > { %v1337_v3 = vsel %vm1321_vm15, %v5122_v53, 0.0  ;;  %vm1314_vm15 = vcmp.eq.s32.totalorder %v5080_v50, %v5166_v1  ;;  %vm1320_vm0 = vcmp.eq.s32.totalorder %v5080_v50, %v5176_v5 }
 0x20b   : > { %7983 = vst [vmem:[#allocation106_spill] sm:$0xff] %v5396_v24  ;;  %1401 = vst.msk [vmem:[#allocation4 + $0x38] sm:$0xff] %vm1073_vm10, %v5396_v24  ;;  %924 = vperm.xlu1 %4117, %v5363_v37   ;;  %v1336_v1 = vsel %vm1320_vm0, %v5110_v45, 0.0  ;;  %vm1329_vm0 = vcmp.eq.s32.totalorder %v5080_v50, %v5194_v57  ;;  %v1253_v57 = vld [vmem:[#allocation5 + $0x18] sm:$0xff] }
 0x20c   : > { %v1213_v22 = vpop.xlane.xlu0 %1212 }
 0x20d   : > { %v5401_v17 = vadd.f32 %v1213_v22, %v1111_v25  ;;  %v1331_v22 = vsel %vm1315_vm12, %v5099_v52, 0.0  ;;  %v1333_v25 = vsel %vm1317_vm8, %v5075_v8, 0.0  ;;  %vm1323_vm12 = vcmp.eq.s32.totalorder %v5080_v50, %v5182_v38 }
 0x20e   : > { %v1339_v34 = vsel %vm1323_vm12, %v5102_v35, 0.0  ;;  %vm1325_vm8 = vcmp.eq.s32.totalorder %v5080_v50, %v5186_v47  ;;  %v1330_v38 = vsel %vm1314_vm15, %v5072_v7, 0.0  ;;  %vm1316_vm12 = vcmp.eq.s32.totalorder %v5080_v50, %v5168_v58 }
 0x20f   : > { %1399 = vst.msk [vmem:[#allocation4 + $0x28] sm:$0xff] %vm1073_vm10, %v5401_v17  ;;  %v1341_v55 = vsel %vm1325_vm8, %v5086_v0, 0.0  ;;  %v1332_v47 = vsel %vm1316_vm12, %v5060_v62, 0.0  ;;  %vm1318_vm8 = vcmp.eq.s32.totalorder %v5080_v50, %v5172_v4  ;;  %vm1322_vm15 = vcmp.eq.s32.totalorder %v5080_v50, %v5180_v60 }
 0x210   : > { %v1229_v20 = vpop.xlane.xlu0 %1228  ;;  %v1334_v59 = vsel %vm1318_vm8, %v5130_v56, 0.0  ;;  %v1338_v58 = vsel %vm1322_vm15, %v5083_v61, 0.0  ;;  %vm1324_vm12 = vcmp.eq.s32.totalorder %v5080_v50, %v5192_v41  ;;  %vm1327_vm8 = vcmp.eq.s32.totalorder %v5080_v50, %v5190_v30 }
 0x211   : > { %v5405_v23 = vadd.f32 %v1229_v20, %v1119_v13  ;;  %v1340_v4 = vsel %vm1324_vm12, %v5063_v63, 0.0 }
 0x213   : > { %7984 = vst [vmem:[#allocation107_spill] sm:$0xff] %v5405_v23  ;;  %1407 = vst.msk [vmem:[#allocation4 + $0x68] sm:$0xff] %vm1073_vm10, %v5405_v23 }
 0x216   : > { %1232 = vadd.xlane.f32.xlu0 %v1201_v16 }
 0x21a   : > { %1348 = vadd.xlane.f32.xlu0 %v1331_v22 }
 0x21e   : > { %1352 = vadd.xlane.f32.xlu0 %v1333_v25 }
 0x222   : > { %1356 = vadd.xlane.f32.xlu0 %v1335_v54 }
 0x226   : > { %1360 = vadd.xlane.f32.xlu0 %v1337_v3 }
 0x22a   : > { %1364 = vadd.xlane.f32.xlu0 %v1339_v34 }
 0x22e   : > { %1368 = vadd.xlane.f32.xlu0 %v1341_v55  ;;  %v1343_v55 = vsel %vm1327_vm8, %v5150_v49, 0.0 }
 0x22f   : > { %1230 = vadd.xlane.f32.xlu1 %v1200_v14 }
 0x233   : > { %1346 = vadd.xlane.f32.xlu1 %v1330_v38 }
 0x237   : > { %1350 = vadd.xlane.f32.xlu1 %v1332_v47 }
 0x23b   : > { %1354 = vadd.xlane.f32.xlu1 %v1334_v59 }
 0x23f   : > { %1358 = vadd.xlane.f32.xlu1 %v1336_v1 }
 0x243   : > { %1362 = vadd.xlane.f32.xlu1 %v1338_v58 }
 0x244   : > { %1303 = vperm.xlu0 %4118, %v5000_v46  }
 0x247   : > { %1366 = vadd.xlane.f32.xlu1 %v1340_v4 }
 0x248   : > { %1309 = vperm.xlu0 %4118, %v5011_v48  }
 0x24c   : > { %964 = vperm.xlu0 %4118, %v5382_v40  }
 0x252   : > { %v910_v5 = vpop.permute.xlu1 %909 }
 0x253   : > { %v979_v60 = vsub.f32 %v5060_v62, %v910_v5 }
 0x255   : > { %v997_v20 = vmul.f32 1.442695, %v979_v60 }
 0x256   : > { %v950_v19 = vpop.permute.xlu1 %949 }
 0x257   : > { %v987_v16 = vsub.f32 %v5063_v63, %v950_v19  ;;  %4129 = vpow2.f32 %v997_v20 }
 0x259   : > { %v1013_v41 = vmul.f32 1.442695, %v987_v16 }
 0x25a   : > { %v940_v13 = vpop.permute.xlu1 %939 }
 0x25b   : > { %v985_v25 = vsub.f32 %v5083_v61, %v940_v13  ;;  %4131 = vpow2.f32 %v1013_v41 }
 0x25d   : > { %v1009_v3 = vmul.f32 1.442695, %v985_v25 }
 0x25e   : > { %v5456_v22 = vpop.permute.xlu1 %914 }
 0x25f   : > { %4133 = vpow2.f32 %v1009_v3 }
 0x261   : > { %v4130_v38 = vpop.eup %4129 }
 0x265   : > { %v4132_v47 = vpop.eup %4131 }
 0x266   : > { %v905_v54 = vpop.permute.xlu1 %904 }
 0x267   : > { %v978_v34 = vsub.f32 %v5099_v52, %v905_v54 }
 0x269   : > { %v995_v14 = vmul.f32 1.442695, %v978_v34  ;;  %v4134_v59 = vpop.eup %4133 }
 0x26b   : > { %1372 = vadd.xlane.f32.xlu0 %v1343_v55  ;;  %4135 = vpow2.f32 %v995_v14 }
 0x26f   : > { %1029 = vadd.xlane.f32.xlu0 %v4130_v38  ;;  %v900_v38 = vpop.permute.xlu0 %899 }
 0x273   : > { %1045 = vadd.xlane.f32.xlu0 %v4132_v47  ;;  %v1345_v47 = vsel %vm1329_vm0, %v5127_v51, 0.0 }
 0x275   : > { %v4136_v4 = vpop.eup %4135 }
 0x276   : > { %v930_v1 = vpop.permute.xlu1 %929 }
 0x277   : > { %v983_v58 = vsub.f32 %v5110_v45, %v930_v1  ;;  %1041 = vadd.xlane.f32.xlu0 %v4134_v59  ;;  %v955_v59 = vpop.permute.xlu0 %954 }
 0x279   : > { %v1005_v30 = vmul.f32 1.442695, %v983_v58 }
 0x27a   : > { %v970_v5 = vpop.permute.xlu1 %969 }
 0x27b   : > { %v991_v19 = vsub.f32 %v5135_v6, %v970_v5  ;;  %1027 = vadd.xlane.f32.xlu0 %v4136_v4  ;;  %4137 = vpow2.f32 %v1005_v30  ;;  %v945_v1 = vpop.permute.xlu0 %944  ;;  %v1121_v30 = vld [vmem:[#allocation4 + $0x78] sm:$0xff] }
 0x27d   : > { %v1021_v60 = vmul.f32 1.442695, %v991_v19  ;;  %v1251_v19 = vld [vmem:[#allocation5 + $0x8] sm:$0xff] }
 0x27e   : > { %v920_v13 = vpop.permute.xlu1 %919 }
 0x27f   : > { %4139 = vpow2.f32 %v1021_v60  ;;  %v981_v20 = vsub.f32 %v5130_v56, %v920_v13  ;;  %v5470_v58 = vpop.permute.xlu0 %974 }
 0x281   : > { %v1001_v16 = vmul.f32 1.442695, %v981_v20 }
 0x282   : > { %v960_v41 = vpop.permute.xlu1 %959 }
 0x283   : > { %4141 = vpow2.f32 %v1001_v16  ;;  %v989_v25 = vsub.f32 %v5147_v2, %v960_v41  ;;  %v1255_v41 = vld [vmem:[#allocation5 + $0x28] sm:$0xff] }
 0x285   : > { %v1017_v54 = vmul.f32 1.442695, %v989_v25  ;;  %v4138_v3 = vpop.eup %4137 }
 0x286   : > { %1037 = vadd.xlane.f32.xlu0 %v4138_v3  ;;  %v1257_v3 = vld [vmem:[#allocation5 + $0x38] sm:$0xff] }
 0x287   : > { %4143 = vpow2.f32 %v1017_v54 }
 0x289   : > { %v4140_v34 = vpop.eup %4139 }
 0x28a   : > { %1053 = vadd.xlane.f32.xlu0 %v4140_v34  ;;  %v935_v34 = vpop.permute.xlu1 %934 }
 0x28d   : > { %v4142_v55 = vpop.eup %4141 }
 0x28e   : > { %1033 = vadd.xlane.f32.xlu0 %v4142_v55 }
 0x291   : > { %v4144_v14 = vpop.eup %4143 }
 0x292   : > { %1049 = vadd.xlane.f32.xlu0 %v4144_v14 }
 0x296   : > { %1376 = vadd.xlane.f32.xlu0 %v1345_v47  ;;  %v1259_v47 = vld [vmem:[#allocation5 + $0x48] sm:$0xff] }
 0x2a3   : > { %v1233_v4 = vpop.xlane.xlu0 %1232 }
 0x2a4   : > { %v5472_v5 = vadd.f32 %v1233_v4, %v1121_v30  ;;  %v977_v30 = vsub.f32 %v5072_v7, %v900_v38  ;;  %v1250_v38 = vld [vmem:[#allocation5] sm:$0xff] }
 0x2a6   : > { %7985 = vst [vmem:[#allocation108_spill] sm:$0xff] %v5472_v5  ;;  %1409 = vst.msk [vmem:[#allocation4 + $0x78] sm:$0xff] %vm1073_vm10, %v5472_v5 }
 0x2a7   : > { %v1349_v60 = vpop.xlane.xlu0 %1348 }
 0x2a8   : > { %v5476_v13 = vadd.f32 %v1349_v60, %v1251_v19  ;;  %v925_v19 = vpop.permute.xlu1 %924 }
 0x2aa   : > { %7986 = vst [vmem:[#allocation109_spill] sm:$0xff] %v5476_v13  ;;  %1411 = vst.msk [vmem:[#allocation5 + $0x8] sm:$0xff] %vm1073_vm10, %v5476_v13 }
 0x2ab   : > { %v1353_v20 = vpop.xlane.xlu0 %1352 }
 0x2ac   : > { %v5480_v16 = vadd.f32 %v1353_v20, %v1253_v57  ;;  %v1261_v57 = vld [vmem:[#allocation5 + $0x58] sm:$0xff]  ;;  %v1120_v20 = vld [vmem:[#allocation4 + $0x70] sm:$0xff] }
 0x2ae   : > { %7987 = vst [vmem:[#allocation110_spill] sm:$0xff] %v5480_v16  ;;  %1413 = vst.msk [vmem:[#allocation5 + $0x18] sm:$0xff] %vm1073_vm10, %v5480_v16 }
 0x2af   : > { %v1357_v25 = vpop.xlane.xlu0 %1356 }
 0x2b0   : > { %v5484_v54 = vadd.f32 %v1357_v25, %v1255_v41  ;;  %v993_v41 = vmul.f32 1.442695, %v977_v30  ;;  %v980_v25 = vsub.f32 %v5075_v8, %v5456_v22  ;;  %v1252_v22 = vld [vmem:[#allocation5 + $0x10] sm:$0xff] }
 0x2b2   : > { %7988 = vst [vmem:[#allocation111_spill] sm:$0xff] %v5484_v54  ;;  %1415 = vst.msk [vmem:[#allocation5 + $0x28] sm:$0xff] %vm1073_vm10, %v5484_v54  ;;  %4145 = vpow2.f32 %v993_v41 }
 0x2b3   : > { %v1361_v55 = vpop.xlane.xlu0 %1360 }
 0x2b4   : > { %v5488_v14 = vadd.f32 %v1361_v55, %v1257_v3 }
 0x2b6   : > { %7989 = vst [vmem:[#allocation112_spill] sm:$0xff] %v5488_v14  ;;  %1417 = vst.msk [vmem:[#allocation5 + $0x38] sm:$0xff] %vm1073_vm10, %v5488_v14 }
 0x2b7   : > { %v1365_v4 = vpop.xlane.xlu0 %1364 }
 0x2b8   : > { %v5493_v60 = vadd.f32 %v1365_v4, %v1259_v47  ;;  %v988_v47 = vsub.f32 %v5086_v0, %v955_v59  ;;  %v999_v4 = vmul.f32 1.442695, %v980_v25 }
 0x2ba   : > { %7990 = vst [vmem:[#allocation113_spill] sm:$0xff] %v5493_v60  ;;  %1419 = vst.msk [vmem:[#allocation5 + $0x48] sm:$0xff] %vm1073_vm10, %v5493_v60  ;;  %4147 = vpow2.f32 %v999_v4 }
 0x2bb   : > { %v1369_v3 = vpop.xlane.xlu0 %1368 }
 0x2bc   : > { %v5499_v55 = vadd.f32 %v1369_v3, %v1261_v57  ;;  %v1231_v54 = vpop.xlane.xlu1 %1230  ;;  %v1015_v57 = vmul.f32 1.442695, %v988_v47  ;;  %v1254_v3 = vld [vmem:[#allocation5 + $0x20] sm:$0xff]  ;;  %v984_v47 = vsub.f32 %v5122_v53, %v935_v34  ;;  %v4146_v4 = vpop.eup %4145 }
 0x2bd   : > { %v5501_v14 = vadd.f32 %v1231_v54, %v1120_v20  ;;  %v986_v54 = vsub.f32 %v5102_v35, %v945_v1 }
 0x2be   : > { %7991 = vst [vmem:[#allocation114_spill] sm:$0xff] %v5499_v55  ;;  %1421 = vst.msk [vmem:[#allocation5 + $0x58] sm:$0xff] %vm1073_vm10, %v5499_v55  ;;  %4149 = vpow2.f32 %v1015_v57 }
 0x2bf   : > { %7992 = vst [vmem:[#allocation115_spill] sm:$0xff] %v5501_v14  ;;  %1408 = vst.msk [vmem:[#allocation4 + $0x70] sm:$0xff] %vm1073_vm10, %v5501_v14 }
 0x2c0   : > { %v1347_v30 = vpop.xlane.xlu1 %1346 }
 0x2c1   : > { %v5508_v60 = vadd.f32 %v1347_v30, %v1250_v38  ;;  %v1011_v38 = vmul.f32 1.442695, %v986_v54 }
 0x2c3   : > { %7993 = vst [vmem:[#allocation116_spill] sm:$0xff] %v5508_v60  ;;  %1410 = vst.msk [vmem:[#allocation5] sm:$0xff] %vm1073_vm10, %v5508_v60  ;;  %v1304_v20 = vpop.permute.xlu0 %1303  ;;  %4151 = vpow2.f32 %v1011_v38 }
 0x2c4   : > { %vm1326_vm15 = vcmp.eq.s32.totalorder %v5080_v50, %v1304_v20  ;;  %v1351_v41 = vpop.xlane.xlu1 %1350  ;;  %v1256_v20 = vld [vmem:[#allocation5 + $0x30] sm:$0xff]  ;;  %v4148_v34 = vpop.eup %4147 }
 0x2c5   : > { %v1342_v59 = vsel %vm1326_vm15, %v5147_v2, 0.0  ;;  %v5515_v25 = vadd.f32 %v1351_v41, %v1252_v22  ;;  %v992_v22 = vsub.f32 %v5127_v51, %v5470_v58  ;;  %v1007_v41 = vmul.f32 1.442695, %v984_v47 }
 0x2c6   : > { %1370 = vadd.xlane.f32.xlu1 %v1342_v59  ;;  %v1258_v59 = vld [vmem:[#allocation5 + $0x40] sm:$0xff] }
 0x2c7   : > { %7994 = vst [vmem:[#allocation117_spill] sm:$0xff] %v5515_v25  ;;  %1412 = vst.msk [vmem:[#allocation5 + $0x10] sm:$0xff] %vm1073_vm10, %v5515_v25  ;;  %v1310_v55 = vpop.permute.xlu0 %1309  ;;  %v1023_v16 = vmul.f32 1.442695, %v992_v22  ;;  %4153 = vpow2.f32 %v1007_v41 }
 0x2c8   : > { %v1355_v1 = vpop.xlane.xlu1 %1354  ;;  %v4150_v58 = vpop.eup %4149  ;;  %vm1328_vm12 = vcmp.eq.s32.totalorder %v5080_v50, %v1310_v55  ;;  %v8002_v50 = vsub.f32 %v5268_v28, %v5277_v29 }
 0x2c9   : > { %v5520_v30 = vadd.f32 %v1355_v1, %v1254_v3  ;;  %v982_v3 = vsub.f32 %v5142_v44, %v925_v19  ;;  %4155 = vpow2.f32 %v1023_v16 }
 0x2ca   : > { %1025 = vadd.xlane.f32.xlu1 %v4146_v4  ;;  %v1260_v4 = vld [vmem:[#allocation5 + $0x50] sm:$0xff]  ;;  %v851_v55 = vmul.f32 1.442695, %v8002_v50 }
 0x2cb   : > { %7995 = vst [vmem:[#allocation118_spill] sm:$0xff] %v5520_v30  ;;  %1414 = vst.msk [vmem:[#allocation5 + $0x20] sm:$0xff] %vm1073_vm10, %v5520_v30  ;;  %v965_v38 = vpop.permute.xlu0 %964  ;;  %v1003_v30 = vmul.f32 1.442695, %v982_v3 }
 0x2cc   : > { %v1359_v57 = vpop.xlane.xlu1 %1358 }
 0x2cd   : > { %v5526_v54 = vadd.f32 %v1359_v57, %v1256_v20  ;;  %v990_v20 = vsub.f32 %v5150_v49, %v965_v38  ;;  %v4152_v41 = vpop.eup %4151  ;;  %4157 = vpow2.f32 %v1003_v30  ;;  %v1344_v38 = vsel %vm1328_vm12, %v5135_v6, 0.0 }
 0x2ce   : > { %1031 = vadd.xlane.f32.xlu1 %v4148_v34  ;;  %v7999_v30 = vsub.f32 %v5198_v42, %v5204_v27 }
 0x2cf   : > { %7996 = vst [vmem:[#allocation119_spill] sm:$0xff] %v5526_v54  ;;  %1416 = vst.msk [vmem:[#allocation5 + $0x30] sm:$0xff] %vm1073_vm10, %v5526_v54  ;;  %v1019_v57 = vmul.f32 1.442695, %v990_v20  ;;  %v8001_v20 = vsub.f32 %v5227_v36, %v5243_v33  ;;  %v827_v36 = vld [vmem:[#allocation3 + $0x50] sm:$0xff] }
 0x2d0   : > { %v1363_v1 = vpop.xlane.xlu1 %1362 }
 0x2d1   : > { %v5531_v47 = vadd.f32 %v1363_v1, %v1258_v59  ;;  %v4154_v34 = vpop.eup %4153  ;;  %4159 = vpow2.f32 %v1019_v57  ;;  %v853_v1 = vmul.f32 1.442695, %v7999_v30 }
 0x2d2   : > { %1047 = vadd.xlane.f32.xlu1 %v4150_v58  ;;  %v8000_v58 = vsub.f32 %v5196_v31, %v5201_v18 }
 0x2d3   : > { %7997 = vst [vmem:[#allocation120_spill] sm:$0xff] %v5531_v47  ;;  %1418 = vst.msk [vmem:[#allocation5 + $0x40] sm:$0xff] %vm1073_vm10, %v5531_v47  ;;  %v4156_v16 = vpop.eup %4155  ;;  %4161 = vpow2.f32 %v853_v1 }
 0x2d4   : > { %v1367_v22 = vpop.xlane.xlu1 %1366 }
 0x2d5   : > { %v5536_v19 = vadd.f32 %v1367_v22, %v1260_v4  ;;  %v869_v4 = vmul.f32 1.442695, %v8000_v58  ;;  %v865_v22 = vmul.f32 1.442695, %v8001_v20  ;;  %v825_v58 = vld [vmem:[#allocation3 + $0x40] sm:$0xff]  ;;  %v8005_v20 = vsub.f32 %v5315_v15, %v5326_v9 }
 0x2d6   : > { %1043 = vadd.xlane.f32.xlu1 %v4152_v41  ;;  %v1263_v41 = vld [vmem:[#allocation5 + $0x68] sm:$0xff] }
 0x2d7   : > { %7998 = vst [vmem:[#allocation121_spill] sm:$0xff] %v5536_v19  ;;  %1420 = vst.msk [vmem:[#allocation5 + $0x50] sm:$0xff] %vm1073_vm10, %v5536_v19  ;;  %v4158_v59 = vpop.eup %4157  ;;  %4163 = vpow2.f32 %v869_v4 }
 0x2d8   : > { %4165 = vpow2.f32 %v865_v22  ;;  %v861_v22 = vmul.f32 1.442695, %v8005_v20 }
 0x2d9   : > { %4167 = vpow2.f32 %v851_v55 }
 0x2da   : > { %1039 = vadd.xlane.f32.xlu1 %v4154_v34  ;;  %v819_v34 = vld [vmem:[#allocation3 + $0x10] sm:$0xff]  ;;  %4169 = vpow2.f32 %v861_v22 }
 0x2db   : > { %v4160_v3 = vpop.eup %4159 }
 0x2dd   : > { %v4162_v57 = vpop.eup %4161 }
 0x2de   : > { %1055 = vadd.xlane.f32.xlu1 %v4156_v16  ;;  %v883_v31 = vmul.f32 %v4162_v57, %v819_v34  ;;  %v818_v57 = vld [vmem:[#allocation3 + $0x8] sm:$0xff]  ;;  %v8007_v34 = vsub.f32 %v5331_v21, %v5344_v12  ;;  %v8009_v21 = vsub.f32 %v5365_v10, %v5379_v32 }
 0x2e2   : > { %1035 = vadd.xlane.f32.xlu1 %v4158_v59  ;;  %v4164_v59 = vpop.eup %4163 }
 0x2e3   : > { %v891_v28 = vmul.f32 %v4164_v59, %v827_v36  ;;  %v4166_v30 = vpop.eup %4165  ;;  %v8008_v36 = vsub.f32 %v5348_v26, %v5360_v11 }
 0x2e4   : > { %v889_v50 = vmul.f32 %v4166_v30, %v825_v58  ;;  %v4168_v55 = vpop.eup %4167  ;;  %v873_v30 = vmul.f32 1.442695, %v8009_v21  ;;  %v823_v58 = vld [vmem:[#allocation3 + $0x30] sm:$0xff] }
 0x2e5   : > { %v882_v59 = vmul.f32 %v4168_v55, %v818_v57  ;;  %v831_v55 = vld [vmem:[#allocation3 + $0x70] sm:$0xff] }
 0x2e6   : > { %1051 = vadd.xlane.f32.xlu1 %v4160_v3 }
 0x2ea   : > { %1374 = vadd.xlane.f32.xlu1 %v1344_v38 }
 0x2f8   : > { %v1373_v42 = vpop.xlane.xlu0 %1372 }
 0x2f9   : > { %v5554_v16 = vadd.f32 %v1373_v42, %v1263_v41 }
 0x2fb   : > { %8003 = vst [vmem:[#allocation122_spill] sm:$0xff] %v5554_v16  ;;  %1423 = vst.msk [vmem:[#allocation5 + $0x68] sm:$0xff] %vm1073_vm10, %v5554_v16 }
 0x2fc   : > { %v1030_v3 = vpop.xlane.xlu0 %1029 }
 0x2fd   : > { %v5558_v38 = vadd.f32 %v1030_v3, %v883_v31  ;;  %v877_v31 = vmul.f32 1.442695, %v8007_v34 }
 0x2ff   : > { %1092 = vst.msk [vmem:[#allocation3 + $0x10] sm:$0xff] %vm1073_vm10, %v5558_v38  ;;  %4171 = vpow2.f32 %v877_v31  ;;  %v821_v31 = vld [vmem:[#allocation3 + $0x20] sm:$0xff] }
 0x300   : > { %v1046_v1 = vpop.xlane.xlu0 %1045 }
 0x301   : > { %v5562_v4 = vadd.f32 %v1046_v1, %v891_v28  ;;  %v857_v28 = vmul.f32 1.442695, %v8008_v36  ;;  %v4170_v1 = vpop.eup %4169 }
 0x302   : > { %v887_v20 = vmul.f32 %v4170_v1, %v823_v58 }
 0x303   : > { %8004 = vst [vmem:[#allocation123_spill] sm:$0xff] %v5562_v4  ;;  %1100 = vst.msk [vmem:[#allocation3 + $0x50] sm:$0xff] %vm1073_vm10, %v5562_v4  ;;  %4173 = vpow2.f32 %v857_v28  ;;  %v829_v28 = vld [vmem:[#allocation3 + $0x60] sm:$0xff] }
 0x304   : > { %v1042_v41 = vpop.xlane.xlu0 %1041  ;;  %4175 = vpow2.f32 %v873_v30  ;;  %v1262_v4 = vld [vmem:[#allocation5 + $0x60] sm:$0xff] }
 0x305   : > { %v5569_v42 = vadd.f32 %v1042_v41, %v889_v50 }
 0x307   : > { %8006 = vst [vmem:[#allocation124_spill] sm:$0xff] %v5569_v42  ;;  %1098 = vst.msk [vmem:[#allocation3 + $0x40] sm:$0xff] %vm1073_vm10, %v5569_v42 }
 0x308   : > { %v1028_v15 = vpop.xlane.xlu0 %1027 }
 0x309   : > { %v5576_v3 = vadd.f32 %v1028_v15, %v882_v59  ;;  %v4172_v22 = vpop.eup %4171 }
 0x30a   : > { %v895_v26 = vmul.f32 %v4172_v22, %v831_v55  ;;  %v8014_v55 = vld [vmem:[#allocation79_spill] sm:$0xff] }
 0x30b   : > { %1091 = vst.msk [vmem:[#allocation3 + $0x8] sm:$0xff] %vm1073_vm10, %v5576_v3 }
 0x30d   : > { %v4174_v57 = vpop.eup %4173 }
 0x30e   : > { %v885_v10 = vmul.f32 %v4174_v57, %v821_v31  ;;  %v4176_v15 = vpop.eup %4175  ;;  %v8017_v31 = vld [vmem:[#allocation78_spill] sm:$0xff] }
 0x30f   : > { %v893_v30 = vmul.f32 %v4176_v15, %v829_v28  ;;  %v8020_v28 = vld [vmem:[#allocation81_spill] sm:$0xff] }
 0x313   : > { %v1038_v50 = vpop.xlane.xlu0 %1037 }
 0x314   : > { %v5586_v41 = vadd.f32 %v1038_v50, %v887_v20  ;;  %v1265_v20 = vld [vmem:[#allocation5 + $0x78] sm:$0xff] }
 0x316   : > { %8010 = vst [vmem:[#allocation125_spill] sm:$0xff] %v5586_v41  ;;  %1096 = vst.msk [vmem:[#allocation3 + $0x30] sm:$0xff] %vm1073_vm10, %v5586_v41 }
 0x317   : > { %v1054_v34 = vpop.xlane.xlu0 %1053 }
 0x318   : > { %v5590_v59 = vadd.f32 %v1054_v34, %v895_v26  ;;  %v8015_v26 = vsub.f32 %v5208_v43, %v8014_v55  ;;  %v8016_v34 = vld [vmem:[#allocation77_spill] sm:$0xff] }
 0x319   : > { %v817_v43 = vld [vmem:[#allocation3] sm:$0xff] }
 0x31a   : > { %8011 = vst [vmem:[#allocation126_spill] sm:$0xff] %v5590_v59  ;;  %1104 = vst.msk [vmem:[#allocation3 + $0x70] sm:$0xff] %vm1073_vm10, %v5590_v59  ;;  %v849_v57 = vmul.f32 1.442695, %v8015_v26  ;;  %v8026_v26 = vld [vmem:[#allocation93_spill] sm:$0xff] }
 0x31b   : > { %v1034_v36 = vpop.xlane.xlu0 %1033 }
 0x31c   : > { %v5594_v21 = vadd.f32 %v1034_v36, %v885_v10  ;;  %v8018_v10 = vsub.f32 %v8016_v34, %v8017_v31  ;;  %4177 = vpow2.f32 %v849_v57  ;;  %v8019_v36 = vld [vmem:[#allocation80_spill] sm:$0xff]  ;;  %v8027_v57 = vsub.f32 %v8026_v26, %v5313_v39 }
 0x31e   : > { %1094 = vst.msk [vmem:[#allocation3 + $0x20] sm:$0xff] %vm1073_vm10, %v5594_v21  ;;  %v855_v15 = vmul.f32 1.442695, %v8018_v10  ;;  %v863_v34 = vmul.f32 1.442695, %v8027_v57 }
 0x31f   : > { %v1050_v1 = vpop.xlane.xlu0 %1049 }
 0x320   : > { %v5598_v58 = vadd.f32 %v1050_v1, %v893_v30  ;;  %4179 = vpow2.f32 %v855_v15  ;;  %v8021_v30 = vsub.f32 %v8019_v36, %v8020_v28  ;;  %v820_v36 = vld [vmem:[#allocation3 + $0x18] sm:$0xff] }
 0x322   : > { %8012 = vst [vmem:[#allocation127_spill] sm:$0xff] %v5598_v58  ;;  %1102 = vst.msk [vmem:[#allocation3 + $0x60] sm:$0xff] %vm1073_vm10, %v5598_v58  ;;  %v871_v1 = vmul.f32 1.442695, %v8021_v30  ;;  %v8029_v30 = vld [vmem:[#allocation98_spill] sm:$0xff] }
 0x323   : > { %v1377_v22 = vpop.xlane.xlu0 %1376 }
 0x324   : > { %v5602_v50 = vadd.f32 %v1377_v22, %v1265_v20  ;;  %4181 = vpow2.f32 %v871_v1  ;;  %v8022_v20 = vld [vmem:[#allocation87_spill] sm:$0xff]  ;;  %v8023_v22 = vld [vmem:[#allocation88_spill] sm:$0xff] }
 0x325   : > { %v8024_v59 = vsub.f32 %v8022_v20, %v8023_v22  ;;  %v828_v22 = vld [vmem:[#allocation3 + $0x58] sm:$0xff] }
 0x326   : > { %8013 = vst [vmem:[#allocation128_spill] sm:$0xff] %v5602_v50  ;;  %1425 = vst.msk [vmem:[#allocation5 + $0x78] sm:$0xff] %vm1073_vm10, %v5602_v50  ;;  %v4178_v50 = vpop.eup %4177 }
 0x327   : > { %v867_v58 = vmul.f32 1.442695, %v8024_v59  ;;  %v881_v31 = vmul.f32 %v4178_v50, %v817_v43  ;;  %v8028_v59 = vld [vmem:[#allocation96_spill] sm:$0xff]  ;;  %v8031_v50 = vld [vmem:[#allocation101_spill] sm:$0xff] }
 0x328   : > { %v8030_v1 = vsub.f32 %v8028_v59, %v8029_v30  ;;  %v8032_v43 = vsub.f32 %v8031_v50, %v5363_v37  ;;  %v824_v50 = vld [vmem:[#allocation3 + $0x38] sm:$0xff] }
 0x329   : > { %4183 = vpow2.f32 %v867_v58 }
 0x32a   : > { %v4180_v10 = vpop.eup %4179  ;;  %4185 = vpow2.f32 %v863_v34  ;;  %v859_v57 = vmul.f32 1.442695, %v8032_v43  ;;  %v8033_v34 = vld [vmem:[#allocation102_spill] sm:$0xff] }
 0x32e   : > { %v4182_v58 = vpop.eup %4181 }
 0x333   : > { %v4184_v59 = vpop.eup %4183 }
 0x353   : > { %v1371_v16 = vpop.xlane.xlu1 %1370 }
 0x354   : > { %v5618_v55 = vadd.f32 %v1371_v16, %v1262_v4  ;;  %v879_v16 = vmul.f32 1.442695, %v8030_v1  ;;  %v884_v4 = vmul.f32 %v4180_v10, %v820_v36  ;;  %v826_v10 = vld [vmem:[#allocation3 + $0x48] sm:$0xff] }
 0x356   : > { %8025 = vst [vmem:[#allocation77_spill] sm:$0xff] %v5618_v55  ;;  %1422 = vst.msk [vmem:[#allocation5 + $0x60] sm:$0xff] %vm1073_vm10, %v5618_v55  ;;  %4187 = vpow2.f32 %v879_v16  ;;  %v890_v16 = vmul.f32 %v4184_v59, %v826_v10  ;;  %v822_v10 = vld [vmem:[#allocation3 + $0x28] sm:$0xff] }
 0x357   : > { %v1026_v15 = vpop.xlane.xlu1 %1025  ;;  %4189 = vpow2.f32 %v859_v57 }
 0x358   : > { %v5625_v28 = vadd.f32 %v1026_v15, %v881_v31  ;;  %v846_v31 = vsub.f32 %v8033_v34, %v5382_v40  ;;  %v892_v15 = vmul.f32 %v4182_v58, %v828_v22 }
 0x35a   : > { %1090 = vst.msk [vmem:[#allocation3] sm:$0xff] %vm1073_vm10, %v5625_v28  ;;  %v875_v1 = vmul.f32 1.442695, %v846_v31 }
 0x35b   : > { %v1032_v20 = vpop.xlane.xlu1 %1031 }
 0x35c   : > { %v5632_v26 = vadd.f32 %v1032_v20, %v884_v4  ;;  %v4186_v4 = vpop.eup %4185  ;;  %4191 = vpow2.f32 %v875_v1 }
 0x35d   : > { %v888_v58 = vmul.f32 %v4186_v4, %v824_v50 }
 0x35e   : > { %1093 = vst.msk [vmem:[#allocation3 + $0x18] sm:$0xff] %vm1073_vm10, %v5632_v26 }
 0x35f   : > { %v1048_v30 = vpop.xlane.xlu1 %1047 }
 0x360   : > { %v5641_v36 = vadd.f32 %v1048_v30, %v892_v15  ;;  %v4188_v22 = vpop.eup %4187  ;;  %v832_v15 = vld [vmem:[#allocation3 + $0x78] sm:$0xff] }
 0x361   : > { %v896_v57 = vmul.f32 %v4188_v22, %v832_v15  ;;  %v4190_v31 = vpop.eup %4189  ;;  %v1264_v15 = vld [vmem:[#allocation5 + $0x70] sm:$0xff] }
 0x362   : > { %8034 = vst [vmem:[#allocation80_spill] sm:$0xff] %v5641_v36  ;;  %1101 = vst.msk [vmem:[#allocation3 + $0x58] sm:$0xff] %vm1073_vm10, %v5641_v36  ;;  %v886_v1 = vmul.f32 %v4190_v31, %v822_v10 }
 0x363   : > { %v1044_v20 = vpop.xlane.xlu1 %1043 }
 0x364   : > { %v5645_v43 = vadd.f32 %v1044_v20, %v890_v16  ;;  %v830_v20 = vld [vmem:[#allocation3 + $0x68] sm:$0xff] }
 0x366   : > { %8035 = vst [vmem:[#allocation87_spill] sm:$0xff] %v5645_v43  ;;  %1099 = vst.msk [vmem:[#allocation3 + $0x48] sm:$0xff] %vm1073_vm10, %v5645_v43  ;;  %v4192_v16 = vpop.eup %4191 }
 0x367   : > { %v1040_v34 = vpop.xlane.xlu1 %1039 }
 0x368   : > { %v5649_v30 = vadd.f32 %v1040_v34, %v888_v58  ;;  %v894_v58 = vmul.f32 %v4192_v16, %v830_v20 }
 0x36a   : > { %8036 = vst [vmem:[#allocation93_spill] sm:$0xff] %v5649_v30  ;;  %1097 = vst.msk [vmem:[#allocation3 + $0x38] sm:$0xff] %vm1073_vm10, %v5649_v30 }
 0x36b   : > { %v1056_v59 = vpop.xlane.xlu1 %1055 }
 0x36c   : > { %v5653_v36 = vadd.f32 %v1056_v59, %v896_v57 }
 0x36e   : > { %8037 = vst [vmem:[#allocation96_spill] sm:$0xff] %v5653_v36  ;;  %1105 = vst.msk [vmem:[#allocation3 + $0x78] sm:$0xff] %vm1073_vm10, %v5653_v36 }
 0x36f   : > { %v1036_v4 = vpop.xlane.xlu1 %1035 }
 0x370   : > { %v5657_v50 = vadd.f32 %v1036_v4, %v886_v1 }
 0x372   : > { %1095 = vst.msk [vmem:[#allocation3 + $0x28] sm:$0xff] %vm1073_vm10, %v5657_v50 }
 0x373   : > { %v1052_v34 = vpop.xlane.xlu1 %1051 }
 0x374   : > { %v5661_v22 = vadd.f32 %v1052_v34, %v894_v58  ;;  %1429 = sbr.rel (%p3876_p6) target bundleno = 2158 (0x86e), region = 101 }
 0x376   : > { %8038 = vst [vmem:[#allocation101_spill] sm:$0xff] %v5661_v22  ;;  %1103 = vst.msk [vmem:[#allocation3 + $0x68] sm:$0xff] %vm1073_vm10, %v5661_v22 }
 0x377   : > { %v1375_v57 = vpop.xlane.xlu1 %1374 }
 0x378   : > { %v5665_v59 = vadd.f32 %v1375_v57, %v1264_v15 }
 0x37a   : > { %8039 = vst [vmem:[#allocation102_spill] sm:$0xff] %v5665_v59  ;;  %1424 = vst.msk [vmem:[#allocation5 + $0x70] sm:$0xff] %vm1073_vm10, %v5665_v59 }
 0x37b   : > { %v1478_v31 = vld [vmem:[%s7582_s6] sm:$0xff]  ;;  %v1479_v10 = vld [vmem:[%s7582_s6 + $0x8] sm:$0xff]  ;;  %v1480_v1 = vld [vmem:[%s7582_s6 + $0x10] sm:$0xff]  ;;  %vm1865_vm8 = vcmask 523264   ;;  %s4572_s21 = smov 127   ;;  %s4573_s18 = smov 2  }
 0x37c   : > { %v8040_v16 = vld [vmem:[#allocation19_spill] sm:$0xff]  ;;  %v4005_v20 = vpack.c.bf16 %v1479_v10, %v1478_v31  ;;  %2173 = vrot.lane.b32.xlu1 %v5277_v29, %s4572_s21  ;;  %v4195_v15 = vld [vmem:[%s7578_s2] sm:$0xff]   ;;  %v4196_v57 = vld [vmem:[%s7578_s2 + $0x8] sm:$0xff]   ;;  %s4574_s24 = smov 1   ;;  %s4576_s16 = smov 126  }
 0x37d   : > { %3965 = vmatprep.mubr.msk.bf16.mxu0 %vm578_vm1, %v8040_v16  ;;  %v8041_v4 = vld [vmem:[#allocation79_spill] sm:$0xff]  ;;  %3989 = vmatprep.mubr.msk.bf16.mxu1 %vm1865_vm8, %v8040_v16  ;;  %v8042_v31 = vld [vmem:[#allocation78_spill] sm:$0xff]  ;;  %v8053_v36 = vld [vmem:[#allocation84_spill] sm:$0xff] }
 0x37e   : > { %2171 = vrot.lane.b32.xlu0 %v8041_v4, %s4572_s21  ;;  %v1481_v58 = vld [vmem:[%s7582_s6 + $0x18] sm:$0xff]  ;;  %4006 = vmatprep.subr.bf16.mxu0 %v4005_v20  ;;  %v4197_v10 = vld [vmem:[%s7578_s2 + $0x10] sm:$0xff]  }
 0x37f   : > { %v4009_v34 = vpack.c.bf16 %v1481_v58, %v1480_v1  ;;  %4008 = vmatpush3.bf16.msra.mxu0 %v4005_v20  ;;  %3981 = vmatprep.subr.bf16.mxu1 %v4195_v15  ;;  %v8043_v1 = vld [vmem:[#allocation21_spill] sm:$0xff]  ;;  %v4198_v16 = vld [vmem:[%s7578_s2 + $0x18] sm:$0xff]   ;;  %v8054_v22 = vld [vmem:[#allocation30_spill] sm:$0xff] }
 0x380   : > { %3982 = vmatpush3.bf16.msra.mxu1 %v4195_v15  ;;  %2177 = vrot.lane.b32.xlu1 %v8042_v31, %s4572_s21  ;;  %v8044_v20 = vld [vmem:[#allocation23_spill] sm:$0xff]  ;;  %v8045_v58 = vld [vmem:[#allocation88_spill] sm:$0xff] }
 0x381   : > { %4010 = vmatprep.subr.bf16.mxu0 %v4009_v34  ;;  %3983 = vmatprep.subr.bf16.mxu1 %v4196_v57  ;;  %v8047_v15 = vld [vmem:[#allocation20_spill] sm:$0xff]  ;;  %v8055_v43 = vld [vmem:[#allocation83_spill] sm:$0xff] }
 0x382   : > { %2175 = vrot.lane.b32.xlu0 %v5204_v27, %s4572_s21 }
 0x383   : > { %4012 = vmatpush3.bf16.msra.mxu0 %v4009_v34  ;;  %v8046_v34 = vld [vmem:[#allocation29_spill] sm:$0xff] }
 0x384   : > { %3984 = vmatpush3.bf16.msra.mxu1 %v4196_v57  ;;  %2181 = vrot.lane.b32.xlu1 %v5363_v37, %s4572_s21  ;;  %v8048_v57 = vld [vmem:[#allocation81_spill] sm:$0xff] }
 0x385   : > { %3985 = vmatprep.subr.bf16.mxu1 %v4197_v10 }
 0x386   : > { %2179 = vrot.lane.b32.xlu0 %v5360_v11, %s4572_s21  ;;  %3966 = vmatmul.mubr.msk.bf16.vlgmr.msra.gmra.mrb[0].mxu0 %vm578_vm1, %v8043_v1 }
 0x387   : > { %3969 = vmatprep.mubr.msk.bf16.mxu0 %vm578_vm1, %v8044_v20 }
 0x388   : > { %3986 = vmatpush3.bf16.msra.mxu1 %v4197_v10  ;;  %2185 = vrot.lane.b32.xlu1 %v5313_v39, %s4572_s21  ;;  %v8049_v10 = vld [vmem:[#allocation22_spill] sm:$0xff] }
 0x389   : > { %3987 = vmatprep.subr.bf16.mxu1 %v4198_v16 }
 0x38a   : > { %2183 = vrot.lane.b32.xlu0 %v5326_v9, %s4572_s21 }
 0x38c   : > { %3988 = vmatpush3.bf16.msra.mxu1 %v4198_v16  ;;  %2189 = vrot.lane.b32.xlu1 %v8045_v58, %s4572_s21  ;;  %v8050_v16 = vld [vmem:[#allocation24_spill] sm:$0xff] }
 0x38e   : > { %2187 = vrot.lane.b32.xlu0 %v5243_v33, %s4572_s21  ;;  %3970 = vmatmul.mubr.msk.bf16.gmra.mrb[4].mxu0 %vm578_vm1, %v8046_v34 }
 0x38f   : > { %3973 = vmatprep.mubr.msk.bf16.mxu0 %vm578_vm1, %v8047_v15  ;;  %3990 = vmatmul.mubr.msk.bf16.vlgmr.msra.gmra.mrb[0].mxu1 %vm1865_vm8, %v8043_v1  ;;  %v8051_v1 = vld [vmem:[#allocation98_spill] sm:$0xff] }
 0x390   : > { %2193 = vrot.lane.b32.xlu1 %v8048_v57, %s4572_s21  ;;  %3993 = vmatprep.mubr.msk.bf16.mxu1 %vm1865_vm8, %v8044_v20  ;;  %v8052_v20 = vld [vmem:[#allocation91_spill] sm:$0xff] }
 0x392   : > { %2191 = vrot.lane.b32.xlu0 %v5201_v18, %s4572_s21 }
 0x394   : > { %2197 = vrot.lane.b32.xlu1 %v5382_v40, %s4572_s21 }
 0x396   : > { %2195 = vrot.lane.b32.xlu0 %v5379_v32, %s4572_s21  ;;  %3974 = vmatmul.mubr.msk.bf16.gmra.mrb[8].mxu0 %vm578_vm1, %v8049_v10 }
 0x397   : > { %3977 = vmatprep.mubr.msk.bf16.mxu0 %vm578_vm1, %v8050_v16  ;;  %3994 = vmatmul.mubr.msk.bf16.gmra.mrb[4].mxu1 %vm1865_vm8, %v8046_v34  ;;  %v8056_v34 = vld [vmem:[#allocation89_spill] sm:$0xff] }
 0x398   : > { %2201 = vrot.lane.b32.xlu1 %v8051_v1, %s4572_s21  ;;  %3997 = vmatprep.mubr.msk.bf16.mxu1 %vm1865_vm8, %v8047_v15  ;;  %v8057_v15 = vld [vmem:[#allocation100_spill] sm:$0xff] }
 0x399   : > { %v8058_v1 = vld [vmem:[#allocation92_spill] sm:$0xff] }
 0x39a   : > { %2199 = vrot.lane.b32.xlu0 %v5344_v12, %s4572_s21 }
 0x39c   : > { %3131 = vrot.lane.b32.xlu1 %v8053_v36, %s4573_s18 }
 0x39e   : > { %3133 = vrot.lane.b32.xlu0 %v8052_v20, %s4573_s18  ;;  %3978 = vmatmul.mubr.msk.bf16.gmra.mrb[12].mxu0 %vm578_vm1, %v8054_v22 }
 0x39f   : > { %3998 = vmatmul.mubr.msk.bf16.gmra.mrb[8].mxu1 %vm1865_vm8, %v8049_v10  ;;  %v8059_v10 = vld [vmem:[#allocation86_spill] sm:$0xff] }
 0x3a0   : > { %4001 = vmatprep.mubr.msk.bf16.mxu1 %vm1865_vm8, %v8050_v16 }
 0x3a2   : > { %3135 = vrot.lane.b32.xlu0 %v8055_v43, %s4573_s18 }
 0x3a6   : > { %3137 = vrot.lane.b32.xlu0 %v8056_v34, %s4573_s18 }
 0x3a7   : > { %4002 = vmatmul.mubr.msk.bf16.gmra.mrb[12].mxu1 %vm1865_vm8, %v8054_v22 }
 0x3aa   : > { %3139 = vrot.lane.b32.xlu0 %v8057_v15, %s4573_s18 }
 0x3ae   : > { %3141 = vrot.lane.b32.xlu0 %v5401_v17, %s4573_s18 }
 0x3b2   : > { %3143 = vrot.lane.b32.xlu0 %v8058_v1, %s4573_s18 }
 0x3b6   : > { %3145 = vrot.lane.b32.xlu0 %v5396_v24, %s4573_s18 }
 0x3ba   : > { %3147 = vrot.lane.b32.xlu0 %v8059_v10, %s4573_s18 }
 0x3ee   : > { %v2174_v40 = vpop.permute.xlu1 %2173 }
 0x3ef   : > { %v2220_v30 = vsub.f32 %v5099_v52, %v2174_v40 }
 0x3f0   : > { %v2172_v16 = vpop.permute.xlu0 %2171 }
 0x3f1   : > { %v2219_v42 = vsub.f32 %v5072_v7, %v2172_v16  ;;  %v2237_v22 = vmul.f32 1.442695, %v2220_v30 }
 0x3f2   : > { %v2178_v12 = vpop.permute.xlu1 %2177 }
 0x3f3   : > { %v2235_v59 = vmul.f32 1.442695, %v2219_v42  ;;  %v2222_v1 = vsub.f32 %v5075_v8, %v2178_v12 }
 0x3f4   : > { %v2176_v41 = vpop.permute.xlu0 %2175 }
 0x3f5   : > { %4199 = vpow2.f32 %v2235_v59  ;;  %v2221_v57 = vsub.f32 %v5060_v62, %v2176_v41  ;;  %v2241_v55 = vmul.f32 1.442695, %v2222_v1 }
 0x3f6   : > { %4201 = vpow2.f32 %v2237_v22  ;;  %v2182_v39 = vpop.permute.xlu1 %2181 }
 0x3f7   : > { %v2239_v24 = vmul.f32 1.442695, %v2221_v57  ;;  %v2224_v16 = vsub.f32 %v5142_v44, %v2182_v39 }
 0x3f8   : > { %v2180_v58 = vpop.permute.xlu0 %2179 }
 0x3f9   : > { %4203 = vpow2.f32 %v2239_v24  ;;  %v2223_v10 = vsub.f32 %v5130_v56, %v2180_v58  ;;  %v2245_v30 = vmul.f32 1.442695, %v2224_v16 }
 0x3fa   : > { %4205 = vpow2.f32 %v2241_v55  ;;  %v2186_v59 = vpop.permute.xlu1 %2185 }
 0x3fb   : > { %v2243_v40 = vmul.f32 1.442695, %v2223_v10  ;;  %v2226_v22 = vsub.f32 %v5122_v53, %v2186_v59 }
 0x3fc   : > { %v2184_v42 = vpop.permute.xlu0 %2183 }
 0x3fd   : > { %4207 = vpow2.f32 %v2243_v40  ;;  %v2225_v41 = vsub.f32 %v5110_v45, %v2184_v42  ;;  %v2249_v58 = vmul.f32 1.442695, %v2226_v22 }
 0x3fe   : > { %4209 = vpow2.f32 %v2245_v30  ;;  %v2190_v55 = vpop.permute.xlu1 %2189 }
 0x3ff   : > { %v4200_v12 = vpop.eup %4199  ;;  %v2247_v57 = vmul.f32 1.442695, %v2225_v41  ;;  %v2228_v10 = vsub.f32 %v5102_v35, %v2190_v55 }
 0x400   : > { %v4202_v1 = vpop.eup %4201  ;;  %v2188_v24 = vpop.permute.xlu0 %2187  ;;  %2331 = vrot.lane.b32.xlu1 %v4200_v12, %s4574_s24 }
 0x401   : > { %4211 = vpow2.f32 %v2247_v57  ;;  %v2227_v39 = vsub.f32 %v5083_v61, %v2188_v24  ;;  %2333 = vrot.lane.b32.xlu0 %v4202_v1, %s4574_s24  ;;  %v2253_v30 = vmul.f32 1.442695, %v2228_v10 }
 0x402   : > { %4213 = vpow2.f32 %v2249_v58  ;;  %v2194_v22 = vpop.permute.xlu1 %2193 }
 0x403   : > { %v4204_v16 = vpop.eup %4203  ;;  %v2251_v40 = vmul.f32 1.442695, %v2227_v39  ;;  %v2230_v12 = vsub.f32 %v5086_v0, %v2194_v22 }
 0x404   : > { %v2192_v42 = vpop.permute.xlu0 %2191  ;;  %2335 = vrot.lane.b32.xlu1 %v4204_v16, %s4574_s24  ;;  %v4206_v41 = vpop.eup %4205 }
 0x405   : > { %4215 = vpow2.f32 %v2251_v40  ;;  %v2229_v59 = vsub.f32 %v5063_v63, %v2192_v42  ;;  %v2257_v55 = vmul.f32 1.442695, %v2230_v12 }
 0x406   : > { %4217 = vpow2.f32 %v2253_v30  ;;  %v2198_v10 = vpop.permute.xlu1 %2197 }
 0x407   : > { %v4208_v57 = vpop.eup %4207  ;;  %v2255_v24 = vmul.f32 1.442695, %v2229_v59  ;;  %v2232_v16 = vsub.f32 %v5150_v49, %v2198_v10  ;;  %v5858_v49 = vld [vmem:[#allocation6] ss:$0 sm:$0xff] }
 0x408   : > { %v2196_v1 = vpop.permute.xlu0 %2195  ;;  %2339 = vrot.lane.b32.xlu0 %v4208_v57, %s4574_s24  ;;  %2337 = vrot.lane.b32.xlu1 %v4206_v41, %s4574_s24  ;;  %v4210_v58 = vpop.eup %4209 }
 0x409   : > { %4219 = vpow2.f32 %v2255_v24  ;;  %v2231_v39 = vsub.f32 %v5147_v2, %v2196_v1  ;;  %v2261_v30 = vmul.f32 1.442695, %v2232_v16  ;;  %v8060_v16 = vld [vmem:[#allocation94_spill] sm:$0xff] }
 0x40a   : > { %4221 = vpow2.f32 %v2257_v55 }
 0x40b   : > { %v4212_v40 = vpop.eup %4211  ;;  %v2259_v42 = vmul.f32 1.442695, %v2231_v39 }
 0x40c   : > { %v2200_v22 = vpop.permute.xlu0 %2199  ;;  %2343 = vrot.lane.b32.xlu0 %v4212_v40, %s4574_s24  ;;  %2341 = vrot.lane.b32.xlu1 %v4210_v58, %s4574_s24  ;;  %v4214_v59 = vpop.eup %4213  ;;  %v8061_v40 = vld [vmem:[#allocation25_spill] sm:$0xff] }
 0x40d   : > { %4223 = vpow2.f32 %v2259_v42  ;;  %v2233_v41 = vsub.f32 %v5135_v6, %v2200_v22  ;;  %v8062_v42 = vld [vmem:[#allocation85_spill] sm:$0xff]  ;;  %v8063_v22 = vld [vmem:[#allocation28_spill] sm:$0xff]  ;;  %vm2140_vm10 = vcmp.eq.s32.totalorder %v8061_v40, 255 }
 0x40e   : > { %4225 = vpow2.f32 %v2261_v30  ;;  %v8064_v30 = vld [vmem:[#allocation90_spill] sm:$0xff]  ;;  %vm2142_vm14 = vcmp.eq.s32.totalorder %v8063_v22, 255 }
 0x40f   : > { %v4216_v12 = vpop.eup %4215  ;;  %v2263_v57 = vmul.f32 1.442695, %v2233_v41  ;;  %v2202_v41 = vpop.permute.xlu1 %2201 }
 0x410   : > { %2347 = vrot.lane.b32.xlu0 %v4216_v12, %s4574_s24  ;;  %2345 = vrot.lane.b32.xlu1 %v4214_v59, %s4574_s24  ;;  %v4218_v24 = vpop.eup %4217  ;;  %v8065_v59 = vld [vmem:[#allocation38_spill] sm:$0xff]  ;;  %v2234_v12 = vsub.f32 %v5127_v51, %v2202_v41  ;;  %v8072_v41 = vld [vmem:[#allocation45_spill] sm:$0xff] }
 0x411   : > { %4227 = vpow2.f32 %v2263_v57  ;;  %v8066_v57 = vld [vmem:[#allocation105_spill] sm:$0xff]  ;;  %vm2144_vm13 = vcmp.eq.s32.totalorder %v8065_v59, 255 }
 0x413   : > { %v4220_v1 = vpop.eup %4219 }
 0x414   : > { %2351 = vrot.lane.b32.xlu0 %v4220_v1, %s4574_s24  ;;  %2349 = vrot.lane.b32.xlu1 %v4218_v24, %s4574_s24  ;;  %v4222_v55 = vpop.eup %4221  ;;  %v8067_v24 = vld [vmem:[#allocation46_spill] sm:$0xff]  ;;  %v2265_v1 = vmul.f32 1.442695, %v2234_v12 }
 0x416   : > { %4229 = vpow2.f32 %v2265_v1  ;;  %v8073_v1 = vld [vmem:[#allocation26_spill] sm:$0xff] }
 0x417   : > { %v4224_v58 = vpop.eup %4223  ;;  %4231 = vlog2.f32 %v5558_v38  ;;  %vm2141_vm0 = vcmp.eq.s32.totalorder %v8073_v1, 255 }
 0x418   : > { %2355 = vrot.lane.b32.xlu0 %v4224_v58, %s4574_s24  ;;  %2353 = vrot.lane.b32.xlu1 %v4222_v55, %s4574_s24  ;;  %v4226_v39 = vpop.eup %4225  ;;  %v8068_v55 = vld [vmem:[#allocation33_spill] sm:$0xff]  ;;  %4233 = vlog2.f32 %v5632_v26 }
 0x419   : > { %v8069_v58 = vld [vmem:[#allocation37_spill] sm:$0xff]  ;;  %4235 = vlog2.f32 %v5625_v28 }
 0x41a   : > { %4237 = vlog2.f32 %v5657_v50 }
 0x41b   : > { %v4228_v10 = vpop.eup %4227  ;;  %4239 = vlog2.f32 %v5576_v3 }
 0x41c   : > { %2359 = vrot.lane.b32.xlu0 %v4228_v10, %s4574_s24  ;;  %2357 = vrot.lane.b32.xlu1 %v4226_v39, %s4574_s24  ;;  %v8070_v39 = vld [vmem:[#allocation41_spill] sm:$0xff]  ;;  %v8071_v10 = vld [vmem:[#allocation32_spill] sm:$0xff]  ;;  %4241 = vlog2.f32 %v5594_v21 }
 0x41d   : > { %vm7875_vm1 = vcmp.eq.s32.totalorder %v8071_v10, 255 }
 0x420   : > { %3149 = vrot.lane.b32.xlu0 %v8060_v16, %s4573_s18  ;;  %3053 = vrot.lane.b32.xlu1 %v8061_v40, %s4574_s24  ;;  %v4230_v12 = vpop.eup %4229 }
 0x424   : > { %3151 = vrot.lane.b32.xlu0 %v8062_v42, %s4573_s18  ;;  %3057 = vrot.lane.b32.xlu1 %v8063_v22, %s4574_s24 }
 0x428   : > { %3153 = vrot.lane.b32.xlu0 %v8064_v30, %s4573_s18  ;;  %3061 = vrot.lane.b32.xlu1 %v8065_v59, %s4574_s24  ;;  %v8077_v30 = vld [vmem:[#allocation52_spill] sm:$0xff] }
 0x429   : > { %vm2149_vm6 = vcmp.eq.s32.totalorder %v8077_v30, 255 }
 0x42c   : > { %3155 = vrot.lane.b32.xlu0 %v8066_v57, %s4573_s18  ;;  %3065 = vrot.lane.b32.xlu1 %v8067_v24, %s4574_s24  ;;  %v4232_v57 = vpop.eup %4231 }
 0x42d   : > { %v4234_v42 = vpop.eup %4233  ;;  %v1435_v16 = vmul.f32 0.6931472, %v4232_v57 }
 0x42f   : > { %v1464_v51 = vadd.f32 %v1435_v16, %v5204_v27 }
 0x430   : > { %3157 = vrot.lane.b32.xlu0 %v5405_v23, %s4573_s18  ;;  %3069 = vrot.lane.b32.xlu1 %v8068_v55, %s4574_s24  ;;  %v8076_v23 = vld [vmem:[#allocation49_spill] sm:$0xff] }
 0x431   : > { %v1636_v2 = vmul.f32 256.0, %v1464_v51  ;;  %v1684_v0 = vsub.f32 %v8055_v43, %v1464_v51  ;;  %vm2147_vm8 = vcmp.eq.s32.totalorder %v8076_v23, 255 }
 0x434   : > { %3159 = vrot.lane.b32.xlu0 %v5501_v14, %s4573_s18  ;;  %3073 = vrot.lane.b32.xlu1 %v8069_v58, %s4574_s24  ;;  %v8074_v14 = vld [vmem:[#allocation34_spill] sm:$0xff] }
 0x435   : > { %vm2143_vm15 = vcmp.eq.s32.totalorder %v8074_v14, 255 }
 0x438   : > { %3161 = vrot.lane.b32.xlu0 %v5472_v5, %s4573_s18  ;;  %3077 = vrot.lane.b32.xlu1 %v8070_v39, %s4574_s24  ;;  %v8075_v5 = vld [vmem:[#allocation42_spill] sm:$0xff] }
 0x439   : > { %vm2145_vm12 = vcmp.eq.s32.totalorder %v8075_v5, 255 }
 0x43c   : > { %3051 = vrot.lane.b32.xlu0 %v8071_v10, %s4574_s24  ;;  %3081 = vrot.lane.b32.xlu1 %v8072_v41, %s4574_s24  ;;  %v8117_v10 = vmov 2.0  }
 0x440   : > { %3055 = vrot.lane.b32.xlu0 %v8073_v1, %s4574_s24  ;;  %2361 = vrot.lane.b32.xlu1 %v4230_v12, %s4574_s24  ;;  %v1437_v12 = vmul.f32 0.6931472, %v4234_v42 }
 0x442   : > { %v1465_v6 = vadd.f32 %v1437_v12, %v8042_v31  ;;  %v1700_v12 = vmul.f32 0.8996094, %v1684_v0 }
 0x444   : > { %3059 = vrot.lane.b32.xlu0 %v8074_v14, %s4574_s24  ;;  %v1637_v61 = vmul.f32 256.0, %v1465_v6  ;;  %v1685_v42 = vsub.f32 %v8056_v34, %v1465_v6 }
 0x446   : > { %v1701_v43 = vmul.f32 0.8996094, %v1685_v42 }
 0x448   : > { %3063 = vrot.lane.b32.xlu0 %v8075_v5, %s4574_s24 }
 0x44c   : > { %3067 = vrot.lane.b32.xlu0 %v8076_v23, %s4574_s24 }
 0x450   : > { %3071 = vrot.lane.b32.xlu0 %v8077_v30, %s4574_s24 }
 0x454   : > { %3075 = vrot.lane.b32.xlu0 %v5000_v46, %s4574_s24 }
 0x458   : > { %3079 = vrot.lane.b32.xlu0 %v5011_v48, %s4574_s24 }
 0x459   : > { %v3967_v63 = vpop.f32.mrb[0].mxu0 }
 0x45a   : > { %v5862_v35 = vadd.f32 %v3967_v63, %v5858_v49  ;;  %v1548_v57 = vpop.f32.mrb[1].mxu0 }
 0x45b   : > { %v3968_v53 = vpop.f32.mrb[2].mxu0 }
 0x45c   : > { %8078 = vst [vmem:[#allocation129_spill] sm:$0xff] %v5862_v35  ;;  %v1652_v16 = vsub.f32 %v5862_v35, %v1636_v2  ;;  %v5867_v44 = vadd.f32 %v3968_v53, %v5858_v49  ;;  %v5869_v8 = vpop.f32.mrb[3].mxu0 }
 0x45e   : > { %8079 = vst [vmem:[#allocation130_spill] sm:$0xff] %v5867_v44  ;;  %v1668_v45 = vmul.f32 0.000390625, %v1652_v16  ;;  %v1653_v51 = vsub.f32 %v5867_v44, %v1637_v61 }
 0x460   : > { %v1669_v56 = vmul.f32 0.000390625, %v1653_v51  ;;  %v1716_v63 = vadd.f32 %v1700_v12, %v1668_v45  ;;  %v5888_v12 = vld [vmem:[%s7579_s3] ss:$0 sm:$0xff] }
 0x461   : > { %v5872_v62 = vpop.f32.mrb[4].mxu0 }
 0x462   : > { %8080 = vst [vmem:[#allocation131_spill] sm:$0xff] %v5872_v62  ;;  %v1732_v7 = vsub.f32 0.0, %v1716_v63  ;;  %v1717_v41 = vadd.f32 %v1701_v43, %v1669_v56  ;;  %v5874_v6 = vpop.f32.mrb[5].mxu0  ;;  %v3991_v34 = vpop.f32.mrb[0].mxu1 }
 0x463   : > { %v5876_v2 = vpop.f32.mrb[6].mxu0  ;;  %v5880_v53 = vpop.f32.mrb[1].mxu1  ;;  %v5897_v35 = vadd.f32 %v3991_v34, %v5888_v12 }
 0x464   : > { %8081 = vst [vmem:[#allocation132_spill] sm:$0xff] %v5876_v2  ;;  %1766 = vrot.lane.b32.xlu1 %v1732_v7, %s4574_s24  ;;  %v1733_v0 = vsub.f32 0.0, %v1717_v41  ;;  %v1567_v61 = vpop.f32.mrb[7].mxu0  ;;  %v5882_v42 = vpop.f32.mrb[2].mxu1 }
 0x465   : > { %v1919_v45 = vpop.f32.mrb[3].mxu1  ;;  %v4236_v43 = vpop.eup %4235  ;;  %8084 = vst [vmem:[#allocation135_spill] sm:$0xff] %v5897_v35 }
 0x466   : > { %v1431_v44 = vmul.f32 0.6931472, %v4236_v43  ;;  %v5899_v2 = vpop.permute.xlu0 %3133 }
 0x467   : > { %8085 = vst [vmem:[#allocation136_spill] sm:$0xff] %v5899_v2  ;;  %v5916_v2 = vadd.f32 %v5858_v49, %v1548_v57 }
 0x468   : > { %1768 = vrot.lane.b32.xlu1 %v1733_v0, %s4574_s24  ;;  %v1462_v39 = vadd.f32 %v1431_v44, %v8041_v4 }
 0x469   : > { %8090 = vst [vmem:[#allocation141_spill] sm:$0xff] %v5916_v2 }
 0x46a   : > { %v3995_v16 = vpop.f32.mrb[4].mxu1 }
 0x46b   : > { %v1932_v56 = vpop.f32.mrb[5].mxu1 }
 0x46c   : > { %v3996_v51 = vpop.f32.mrb[6].mxu1 }
 0x46d   : > { %v5891_v7 = vadd.f32 %v3996_v51, %v5888_v12  ;;  %v1935_v41 = vpop.f32.mrb[7].mxu1 }
 0x46e   : > { %v5894_v63 = vadd.f32 %v5888_v12, %v1935_v41 }
 0x46f   : > { %8082 = vst [vmem:[#allocation133_spill] sm:$0xff] %v5891_v7 }
 0x470   : > { %8083 = vst [vmem:[#allocation134_spill] sm:$0xff] %v5894_v63  ;;  %v5918_v63 = vpop.permute.xlu0 %3135 }
 0x471   : > { %8091 = vst [vmem:[#allocation142_spill] sm:$0xff] %v5918_v63 }
 0x472   : > { %v3999_v0 = vpop.f32.mrb[8].mxu1 }
 0x473   : > { %v5902_v62 = vadd.f32 %v3999_v0, %v5888_v12  ;;  %v1948_v48 = vpop.f32.mrb[9].mxu1  ;;  %v1634_v0 = vmul.f32 256.0, %v1462_v39 }
 0x474   : > { %v5907_v51 = vadd.f32 %v5888_v12, %v1948_v48  ;;  %v4000_v41 = vpop.f32.mrb[10].mxu1  ;;  %v5932_v63 = vpop.permute.xlu0 %3137 }
 0x475   : > { %8086 = vst [vmem:[#allocation137_spill] sm:$0xff] %v5902_v62  ;;  %v5910_v43 = vadd.f32 %v4000_v41, %v5888_v12  ;;  %v1951_v34 = vpop.f32.mrb[11].mxu1  ;;  %v1682_v41 = vsub.f32 %v8053_v36, %v1462_v39  ;;  %8093 = vst [vmem:[#allocation144_spill] sm:$0xff] %v5932_v63 }
 0x476   : > { %8087 = vst [vmem:[#allocation138_spill] sm:$0xff] %v5907_v51  ;;  %v5913_v58 = vadd.f32 %v5888_v12, %v1951_v34 }
 0x477   : > { %1983 = vmax.xlane.f32.xlu0 %v5897_v35  ;;  %8088 = vst [vmem:[#allocation139_spill] sm:$0xff] %v5910_v43  ;;  %v1650_v35 = vsub.f32 %v5916_v2, %v1634_v0  ;;  %v1698_v7 = vmul.f32 0.8996094, %v1682_v41  ;;  %v4238_v0 = vpop.eup %4237 }
 0x478   : > { %8089 = vst [vmem:[#allocation140_spill] sm:$0xff] %v5913_v58  ;;  %v5937_v2 = vpop.permute.xlu0 %3139  ;;  %v1441_v39 = vmul.f32 0.6931472, %v4238_v0 }
 0x479   : > { %8095 = vst [vmem:[#allocation146_spill] sm:$0xff] %v5937_v2  ;;  %v5965_v2 = vpop.permute.xlu1 %3131 }
 0x47a   : > { %v4003_v44 = vpop.f32.mrb[12].mxu1  ;;  %8103 = vst [vmem:[#allocation154_spill] sm:$0xff] %v5965_v2 }
 0x47b   : > { %v5922_v48 = vadd.f32 %v4003_v44, %v5888_v12  ;;  %v1964_v43 = vpop.f32.mrb[13].mxu1  ;;  %v1666_v44 = vmul.f32 0.000390625, %v1650_v35  ;;  %v1467_v35 = vadd.f32 %v1441_v39, %v5363_v37 }
 0x47c   : > { %v5927_v34 = vadd.f32 %v5888_v12, %v1964_v43  ;;  %v4004_v58 = vpop.f32.mrb[14].mxu1  ;;  %v5940_v43 = vadd.f32 %v5888_v12, %v1919_v45 }
 0x47d   : > { %v5930_v57 = vadd.f32 %v4004_v58, %v5888_v12  ;;  %v1967_v46 = vpop.f32.mrb[15].mxu1  ;;  %v1714_v52 = vadd.f32 %v1698_v7, %v1666_v44  ;;  %v5943_v58 = vpop.permute.xlu0 %3141  ;;  %v5952_v7 = vadd.f32 %v5888_v12, %v1932_v56  ;;  %v1639_v45 = vmul.f32 256.0, %v1467_v35 }
 0x47e   : > { %v5935_v55 = vadd.f32 %v5888_v12, %v1967_v46  ;;  %8096 = vst [vmem:[#allocation147_spill] sm:$0xff] %v5940_v43  ;;  %8097 = vst [vmem:[#allocation148_spill] sm:$0xff] %v5943_v58  ;;  %v5947_v46 = vadd.f32 %v3995_v16, %v5888_v12  ;;  %v1687_v16 = vsub.f32 %v5401_v17, %v1467_v35  ;;  %v5970_v58 = vpop.permute.xlu1 %2331  ;;  %v4240_v17 = vpop.eup %4239 }
 0x47f   : > { %8092 = vst [vmem:[#allocation143_spill] sm:$0xff] %v5930_v57  ;;  %v1730_v36 = vsub.f32 0.0, %v1714_v52  ;;  %8099 = vst [vmem:[#allocation150_spill] sm:$0xff] %v5952_v7  ;;  %v5955_v52 = vadd.f32 %v5858_v49, %v1567_v61  ;;  %v5977_v35 = vadd.f32 %v5888_v12, %v5880_v53  ;;  %v5992_v53 = vadd.f32 %v5882_v42, %v5888_v12 }
 0x480   : > { %8094 = vst [vmem:[#allocation145_spill] sm:$0xff] %v5935_v55  ;;  %8098 = vst [vmem:[#allocation149_spill] sm:$0xff] %v5947_v46  ;;  %v1703_v39 = vmul.f32 0.8996094, %v1687_v16  ;;  %v2267_v16 = vsub.f32 %v5508_v60, %v8041_v4  ;;  %v6000_v60 = vmax.f32 %v5204_v27, 0.0  ;;  %v2269_v42 = vsub.f32 %v5515_v25, %v5204_v27 }
 0x481   : > { %8100 = vst [vmem:[#allocation151_spill] sm:$0xff] %v5955_v52  ;;  %v5957_v41 = vpop.permute.xlu0 %3143  ;;  %v1655_v44 = vsub.f32 %v5955_v52, %v1639_v45  ;;  %8105 = vst [vmem:[#allocation156_spill] sm:$0xff] %v5977_v35  ;;  %v5980_v45 = vmax.f32 %v8041_v4, 0.0  ;;  %v5995_v52 = vmax.f32 %v5277_v29, 0.0 }
 0x482   : > { %8101 = vst [vmem:[#allocation152_spill] sm:$0xff] %v5957_v41  ;;  %8106 = vst [vmem:[#allocation157_spill] sm:$0xff] %v5992_v53  ;;  %v2287_v25 = vmul.f32 1.442695, %v2269_v42 }
 0x483   : > { %8107 = vst [vmem:[#allocation158_spill] sm:$0xff] %v5995_v52  ;;  %8108 = vst [vmem:[#allocation159_spill] sm:$0xff] %v6000_v60 }
 0x485   : > { %v5962_v0 = vpop.permute.xlu0 %3145 }
 0x486   : > { %8102 = vst [vmem:[#allocation153_spill] sm:$0xff] %v5962_v0  ;;  %v2283_v0 = vmul.f32 1.442695, %v2267_v16 }
 0x488   : > { %4243 = vpow2.f32 %v2283_v0  ;;  %v6026_v0 = vmax.f32 %v5360_v11, 0.0 }
 0x489   : > { %v5967_v61 = vpop.permute.xlu0 %3147 }
 0x48a   : > { %8104 = vst [vmem:[#allocation155_spill] sm:$0xff] %v5967_v61  ;;  %8110 = vst [vmem:[#allocation161_spill] sm:$0xff] %v6026_v0 }
 0x48c   : > { %1981 = vmax.xlane.f32.xlu1 %v5940_v43 }
 0x48d   : > { %1762 = vrot.lane.b32.xlu0 %v1730_v36, %s4574_s24  ;;  %v1671_v36 = vmul.f32 0.000390625, %v1655_v44  ;;  %v5972_v63 = vpop.permute.xlu0 %2333  ;;  %v1433_v44 = vmul.f32 0.6931472, %v4240_v17  ;;  %v2268_v17 = vsub.f32 %v5476_v13, %v5277_v29 }
 0x48f   : > { %v1719_v56 = vadd.f32 %v1703_v39, %v1671_v36  ;;  %v5984_v36 = vpop.permute.xlu1 %2335  ;;  %v1463_v61 = vadd.f32 %v1433_v44, %v5277_v29  ;;  %v2285_v13 = vmul.f32 1.442695, %v2268_v17  ;;  %v6014_v44 = vadd.f32 %v5858_v49, %v5869_v8 }
 0x490   : > { %1991 = vmax.xlane.f32.xlu1 %v5947_v46  ;;  %v2508_v46 = vsub.f32 0.0, %v5995_v52  ;;  %v2445_v17 = vsub.f32 %v5204_v27, %v6000_v60 }
 0x491   : > { %v1735_v41 = vsub.f32 0.0, %v1719_v56  ;;  %v5986_v39 = vpop.permute.xlu0 %2339  ;;  %v4242_v56 = vpop.eup %4241  ;;  %8109 = vst [vmem:[#allocation160_spill] sm:$0xff] %v6014_v44  ;;  %v1635_v16 = vmul.f32 256.0, %v1463_v61  ;;  %v1683_v27 = vsub.f32 %v8052_v20, %v1463_v61  ;;  %v2511_v20 = vsub.f32 0.0, %v6026_v0 }
 0x492   : > { %v1439_v2 = vmul.f32 0.6931472, %v4242_v56  ;;  %v2525_v55 = vmul.f32 1.442695, %v2508_v46 }
 0x494   : > { %1987 = vmax.xlane.f32.xlu1 %v5952_v7  ;;  %v6003_v7 = vpop.permute.xlu1 %2337  ;;  %v1466_v56 = vadd.f32 %v1439_v2, %v5360_v11  ;;  %v8111_v2 = vld [vmem:[#allocation118_spill] sm:$0xff] }
 0x495   : > { %v6009_v43 = vpop.permute.xlu0 %2343  ;;  %v2271_v24 = vsub.f32 %v8111_v2, %v5360_v11  ;;  %v2447_v2 = vsub.f32 %v5360_v11, %v6026_v0  ;;  %v7808_v11 = vmov 2.0  }
 0x496   : > { %v1638_v46 = vmul.f32 256.0, %v1466_v56  ;;  %v6054_v61 = vsel %vm7875_vm1, 1.0, %v7808_v11 }
 0x497   : > { %8114 = vst [vmem:[#allocation164_spill] sm:$0xff] %v6054_v61 }
 0x498   : > { %v6023_v57 = vpop.permute.xlu1 %2341 }
 0x499   : > { %v6031_v42 = vpop.permute.xlu0 %2347 }
 0x4a5   : > { %1772 = vrot.lane.b32.xlu1 %v1735_v41, %s4574_s24  ;;  %v2507_v41 = vsub.f32 0.0, %v5980_v45 }
 0x4a7   : > { %v2523_v12 = vmul.f32 1.442695, %v2507_v41  ;;  %v2444_v41 = vsub.f32 %v5277_v29, %v5995_v52  ;;  %v6035_v29 = vadd.f32 %v5858_v49, %v5874_v6  ;;  %v6041_v52 = vpop.permute.xlu1 %2345  ;;  %v1699_v49 = vmul.f32 0.8996094, %v1683_v27 }
 0x4a8   : > { %v1686_v6 = vsub.f32 %v8057_v15, %v1466_v56  ;;  %v2467_v15 = vmul.f32 1.442695, %v2447_v2  ;;  %v2531_v27 = vmul.f32 1.442695, %v2511_v20  ;;  %v6077_v20 = vmax.f32 %v8042_v31, 0.0 }
 0x4a9   : > { %4245 = vpow2.f32 %v2523_v12  ;;  %8112 = vst [vmem:[#allocation162_spill] sm:$0xff] %v6035_v29 }
 0x4aa   : > { %4247 = vpow2.f32 %v2285_v13  ;;  %v2461_v13 = vmul.f32 1.442695, %v2444_v41 }
 0x4ab   : > { %4249 = vpow2.f32 %v2287_v25  ;;  %v4244_v25 = vpop.eup %4243 }
 0x4ac   : > { %1979 = vmax.xlane.f32.xlu0 %v5977_v35  ;;  %v2509_v35 = vsub.f32 0.0, %v6000_v60  ;;  %4251 = vpow2.f32 %v2525_v55  ;;  %v2291_v60 = vmul.f32 1.442695, %v2271_v24  ;;  %v6047_v24 = vmax.f32 %v5326_v9, 0.0  ;;  %v6049_v55 = vpop.permute.xlu0 %2351 }
 0x4ae   : > { %v2527_v8 = vmul.f32 1.442695, %v2509_v35  ;;  %v2463_v35 = vmul.f32 1.442695, %v2445_v17  ;;  %8113 = vst [vmem:[#allocation163_spill] sm:$0xff] %v6047_v24 }
 0x4b0   : > { %1985 = vmax.xlane.f32.xlu0 %v5992_v53  ;;  %v2443_v53 = vsub.f32 %v8041_v4, %v5980_v45  ;;  %v1651_v4 = vsub.f32 %v6014_v44, %v1635_v16  ;;  %4253 = vpow2.f32 %v2527_v8  ;;  %v1654_v44 = vsub.f32 %v6035_v29, %v1638_v46 }
 0x4b1   : > { %v1702_v8 = vmul.f32 0.8996094, %v1686_v6  ;;  %v6060_v46 = vsel %vm7875_vm1, 0.0, %v4244_v25 }
 0x4b2   : > { %v2459_v12 = vmul.f32 1.442695, %v2443_v53  ;;  %v1667_v16 = vmul.f32 0.000390625, %v1651_v4  ;;  %v2273_v53 = vsub.f32 %v5526_v54, %v5326_v9  ;;  %v1670_v41 = vmul.f32 0.000390625, %v1654_v44 }
 0x4b3   : > { %v4246_v56 = vpop.eup %4245  ;;  %v2513_v44 = vsub.f32 0.0, %v6047_v24 }
 0x4b4   : > { %4255 = vpow2.f32 %v2459_v12  ;;  %v1715_v17 = vadd.f32 %v1699_v49, %v1667_v16  ;;  %v4248_v4 = vpop.eup %4247  ;;  %v6063_v12 = vmax.f32 %v5243_v33, 0.0  ;;  %v6073_v16 = vpop.permute.xlu1 %2349  ;;  %v2295_v6 = vmul.f32 1.442695, %v2273_v53 }
 0x4b5   : > { %4257 = vpow2.f32 %v2461_v13  ;;  %v2449_v13 = vsub.f32 %v5326_v9, %v6047_v24  ;;  %v4250_v49 = vpop.eup %4249  ;;  %v6080_v11 = vmul.f32 %v4246_v56, %v6054_v61  ;;  %v1718_v29 = vadd.f32 %v1702_v8, %v1670_v41 }
 0x4b6   : > { %4259 = vpow2.f32 %v2291_v60  ;;  %8115 = vst [vmem:[#allocation165_spill] sm:$0xff] %v6063_v12  ;;  %v8116_v60 = vld [vmem:[#allocation110_spill] sm:$0xff]  ;;  %v4252_v25 = vpop.eup %4251  ;;  %v1731_v9 = vsub.f32 0.0, %v1715_v17  ;;  %v6096_v53 = vsel %vm2141_vm0, 1.0, %v8117_v10  ;;  %v6100_v61 = vsel %vm2141_vm0, 0.0, %v4250_v49 }
 0x4b7   : > { %4261 = vpow2.f32 %v2463_v35  ;;  %v2270_v2 = vsub.f32 %v8116_v60, %v8042_v31  ;;  %v2275_v35 = vsub.f32 %v5531_v47, %v5243_v33  ;;  %v6085_v60 = vsel %vm2140_vm10, 1.0, %v8117_v10  ;;  %v6087_v47 = vpop.permute.xlu0 %2355  ;;  %8119 = vst [vmem:[#allocation167_spill] sm:$0xff] %v6096_v53 }
 0x4b8   : > { %4263 = vpow2.f32 %v2467_v15  ;;  %8118 = vst [vmem:[#allocation166_spill] sm:$0xff] %v6085_v60  ;;  %v6091_v15 = vsel %vm2140_vm10, 0.0, %v4248_v4  ;;  %v2471_v17 = vmul.f32 1.442695, %v2449_v13  ;;  %v2535_v41 = vmul.f32 1.442695, %v2513_v44  ;;  %v6122_v44 = vpop.permute.xlu1 %2353 }
 0x4b9   : > { %4265 = vpow2.f32 %v2531_v27  ;;  %v2289_v56 = vmul.f32 1.442695, %v2270_v2  ;;  %v6105_v4 = vmul.f32 %v4252_v25, %v6085_v60  ;;  %v2299_v40 = vmul.f32 1.442695, %v2275_v35 }
 0x4ba   : > { %v4254_v54 = vpop.eup %4253  ;;  %v2451_v24 = vsub.f32 %v5243_v33, %v6063_v12  ;;  %v2510_v27 = vsub.f32 0.0, %v6077_v20  ;;  %v6118_v13 = vsel %vm2143_vm15, 1.0, %v8117_v10  ;;  %v1734_v35 = vsub.f32 0.0, %v1718_v29 }
 0x4bb   : > { %v6113_v49 = vmul.f32 %v4254_v54, %v6096_v53  ;;  %8120 = vst [vmem:[#allocation168_spill] sm:$0xff] %v6118_v13  ;;  %v2379_v60 = vsub.f32 %v5625_v28, %v5970_v58  ;;  %4267 = vpow2.f32 %v2289_v56  ;;  %v8121_v54 = vld [vmem:[#allocation111_spill] sm:$0xff]  ;;  %v2515_v33 = vsub.f32 0.0, %v6063_v12  ;;  %v6135_v0 = vpop.permute.xlu0 %2359 }
 0x4bc   : > { %v2272_v1 = vsub.f32 %v8121_v54, %v5363_v37  ;;  %4269 = vpow2.f32 %v2295_v6  ;;  %8123 = vst [vmem:[#allocation170_spill] sm:$0xff] %v6135_v0  ;;  %v6138_v29 = vmax.f32 %v5363_v37, 0.0  ;;  %v2475_v28 = vmul.f32 1.442695, %v2451_v24 }
 0x4bd   : > { %4271 = vpow2.f32 %v2471_v17  ;;  %v2277_v58 = vsub.f32 %v5536_v19, %v5201_v18  ;;  %v2529_v56 = vmul.f32 1.442695, %v2510_v27  ;;  %v6151_v54 = vsel %vm2145_vm12, 1.0, %v8117_v10 }
 0x4be   : > { %v4256_v8 = vpop.eup %4255  ;;  %8124 = vst [vmem:[#allocation171_spill] sm:$0xff] %v6138_v29  ;;  %8125 = vst [vmem:[#allocation172_spill] sm:$0xff] %v6151_v54  ;;  %4273 = vpow2.f32 %v2535_v41  ;;  %v2411_v24 = vsub.f32 %v2379_v60, %v6060_v46  ;;  %v2380_v17 = vsub.f32 %v5576_v3, %v5972_v63  ;;  %v2293_v27 = vmul.f32 1.442695, %v2272_v1  ;;  %v6163_v41 = vpop.permute.xlu1 %2357  ;;  %v8128_v1 = vld [vmem:[#allocation95_spill] sm:$0xff]  ;;  %v8129_v63 = vld [vmem:[#allocation112_spill] sm:$0xff] }
 0x4bf   : > { %v6110_v2 = vpop.eup %4257  ;;  %4275 = vpow2.f32 %v2299_v40  ;;  %v2448_v14 = vsub.f32 %v5363_v37, %v6138_v29  ;;  %v2512_v3 = vsub.f32 0.0, %v6138_v29  ;;  %v6174_v40 = vmax.f32 %v5379_v32, 0.0  ;;  %v6176_v37 = vpop.permute.xlu0 %3149 }
 0x4c0   : > { %v4260_v25 = vpop.eup %4259  ;;  %4277 = vpow2.f32 %v2529_v56  ;;  %8127 = vst [vmem:[#allocation174_spill] sm:$0xff] %v6176_v37  ;;  %v2274_v60 = vsub.f32 %v8129_v63, %v8128_v1  ;;  %v2412_v56 = vsub.f32 %v2380_v17, %v6091_v15  ;;  %v6187_v29 = vmax.f32 %v8128_v1, 0.0 }
 0x4c1   : > { %v6129_v53 = vpop.eup %4261  ;;  %v6146_v6 = vsel %vm2143_vm15, 0.0, %v4260_v25  ;;  %v2539_v25 = vmul.f32 1.442695, %v2515_v33  ;;  %v6171_v33 = vsel %vm2147_vm8, 1.0, %v8117_v10  ;;  %v2469_v0 = vmul.f32 1.442695, %v2448_v14 }
 0x4c2   : > { %8126 = vst [vmem:[#allocation173_spill] sm:$0xff] %v6171_v33  ;;  %v2297_v14 = vmul.f32 1.442695, %v2274_v60  ;;  %v2492_v17 = vmul.f32 %v6110_v2, %v2412_v56 }
 0x4c6   : > { %1764 = vrot.lane.b32.xlu0 %v1731_v9, %s4574_s24  ;;  %v2446_v9 = vsub.f32 %v8042_v31, %v6077_v20  ;;  %v6133_v31 = vmax.f32 %v5201_v18, 0.0 }
 0x4c8   : > { %8122 = vst [vmem:[#allocation169_spill] sm:$0xff] %v6133_v31  ;;  %v2465_v12 = vmul.f32 1.442695, %v2446_v9  ;;  %v2453_v19 = vsub.f32 %v5201_v18, %v6133_v31  ;;  %v2517_v46 = vsub.f32 0.0, %v6133_v31  ;;  %v2381_v18 = vsub.f32 %v5558_v38, %v5984_v36  ;;  %v8130_v36 = vld [vmem:[#allocation77_spill] sm:$0xff] }
 0x4c9   : > { %1999 = vmax.xlane.f32.xlu1 %v5902_v62  ;;  %v2303_v62 = vmul.f32 1.442695, %v2277_v58  ;;  %v2491_v58 = vmul.f32 %v4256_v8, %v2411_v24  ;;  %v6196_v8 = vpop.permute.xlu1 %3053 }
 0x4ca   : > { %1770 = vrot.lane.b32.xlu0 %v1734_v35, %s4574_s24  ;;  %v6153_v35 = vpop.eup %4263  ;;  %4279 = vpow2.f32 %v2465_v12  ;;  %v2479_v31 = vmul.f32 1.442695, %v2453_v19  ;;  %v2533_v12 = vmul.f32 1.442695, %v2512_v3  ;;  %v6192_v38 = vmul.f32 1.442695, %v2517_v46  ;;  %v6207_v3 = vpop.permute.xlu0 %3151 }
 0x4cb   : > { %v4266_v9 = vpop.eup %4265  ;;  %4281 = vpow2.f32 %v2293_v27  ;;  %v2279_v19 = vsub.f32 %v8130_v36, %v5379_v32  ;;  %8131 = vst [vmem:[#allocation175_spill] sm:$0xff] %v6196_v8  ;;  %v2413_v27 = vsub.f32 %v2381_v18, %v6100_v61  ;;  %v2455_v46 = vsub.f32 %v5379_v32, %v6174_v40 }
 0x4cc   : > { %v4268_v37 = vpop.eup %4267  ;;  %4283 = vpow2.f32 %v2475_v28  ;;  %v2571_v28 = vadd.f32 %v6080_v11, %v2491_v58  ;;  %v2450_v11 = vsub.f32 %v8128_v1, %v6187_v29  ;;  %v2519_v18 = vsub.f32 0.0, %v6174_v40  ;;  %v8134_v58 = vld [vmem:[#allocation113_spill] sm:$0xff] }
 0x4cd   : > { %1995 = vmax.xlane.f32.xlu1 %v5907_v51  ;;  %v6184_v51 = vmul.f32 %v4266_v9, %v6118_v13  ;;  %v4270_v15 = vpop.eup %4269  ;;  %4285 = vpow2.f32 %v2539_v25  ;;  %v2382_v9 = vsub.f32 %v5632_v26, %v6003_v7  ;;  %v2398_v60 = vsel %vm2142_vm14, 0.0, %v4268_v37  ;;  %v8133_v37 = vld [vmem:[#allocation88_spill] sm:$0xff]  ;;  %v6239_v22 = vpop.permute.xlu1 %3057  ;;  %v8150_v13 = vld [vmem:[#allocation133_spill] sm:$0xff] }
 0x4ce   : > { %v6198_v24 = vpop.eup %4271  ;;  %4287 = vpow2.f32 %v2469_v0  ;;  %v6215_v2 = vsel %vm2145_vm12, 0.0, %v4270_v15  ;;  %v2514_v26 = vsub.f32 0.0, %v6187_v29  ;;  %v2383_v61 = vsub.f32 %v5594_v21, %v5986_v39 }
 0x4cf   : > { %v4274_v25 = vpop.eup %4273  ;;  %4289 = vpow2.f32 %v2533_v12  ;;  %v6225_v0 = vsel %vm2142_vm14, 1.0, %v8117_v10  ;;  %v2276_v56 = vsub.f32 %v8134_v58, %v8133_v37  ;;  %v2572_v12 = vadd.f32 %v6105_v4, %v2492_v17  ;;  %v6245_v17 = vpop.permute.xlu0 %3153 }
 0x4d0   : > { %v4276_v7 = vpop.eup %4275  ;;  %8132 = vst [vmem:[#allocation176_spill] sm:$0xff] %v6225_v0  ;;  %4291 = vpow2.f32 %v2297_v14  ;;  %v2493_v32 = vmul.f32 %v6129_v53, %v2413_v27  ;;  %v2414_v36 = vsub.f32 %v2382_v9, %v2398_v60  ;;  %v6234_v21 = vsel %vm2149_vm6, 1.0, %v8117_v10 }
 0x4d1   : > { %2007 = vmax.xlane.f32.xlu1 %v5922_v48  ;;  %v4278_v15 = vpop.eup %4277  ;;  %4293 = vlog2.f32 %v2571_v28  ;;  %8135 = vst [vmem:[#allocation177_spill] sm:$0xff] %v6234_v21  ;;  %v2473_v39 = vmul.f32 1.442695, %v2450_v11  ;;  %v6237_v14 = vmax.f32 %v8133_v37, 0.0  ;;  %v2307_v28 = vmul.f32 1.442695, %v2279_v19 }
 0x4d2   : > { %4295 = vpow2.f32 %v2303_v62  ;;  %v2537_v53 = vmul.f32 1.442695, %v2514_v26  ;;  %v2415_v4 = vsub.f32 %v2383_v61, %v6146_v6  ;;  %v6243_v62 = vmul.f32 1.442695, %v2455_v46 }
 0x4d3   : > { %4297 = vpow2.f32 %v2479_v31  ;;  %v2558_v27 = vmul.f32 %v4278_v15, %v6225_v0  ;;  %v2301_v9 = vmul.f32 1.442695, %v2276_v56  ;;  %v2573_v11 = vadd.f32 %v6113_v49, %v2493_v32  ;;  %v8136_v56 = vld [vmem:[#allocation99_spill] sm:$0xff] }
 0x4d4   : > { %v4280_v1 = vpop.eup %4279  ;;  %4299 = vlog2.f32 %v2572_v12  ;;  %v2384_v31 = vsub.f32 %v5657_v50, %v6023_v57  ;;  %v6255_v26 = vmul.f32 1.442695, %v2519_v18  ;;  %v2452_v46 = vsub.f32 %v8133_v37, %v6237_v14  ;;  %v8139_v18 = vld [vmem:[#allocation114_spill] sm:$0xff]  ;;  %v8141_v12 = vld [vmem:[#allocation125_spill] sm:$0xff] }
 0x4d5   : > { %2003 = vmax.xlane.f32.xlu1 %v5927_v34  ;;  %v4282_v58 = vpop.eup %4281  ;;  %v2494_v63 = vmul.f32 %v4280_v1, %v2414_v36  ;;  %4301 = vpow2.f32 %v2473_v39  ;;  %v6262_v61 = vmul.f32 %v4274_v25, %v6151_v54  ;;  %v6265_v32 = vmax.f32 %v8136_v56, 0.0  ;;  %v8138_v36 = vld [vmem:[#allocation81_spill] sm:$0xff]  ;;  %v6276_v25 = vpop.permute.xlu1 %3061 }
 0x4d6   : > { %v6248_v60 = vpop.eup %4283  ;;  %v2400_v6 = vsel %vm2144_vm13, 0.0, %v4282_v58  ;;  %4303 = vpow2.f32 %v2537_v53  ;;  %v2516_v50 = vsub.f32 0.0, %v6237_v14  ;;  %v2495_v49 = vmul.f32 %v6153_v35, %v2415_v4  ;;  %8140 = vst [vmem:[#allocation179_spill] sm:$0xff] %v6276_v25  ;;  %v6283_v4 = vpop.permute.xlu0 %3155 }
 0x4d7   : > { %v6253_v19 = vpop.eup %4285  ;;  %v6272_v1 = vsel %vm2144_vm13, 1.0, %v8117_v10  ;;  %4305 = vpow2.f32 %v2301_v9  ;;  %v2278_v58 = vsub.f32 %v8139_v18, %v8138_v36  ;;  %v2385_v39 = vsub.f32 %v8141_v12, %v6009_v43  ;;  %v8143_v43 = vld [vmem:[#allocation46_spill] sm:$0xff] }
 0x4d8   : > { %v4288_v57 = vpop.eup %4287  ;;  %8137 = vst [vmem:[#allocation178_spill] sm:$0xff] %v6272_v1  ;;  %4307 = vlog2.f32 %v2573_v11  ;;  %v2574_v53 = vadd.f32 %v2558_v27, %v2494_v63  ;;  %v2416_v0 = vsub.f32 %v2384_v31, %v2400_v6  ;;  %v2403_v35 = vsel %vm2147_vm8, 0.0, %v4276_v7  ;;  %v8142_v11 = vld [vmem:[#allocation102_spill] sm:$0xff] }
 0x4d9   : > { %v4290_v15 = vpop.eup %4289  ;;  %4309 = vpow2.f32 %v6192_v38  ;;  %v2477_v9 = vmul.f32 1.442695, %v2452_v46  ;;  %v6286_v18 = vmax.f32 %v8138_v36, 0.0  ;;  %v2281_v59 = vsub.f32 %v8142_v11, %v8136_v56  ;;  %v8144_v11 = vld [vmem:[#allocation93_spill] sm:$0xff] }
 0x4da   : > { %v4292_v37 = vpop.eup %4291  ;;  %4311 = vpow2.f32 %v2307_v28  ;;  %vm2146_vm11 = vcmp.eq.s32.totalorder %v8143_v43, 255  ;;  %v2541_v63 = vmul.f32 1.442695, %v2516_v50  ;;  %v2575_v7 = vadd.f32 %v6184_v51, %v2495_v49  ;;  %v6306_v49 = vpop.permute.xlu1 %3065 }
 0x4db   : > { %v4294_v25 = vpop.eup %4293  ;;  %v2457_v38 = vsub.f32 %v8136_v56, %v6265_v32  ;;  %v2560_v31 = vmul.f32 %v4290_v15, %v6272_v1  ;;  %v2305_v6 = vmul.f32 1.442695, %v2278_v58  ;;  %v2417_v28 = vsub.f32 %v2385_v39, %v6215_v2  ;;  %8145 = vst [vmem:[#allocation180_spill] sm:$0xff] %v6306_v49  ;;  %v6317_v39 = vpop.permute.xlu0 %3157 }
 0x4dc   : > { %v6291_v27 = vpop.eup %4295  ;;  %4313 = vlog2.f32 %v2574_v53  ;;  %v2496_v23 = vmul.f32 %v4288_v57, %v2416_v0  ;;  %v2386_v12 = vsub.f32 %v8144_v11, %v6041_v52  ;;  %v2402_v50 = vsel %vm2146_vm11, 0.0, %v4292_v37  ;;  %v8146_v37 = vld [vmem:[#allocation124_spill] sm:$0xff]  ;;  %v8149_v11 = vld [vmem:[#allocation66_spill] sm:$0xff] }
 0x4dd   : > { %v6297_v46 = vpop.eup %4297  ;;  %4315 = vpow2.f32 %v2477_v9  ;;  %v2454_v51 = vsub.f32 %v8138_v36, %v6286_v18  ;;  %v2588_v15 = vmul.f32 0.6931472, %v4294_v25  ;;  %v2521_v56 = vsub.f32 0.0, %v6265_v32  ;;  %v8147_v53 = vld [vmem:[#allocation104_spill] sm:$0xff]  ;;  %v8148_v9 = vld [vmem:[#allocation122_spill] sm:$0xff] }
 0x4de   : > { %v4300_v58 = vpop.eup %4299  ;;  %v6312_v2 = vsel %vm2146_vm11, 1.0, %v8117_v10  ;;  %4317 = vpow2.f32 %v2541_v63  ;;  %v2518_v52 = vsub.f32 0.0, %v6286_v18  ;;  %v2387_v57 = vsub.f32 %v8146_v37, %v6031_v42 }
 0x4df   : > { %v4302_v0 = vpop.eup %4301  ;;  %4319 = vpow2.f32 %v2305_v6  ;;  %v6320_v25 = vmax.f32 %v8147_v53, 0.0  ;;  %v2280_v36 = vsub.f32 %v8148_v9, %v8147_v53  ;;  %v2497_v63 = vmul.f32 %v6198_v24, %v2417_v28  ;;  %v6339_v28 = vpop.permute.xlu1 %3069 }
 0x4e0   : > { %v4304_v49 = vpop.eup %4303  ;;  %4321 = vlog2.f32 %v2575_v7  ;;  %v2576_v43 = vadd.f32 %v2560_v31, %v2496_v23  ;;  %v2418_v1 = vsub.f32 %v2386_v12, %v2402_v50  ;;  %v2311_v37 = vmul.f32 1.442695, %v2281_v59  ;;  %v8152_v12 = vld [vmem:[#allocation54_spill] sm:$0xff]  ;;  %8153 = vst [vmem:[#allocation133_spill] sm:$0xff] %v6339_v28 }
 0x4e1   : > { %v4306_v42 = vpop.eup %4305  ;;  %v2481_v6 = vmul.f32 1.442695, %v2454_v51  ;;  %v2619_v5 = vadd.f32 %v2588_v15, %v5980_v45  ;;  %v2590_v54 = vmul.f32 0.6931472, %v4300_v58  ;;  %v2563_v9 = vmul.f32 %v6253_v19, %v6171_v33  ;;  %v8154_v51 = vld [vmem:[#allocation87_spill] sm:$0xff]  ;;  %v8155_v15 = vld [vmem:[#allocation134_spill] sm:$0xff]  ;;  %v6346_v58 = vpop.permute.xlu0 %3159 }
 0x4e2   : > { %v4308_v8 = vpop.eup %4307  ;;  %4323 = vpow2.f32 %v6243_v62  ;;  %v2545_v7 = vmul.f32 1.442695, %v2518_v52  ;;  %v2419_v23 = vsub.f32 %v2387_v57, %v2403_v35  ;;  %vm7874_vm7 = vcmp.eq.s32.totalorder %v8152_v12, 255  ;;  %v8182_v12 = vld [vmem:[#allocation45_spill] sm:$0xff] }
 0x4e3   : > { %v6333_v24 = vpop.eup %4309  ;;  %v2562_v59 = vmul.f32 %v4304_v49, %v6312_v2  ;;  %v2309_v31 = vmul.f32 1.442695, %v2280_v36  ;;  %v2456_v45 = vsub.f32 %v8147_v53, %v6320_v25  ;;  %v2577_v62 = vadd.f32 %v6262_v61, %v2497_v63  ;;  %v8156_v49 = vld [vmem:[#allocation158_spill] sm:$0xff] }
 0x4e4   : > { %v4312_v19 = vpop.eup %4311  ;;  %4325 = vlog2.f32 %v2576_v43  ;;  %v2498_v50 = vmul.f32 %v4302_v0, %v2418_v1  ;;  %v2388_v35 = vsub.f32 %v8154_v51, %v6073_v16  ;;  %v2620_v52 = vadd.f32 %v2590_v54, %v8156_v49  ;;  %v8158_v63 = vld [vmem:[#allocation98_spill] sm:$0xff]  ;;  %v8159_v54 = vld [vmem:[#allocation128_spill] sm:$0xff]  ;;  %v8161_v49 = vld [vmem:[#allocation139_spill] sm:$0xff] }
 0x4e5   : > { %4327 = vpow2.f32 %v2481_v6  ;;  %v2592_v57 = vmul.f32 0.6931472, %v4308_v8  ;;  %v6351_v53 = vmul.f32 1.442695, %v2457_v38  ;;  %v6353_v61 = vmul.f32 1.442695, %v2521_v56 }
 0x4e6   : > { %2669 = vrot.lane.b32.xlu1 %v8149_v11, %s4574_s24  ;;  %v8151_v11 = vld [vmem:[#allocation33_spill] sm:$0xff]  ;;  %4329 = vpow2.f32 %v2545_v7  ;;  %v2520_v1 = vsub.f32 0.0, %v6320_v25  ;;  %v2499_v43 = vmul.f32 %v6248_v60, %v2419_v23  ;;  %v2282_v8 = vsub.f32 %v8159_v54, %v8158_v63  ;;  %v8160_v56 = vld [vmem:[#allocation123_spill] sm:$0xff] }
 0x4e7   : > { %vm2148_vm9 = vcmp.eq.s32.totalorder %v8151_v11, 255  ;;  %4331 = vpow2.f32 %v2309_v31  ;;  %v2578_v6 = vadd.f32 %v2562_v59, %v2498_v50  ;;  %v2405_v23 = vsel %vm2149_vm6, 0.0, %v6291_v27  ;;  %v6371_v11 = vpop.permute.xlu1 %3073  ;;  %v8162_v54 = vld [vmem:[#allocation159_spill] sm:$0xff] }
 0x4e8   : > { %v2404_v36 = vsel %vm2148_vm9, 0.0, %v4306_v42  ;;  %v6360_v0 = vsel %vm2148_vm9, 1.0, %v8117_v10  ;;  %4333 = vlog2.f32 %v2577_v62  ;;  %v2389_v42 = vsub.f32 %v8160_v56, %v6049_v55  ;;  %v8163_v62 = vld [vmem:[#allocation37_spill] sm:$0xff] }
 0x4e9   : > { %1993 = vmax.xlane.f32.xlu0 %v8150_v13  ;;  %8157 = vst [vmem:[#allocation134_spill] sm:$0xff] %v6360_v0  ;;  %v2420_v7 = vsub.f32 %v2388_v35, %v2404_v36  ;;  %v2485_v31 = vmul.f32 1.442695, %v2456_v45  ;;  %v2621_v33 = vadd.f32 %v2592_v57, %v8162_v54  ;;  %4335 = vpow2.f32 %v6255_v26  ;;  %v6379_v35 = vpop.permute.xlu0 %3161  ;;  %v8164_v26 = vld [vmem:[#allocation80_spill] sm:$0xff] }
 0x4ea   : > { %2875 = vrot.lane.b32.xlu1 %v2619_v5, %s4573_s18  ;;  %v4314_v5 = vpop.eup %4313  ;;  %vm2150_vm4 = vcmp.eq.s32.totalorder %v8163_v62, 255  ;;  %v2549_v55 = vmul.f32 1.442695, %v2520_v1  ;;  %v6377_v59 = vmax.f32 %v8158_v63, 0.0  ;;  %v2579_v50 = vadd.f32 %v2563_v9, %v2499_v43  ;;  %v8165_v1 = vld [vmem:[#allocation140_spill] sm:$0xff] }
 0x4eb   : > { %v4316_v16 = vpop.eup %4315  ;;  %4337 = vpow2.f32 %v2311_v37  ;;  %v2313_v45 = vmul.f32 1.442695, %v2282_v8  ;;  %v2421_v57 = vsub.f32 %v2389_v42, %v2405_v23  ;;  %v2390_v54 = vsub.f32 %v8164_v26, %v6122_v44  ;;  %v8166_v42 = vld [vmem:[#allocation127_spill] sm:$0xff] }
 0x4ec   : > { %v4318_v38 = vpop.eup %4317  ;;  %4339 = vlog2.f32 %v2578_v6  ;;  %v2407_v8 = vsel %vm7874_vm7, 0.0, %v4312_v19  ;;  %v2458_v44 = vsub.f32 %v8158_v63, %v6377_v59  ;;  %v2391_v6 = vsub.f32 %v8166_v42, %v6087_v47 }
 0x4ed   : > { %1989 = vmax.xlane.f32.xlu0 %v8155_v15  ;;  %v4320_v60 = vpop.eup %4319  ;;  %v2564_v27 = vmul.f32 %v4318_v38, %v6360_v0  ;;  %4341 = vpow2.f32 %v2485_v31  ;;  %v8169_v31 = vld [vmem:[#allocation143_spill] sm:$0xff]  ;;  %vm2154_vm5 = vcmp.eq.s32.totalorder %v8182_v12, 255 }
 0x4ee   : > { %2877 = vrot.lane.b32.xlu1 %v2620_v52, %s4573_s18  ;;  %v2594_v52 = vmul.f32 0.6931472, %v4314_v5  ;;  %v4322_v28 = vpop.eup %4321  ;;  %v2500_v5 = vmul.f32 %v4316_v16, %v2420_v7  ;;  %v2406_v9 = vsel %vm2150_vm4, 0.0, %v4320_v60  ;;  %4343 = vpow2.f32 %v2549_v55  ;;  %v8170_v55 = vld [vmem:[#allocation161_spill] sm:$0xff] }
 0x4ef   : > { %v4324_v36 = vpop.eup %4323  ;;  %v2596_v43 = vmul.f32 0.6931472, %v4322_v28  ;;  %v6402_v28 = vpop.permute.xlu1 %3077  ;;  %4345 = vpow2.f32 %v2313_v45  ;;  %v2501_v7 = vmul.f32 %v6297_v46, %v2421_v57  ;;  %v2422_v23 = vsub.f32 %v2390_v54, %v2406_v9 }
 0x4f0   : > { %v2622_v37 = vadd.f32 %v2594_v52, %v6077_v20  ;;  %v4326_v38 = vpop.eup %4325  ;;  %v6400_v20 = vsel %vm2150_vm4, 1.0, %v8117_v10  ;;  %8168 = vst [vmem:[#allocation139_spill] sm:$0xff] %v6402_v28  ;;  %4347 = vlog2.f32 %v2579_v50  ;;  %v2580_v60 = vadd.f32 %v2564_v27, %v2500_v5  ;;  %v6408_v52 = vpop.permute.xlu0 %3051  ;;  %v8172_v50 = vld [vmem:[#allocation41_spill] sm:$0xff] }
 0x4f1   : > { %2001 = vmax.xlane.f32.xlu0 %v8161_v49  ;;  %v4328_v16 = vpop.eup %4327  ;;  %8167 = vst [vmem:[#allocation158_spill] sm:$0xff] %v6400_v20  ;;  %v2623_v63 = vadd.f32 %v2596_v43, %v8170_v55  ;;  %v2598_v42 = vmul.f32 0.6931472, %v4326_v38  ;;  %v6414_v45 = vsel %vm7874_vm7, 1.0, %v8117_v10  ;;  %4349 = vpow2.f32 %v6353_v61  ;;  %v8173_v43 = vld [vmem:[#allocation101_spill] sm:$0xff] }
 0x4f2   : > { %2879 = vrot.lane.b32.xlu1 %v2621_v33, %s4573_s18  ;;  %v2565_v33 = vmul.f32 %v6333_v24, %v6234_v21  ;;  %v2522_v24 = vsub.f32 0.0, %v6377_v59  ;;  %v4330_v19 = vpop.eup %4329  ;;  %8171 = vst [vmem:[#allocation159_spill] sm:$0xff] %v6414_v45  ;;  %vm7872_vm3 = vcmp.eq.s32.totalorder %v8172_v50, 255  ;;  %v2489_v46 = vmul.f32 1.442695, %v2458_v44  ;;  %v8174_v55 = vld [vmem:[#allocation145_spill] sm:$0xff] }
 0x4f3   : > { %v4332_v47 = vpop.eup %4331  ;;  %v2423_v27 = vsub.f32 %v2391_v6, %v2407_v8  ;;  %4351 = vpow2.f32 %v6351_v53  ;;  %v2566_v57 = vmul.f32 %v4330_v19, %v6400_v20  ;;  %v2392_v38 = vsub.f32 %v8173_v43, %v6163_v41  ;;  %v6426_v44 = vpop.permute.xlu1 %3081  ;;  %v8176_v53 = vld [vmem:[#allocation171_spill] sm:$0xff] }
 0x4f4   : > { %v4334_v26 = vpop.eup %4333  ;;  %v2553_v5 = vmul.f32 1.442695, %v2522_v24  ;;  %v2581_v9 = vadd.f32 %v2565_v33, %v2501_v7  ;;  %4353 = vlog2.f32 %v2580_v60  ;;  %v2408_v8 = vsel %vm7872_vm3, 0.0, %v4332_v47  ;;  %8175 = vst [vmem:[#allocation140_spill] sm:$0xff] %v6426_v44  ;;  %v6431_v41 = vpop.permute.xlu0 %3055 }
 0x4f5   : > { %1997 = vmax.xlane.f32.xlu0 %v8165_v1  ;;  %v4336_v54 = vpop.eup %4335  ;;  %v2624_v6 = vadd.f32 %v2598_v42, %v8176_v53  ;;  %v2600_v24 = vmul.f32 0.6931472, %v4334_v26  ;;  %4355 = vpow2.f32 %v2489_v46  ;;  %v2503_v7 = vmul.f32 %v4324_v36, %v2423_v27  ;;  %v8179_v26 = vld [vmem:[#allocation170_spill] sm:$0xff]  ;;  %v8181_v27 = vld [vmem:[#allocation163_spill] sm:$0xff] }
 0x4f6   : > { %2881 = vrot.lane.b32.xlu1 %v2622_v37, %s4573_s18  ;;  %v2502_v37 = vmul.f32 %v4328_v16, %v2422_v23  ;;  %v4338_v61 = vpop.eup %4337  ;;  %v2567_v16 = vmul.f32 %v4336_v54, %v6414_v45  ;;  %v6436_v60 = vsel %vm7872_vm3, 1.0, %v8117_v10  ;;  %4357 = vpow2.f32 %v2553_v5  ;;  %v8180_v23 = vld [vmem:[#allocation126_spill] sm:$0xff] }
 0x4f7   : > { %v4340_v19 = vpop.eup %4339  ;;  %8178 = vst [vmem:[#allocation143_spill] sm:$0xff] %v6436_v60  ;;  %4359 = vlog2.f32 %v2581_v9  ;;  %v2393_v47 = vsub.f32 %v8180_v23, %v8179_v26  ;;  %v2424_v53 = vsub.f32 %v2392_v38, %v2408_v8  ;;  %v2625_v54 = vadd.f32 %v2600_v24, %v8181_v27  ;;  %v8184_v8 = vld [vmem:[#allocation96_spill] sm:$0xff] }
 0x4f8   : > { %v4342_v33 = vpop.eup %4341  ;;  %v2582_v46 = vadd.f32 %v2566_v57, %v2502_v37  ;;  %v2602_v56 = vmul.f32 0.6931472, %v4340_v19  ;;  %v2583_v5 = vadd.f32 %v2567_v16, %v2503_v7  ;;  %v2362_v57 = vpop.permute.xlu1 %2361 }
 0x4f9   : > { %2009 = vmax.xlane.f32.xlu0 %v8169_v31  ;;  %v4344_v42 = vpop.eup %4343  ;;  %v2394_v24 = vsub.f32 %v8184_v8, %v2362_v57  ;;  %v6453_v26 = vpop.permute.xlu0 %3059 }
 0x4fa   : > { %2883 = vrot.lane.b32.xlu1 %v2623_v63, %s4573_s18  ;;  %v8177_v63 = vld [vmem:[#allocation56_spill] sm:$0xff]  ;;  %v4346_v43 = vpop.eup %4345  ;;  %4361 = vlog2.f32 %v2582_v46  ;;  %v2626_v7 = vadd.f32 %v2602_v56, %v6187_v29 }
 0x4fb   : > { %vm7873_vm2 = vcmp.eq.s32.totalorder %v8177_v63, 255  ;;  %v4348_v50 = vpop.eup %4347  ;;  %v2410_v16 = vsel %vm2154_vm5, 0.0, %v4346_v43  ;;  %4363 = vlog2.f32 %v2583_v5  ;;  %v8186_v43 = vld [vmem:[#allocation165_spill] sm:$0xff] }
 0x4fc   : > { %v2409_v36 = vsel %vm7873_vm2, 0.0, %v4338_v61  ;;  %v6448_v9 = vsel %vm7873_vm2, 1.0, %v8117_v10  ;;  %v4350_v37 = vpop.eup %4349  ;;  %v2504_v61 = vmul.f32 %v4342_v33, %v2424_v53  ;;  %v2604_v27 = vmul.f32 0.6931472, %v4348_v50 }
 0x4fd   : > { %2005 = vmax.xlane.f32.xlu0 %v8174_v55  ;;  %8183 = vst [vmem:[#allocation161_spill] sm:$0xff] %v6448_v9  ;;  %v2425_v38 = vsub.f32 %v2393_v47, %v2409_v36  ;;  %v4352_v19 = vpop.eup %4351  ;;  %v2426_v46 = vsub.f32 %v2394_v24, %v2410_v16  ;;  %v6463_v36 = vsel %vm2154_vm5, 1.0, %v8117_v10  ;;  %v6466_v50 = vpop.permute.xlu0 %3063 }
 0x4fe   : > { %2885 = vrot.lane.b32.xlu1 %v2624_v6, %s4573_s18  ;;  %v2568_v6 = vmul.f32 %v4344_v42, %v6436_v60  ;;  %v4354_v63 = vpop.eup %4353  ;;  %v2569_v42 = vmul.f32 %v4350_v37, %v6448_v9  ;;  %8185 = vst [vmem:[#allocation145_spill] sm:$0xff] %v6463_v36  ;;  %v2627_v57 = vadd.f32 %v2604_v27, %v8186_v43 }
 0x4ff   : > { %v2505_v47 = vmul.f32 %v4352_v19, %v2425_v38  ;;  %v2606_v29 = vmul.f32 0.6931472, %v4354_v63  ;;  %v8188_v63 = vld [vmem:[#allocation169_spill] sm:$0xff] }
 0x500   : > { %v2584_v33 = vadd.f32 %v2568_v6, %v2504_v61 }
 0x501   : > { %v2585_v37 = vadd.f32 %v2569_v42, %v2505_v47  ;;  %v2628_v38 = vadd.f32 %v2606_v29, %v6237_v14  ;;  %v6472_v19 = vpop.permute.xlu0 %3067  ;;  %v8189_v42 = vld [vmem:[#allocation62_spill] sm:$0xff]  ;;  %v8191_v29 = vld [vmem:[#allocation71_spill] sm:$0xff] }
 0x502   : > { %2887 = vrot.lane.b32.xlu1 %v2625_v54, %s4573_s18  ;;  %v4356_v54 = vpop.eup %4355  ;;  %4365 = vlog2.f32 %v2584_v33  ;;  %8187 = vst [vmem:[#allocation171_spill] sm:$0xff] %v6472_v19  ;;  %v8190_v33 = vld [vmem:[#allocation59_spill] sm:$0xff] }
 0x503   : > { %v4358_v53 = vpop.eup %4357  ;;  %v2506_v6 = vmul.f32 %v4356_v54, %v2426_v46  ;;  %4367 = vlog2.f32 %v2585_v37 }
 0x504   : > { %v4360_v56 = vpop.eup %4359  ;;  %v2570_v5 = vmul.f32 %v4358_v53, %v6463_v36 }
 0x505   : > { %v2608_v61 = vmul.f32 0.6931472, %v4360_v56  ;;  %v4362_v24 = vpop.eup %4361  ;;  %v6481_v46 = vpop.permute.xlu0 %3071 }
 0x506   : > { %2889 = vrot.lane.b32.xlu1 %v2626_v7, %s4573_s18  ;;  %v2586_v10 = vadd.f32 %v2570_v5, %v2506_v6  ;;  %v2610_v7 = vmul.f32 0.6931472, %v4362_v24  ;;  %v4364_v27 = vpop.eup %4363  ;;  %v8193_v6 = vld [vmem:[#allocation68_spill] sm:$0xff] }
 0x507   : > { %v2629_v16 = vadd.f32 %v2608_v61, %v8188_v63  ;;  %v2612_v54 = vmul.f32 0.6931472, %v4364_v27  ;;  %v8198_v27 = vld [vmem:[#allocation69_spill] sm:$0xff] }
 0x508   : > { %4369 = vlog2.f32 %v2586_v10  ;;  %v2630_v14 = vadd.f32 %v2610_v7, %v6286_v18 }
 0x509   : > { %v2631_v53 = vadd.f32 %v2612_v54, %v6174_v40  ;;  %v6488_v56 = vpop.permute.xlu0 %3075  ;;  %v8201_v54 = vld [vmem:[#allocation64_spill] sm:$0xff] }
 0x50a   : > { %2891 = vrot.lane.b32.xlu1 %v2627_v57, %s4573_s18  ;;  %8192 = vst [vmem:[#allocation170_spill] sm:$0xff] %v6488_v56 }
 0x50c   : > { %v4366_v47 = vpop.eup %4365 }
 0x50d   : > { %v2614_v43 = vmul.f32 0.6931472, %v4366_v47  ;;  %v4368_v57 = vpop.eup %4367  ;;  %v6495_v61 = vpop.permute.xlu0 %3079 }
 0x50e   : > { %2893 = vrot.lane.b32.xlu1 %v2628_v38, %s4573_s18  ;;  %v2616_v37 = vmul.f32 0.6931472, %v4368_v57  ;;  %8194 = vst [vmem:[#allocation163_spill] sm:$0xff] %v6495_v61 }
 0x50f   : > { %v2632_v18 = vadd.f32 %v2614_v43, %v6320_v25  ;;  %v8195_v25 = vld [vmem:[#allocation135_spill] sm:$0xff] }
 0x510   : > { %v2633_v40 = vadd.f32 %v2616_v37, %v6265_v32  ;;  %v8197_v32 = vld [vmem:[#allocation73_spill] sm:$0xff] }
 0x511   : > { %v1984_v10 = vpop.xlane.xlu0 %1983 }
 0x512   : > { %2895 = vrot.lane.b32.xlu1 %v2629_v16, %s4573_s18  ;;  %v4370_v5 = vpop.eup %4369  ;;  %v6501_v63 = vsub.f32 %v8195_v25, %v1984_v10  ;;  %v8196_v16 = vld [vmem:[#allocation63_spill] sm:$0xff] }
 0x513   : > { %2667 = vrot.lane.b32.xlu0 %v8189_v42, %s4574_s24  ;;  %v2618_v38 = vmul.f32 0.6931472, %v4370_v5 }
 0x514   : > { %v2031_v7 = vmul.f32 1.442695, %v6501_v63 }
 0x515   : > { %v2634_v24 = vadd.f32 %v2618_v38, %v6377_v59  ;;  %v6510_v42 = vpop.permute.xlu0 %1762  ;;  %v6512_v59 = vpop.f32.mrb[8].mxu0  ;;  %v8207_v38 = vld [vmem:[#allocation157_spill] sm:$0xff] }
 0x516   : > { %2897 = vrot.lane.b32.xlu1 %v2630_v14, %s4573_s18  ;;  %4371 = vpow2.f32 %v2031_v7  ;;  %8199 = vst [vmem:[#allocation165_spill] sm:$0xff] %v6510_v42  ;;  %v6514_v14 = vpop.permute.xlu1 %1766  ;;  %v6518_v47 = vpop.f32.mrb[9].mxu0 }
 0x517   : > { %2671 = vrot.lane.b32.xlu0 %v8190_v33, %s4574_s24  ;;  %8200 = vst [vmem:[#allocation169_spill] sm:$0xff] %v6514_v14  ;;  %8202 = vst [vmem:[#allocation135_spill] sm:$0xff] %v6518_v47  ;;  %v6523_v57 = vpop.f32.mrb[10].mxu0 }
 0x518   : > { %v6528_v37 = vpop.f32.mrb[11].mxu0 }
 0x51a   : > { %2899 = vrot.lane.b32.xlu1 %v2631_v53, %s4573_s18  ;;  %v8203_v53 = vld [vmem:[#allocation156_spill] sm:$0xff] }
 0x51b   : > { %2675 = vrot.lane.b32.xlu0 %v8191_v29, %s4574_s24  ;;  %8205 = vst [vmem:[#allocation156_spill] sm:$0xff] %v6528_v37 }
 0x51e   : > { %2901 = vrot.lane.b32.xlu1 %v2632_v18, %s4573_s18  ;;  %v8204_v18 = vld [vmem:[#allocation67_spill] sm:$0xff] }
 0x51f   : > { %2679 = vrot.lane.b32.xlu0 %v8193_v6, %s4574_s24 }
 0x520   : > { %v4372_v5 = vpop.eup %4371 }
 0x522   : > { %2903 = vrot.lane.b32.xlu1 %v2633_v40, %s4573_s18  ;;  %v6530_v40 = vpop.permute.xlu1 %1768 }
 0x523   : > { %8206 = vst [vmem:[#allocation181_spill] sm:$0xff] %v6530_v40 }
 0x526   : > { %2905 = vrot.lane.b32.xlu1 %v2634_v24, %s4573_s18  ;;  %v1982_v25 = vpop.xlane.xlu1 %1981 }
 0x52a   : > { %2673 = vrot.lane.b32.xlu1 %v8196_v16, %s4574_s24  ;;  %v1992_v7 = vpop.xlane.xlu1 %1991 }
 0x52e   : > { %2677 = vrot.lane.b32.xlu1 %v8197_v32, %s4574_s24 }
 0x532   : > { %2681 = vrot.lane.b32.xlu1 %v8198_v27, %s4574_s24  ;;  %v8208_v27 = vld [vmem:[#allocation147_spill] sm:$0xff] }
 0x536   : > { %2683 = vrot.lane.b32.xlu1 %v8201_v54, %s4574_s24  ;;  %v6537_v54 = vsub.f32 %v8208_v27, %v1982_v25  ;;  %v8212_v27 = vld [vmem:[#allocation137_spill] sm:$0xff] }
 0x539   : > { %v1980_v33 = vpop.xlane.xlu0 %1979 }
 0x53a   : > { %v6521_v43 = vsub.f32 %v8203_v53, %v1980_v33  ;;  %2685 = vrot.lane.b32.xlu1 %v8204_v18, %s4574_s24  ;;  %v1988_v33 = vpop.xlane.xlu1 %1987  ;;  %v2029_v53 = vmul.f32 1.442695, %v6537_v54 }
 0x53c   : > { %v2027_v29 = vmul.f32 1.442695, %v6521_v43 }
 0x53d   : > { %v1986_v6 = vpop.xlane.xlu0 %1985 }
 0x53e   : > { %4373 = vpow2.f32 %v2027_v29  ;;  %v6533_v24 = vsub.f32 %v8207_v38, %v1986_v6  ;;  %2063 = vadd.xlane.f32.xlu0 %v4372_v5  ;;  %v8209_v29 = vld [vmem:[#allocation149_spill] sm:$0xff]  ;;  %v6543_v6 = vpop.permute.xlu1 %1772  ;;  %v8211_v38 = vld [vmem:[#allocation150_spill] sm:$0xff] }
 0x53f   : > { %v6541_v18 = vsub.f32 %v8209_v29, %v1992_v7  ;;  %8210 = vst [vmem:[#allocation157_spill] sm:$0xff] %v6543_v6  ;;  %v8213_v29 = vld [vmem:[#allocation138_spill] sm:$0xff] }
 0x540   : > { %v2033_v10 = vmul.f32 1.442695, %v6533_v24 }
 0x541   : > { %v2039_v5 = vmul.f32 1.442695, %v6541_v18 }
 0x542   : > { %4375 = vpow2.f32 %v2033_v10  ;;  %v6547_v10 = vsub.f32 %v8211_v38, %v1988_v33 }
 0x543   : > { %4377 = vpow2.f32 %v2029_v53 }
 0x544   : > { %4379 = vpow2.f32 %v2039_v5  ;;  %v2035_v25 = vmul.f32 1.442695, %v6547_v10 }
 0x546   : > { %4381 = vpow2.f32 %v2035_v25 }
 0x548   : > { %v4374_v16 = vpop.eup %4373 }
 0x549   : > { %2059 = vadd.xlane.f32.xlu0 %v4374_v16 }
 0x54c   : > { %v4376_v32 = vpop.eup %4375 }
 0x54d   : > { %2065 = vadd.xlane.f32.xlu0 %v4376_v32  ;;  %v4378_v53 = vpop.eup %4377 }
 0x54e   : > { %v4380_v38 = vpop.eup %4379 }
 0x556   : > { %v2000_v16 = vpop.xlane.xlu1 %1999 }
 0x557   : > { %v6551_v32 = vsub.f32 %v8212_v27, %v2000_v16 }
 0x559   : > { %v2047_v7 = vmul.f32 1.442695, %v6551_v32 }
 0x55a   : > { %v1996_v40 = vpop.xlane.xlu1 %1995 }
 0x55b   : > { %v6555_v14 = vsub.f32 %v8213_v29, %v1996_v40  ;;  %4383 = vpow2.f32 %v2047_v7  ;;  %v4382_v40 = vpop.eup %4381 }
 0x55d   : > { %v2043_v33 = vmul.f32 1.442695, %v6555_v14 }
 0x55e   : > { %2061 = vadd.xlane.f32.xlu1 %v4378_v53  ;;  %v2008_v6 = vpop.xlane.xlu1 %2007  ;;  %v6566_v53 = vpop.permute.xlu0 %1764 }
 0x55f   : > { %v6559_v5 = vsub.f32 %v5922_v48, %v2008_v6  ;;  %4385 = vpow2.f32 %v2043_v33  ;;  %8214 = vst [vmem:[#allocation147_spill] sm:$0xff] %v6566_v53 }
 0x561   : > { %v2055_v25 = vmul.f32 1.442695, %v6559_v5 }
 0x562   : > { %2071 = vadd.xlane.f32.xlu1 %v4380_v38  ;;  %v2004_v16 = vpop.xlane.xlu1 %2003  ;;  %v6570_v33 = vpop.permute.xlu0 %1770 }
 0x563   : > { %v6563_v27 = vsub.f32 %v5927_v34, %v2004_v16  ;;  %4387 = vpow2.f32 %v2055_v25  ;;  %8216 = vst [vmem:[#allocation150_spill] sm:$0xff] %v6570_v33 }
 0x565   : > { %v2051_v29 = vmul.f32 1.442695, %v6563_v27  ;;  %v4384_v7 = vpop.eup %4383 }
 0x566   : > { %2067 = vadd.xlane.f32.xlu1 %v4382_v40  ;;  %v6568_v48 = vpop.permute.xlu1 %2669 }
 0x567   : > { %4389 = vpow2.f32 %v2051_v29  ;;  %8215 = vst [vmem:[#allocation149_spill] sm:$0xff] %v6568_v48 }
 0x569   : > { %v4386_v6 = vpop.eup %4385 }
 0x56a   : > { %2079 = vadd.xlane.f32.xlu1 %v4384_v7  ;;  %v6572_v42 = vpop.permute.xlu1 %2875 }
 0x56d   : > { %v4388_v38 = vpop.eup %4387 }
 0x56e   : > { %2075 = vadd.xlane.f32.xlu1 %v4386_v6  ;;  %v6577_v40 = vpop.permute.xlu1 %2877 }
 0x571   : > { %v4390_v16 = vpop.eup %4389 }
 0x572   : > { %2087 = vadd.xlane.f32.xlu1 %v4388_v38  ;;  %v6584_v60 = vpop.permute.xlu1 %2879 }
 0x576   : > { %v1994_v34 = vpop.xlane.xlu0 %1993  ;;  %2083 = vadd.xlane.f32.xlu1 %v4390_v16  ;;  %v6593_v9 = vpop.permute.xlu1 %2881 }
 0x577   : > { %v6575_v25 = vsub.f32 %v8150_v13, %v1994_v34 }
 0x579   : > { %v2041_v29 = vmul.f32 1.442695, %v6575_v25 }
 0x57a   : > { %v1990_v7 = vpop.xlane.xlu0 %1989 }
 0x57b   : > { %4391 = vpow2.f32 %v2041_v29  ;;  %v6581_v6 = vsub.f32 %v8155_v15, %v1990_v7 }
 0x57d   : > { %v2037_v33 = vmul.f32 1.442695, %v6581_v6 }
 0x57e   : > { %v2002_v53 = vpop.xlane.xlu0 %2001 }
 0x57f   : > { %4393 = vpow2.f32 %v2037_v33  ;;  %v6587_v38 = vsub.f32 %v8161_v49, %v2002_v53 }
 0x581   : > { %v2049_v13 = vmul.f32 1.442695, %v6587_v38 }
 0x582   : > { %v1998_v34 = vpop.xlane.xlu0 %1997 }
 0x583   : > { %4395 = vpow2.f32 %v2049_v13  ;;  %v6591_v16 = vsub.f32 %v8165_v1, %v1998_v34  ;;  %v6600_v13 = vpop.permute.xlu1 %2883 }
 0x585   : > { %v4392_v29 = vpop.eup %4391  ;;  %v2045_v15 = vmul.f32 1.442695, %v6591_v16 }
 0x586   : > { %2073 = vadd.xlane.f32.xlu0 %v4392_v29  ;;  %v2010_v7 = vpop.xlane.xlu0 %2009 }
 0x587   : > { %4397 = vpow2.f32 %v2045_v15  ;;  %v6597_v33 = vsub.f32 %v8169_v31, %v2010_v7  ;;  %v6606_v15 = vpop.permute.xlu1 %2885 }
 0x589   : > { %v4394_v49 = vpop.eup %4393  ;;  %v2057_v53 = vmul.f32 1.442695, %v6597_v33 }
 0x58a   : > { %2069 = vadd.xlane.f32.xlu0 %v4394_v49  ;;  %v2006_v8 = vpop.xlane.xlu0 %2005 }
 0x58b   : > { %4399 = vpow2.f32 %v2057_v53  ;;  %v6603_v1 = vsub.f32 %v8174_v55, %v2006_v8  ;;  %v6608_v7 = vpop.permute.xlu1 %2887 }
 0x58d   : > { %v4396_v34 = vpop.eup %4395  ;;  %v2053_v23 = vmul.f32 1.442695, %v6603_v1 }
 0x58e   : > { %2081 = vadd.xlane.f32.xlu0 %v4396_v34  ;;  %v6618_v34 = vpop.permute.xlu0 %2667 }
 0x58f   : > { %4401 = vpow2.f32 %v2053_v23  ;;  %v6610_v45 = vpop.permute.xlu1 %2889  ;;  %8217 = vst [vmem:[#allocation137_spill] sm:$0xff] %v6618_v34 }
 0x591   : > { %v4398_v29 = vpop.eup %4397 }
 0x592   : > { %2077 = vadd.xlane.f32.xlu0 %v4398_v29  ;;  %v6622_v36 = vpop.permute.xlu0 %2671 }
 0x593   : > { %v6612_v53 = vpop.permute.xlu1 %2891  ;;  %8218 = vst [vmem:[#allocation138_spill] sm:$0xff] %v6622_v36 }
 0x595   : > { %v4400_v31 = vpop.eup %4399 }
 0x596   : > { %2089 = vadd.xlane.f32.xlu0 %v4400_v31  ;;  %v6626_v31 = vpop.permute.xlu0 %2675 }
 0x597   : > { %v6614_v55 = vpop.permute.xlu1 %2893 }
 0x599   : > { %v4402_v49 = vpop.eup %4401 }
 0x59a   : > { %2085 = vadd.xlane.f32.xlu0 %v4402_v49  ;;  %v6630_v49 = vpop.permute.xlu0 %2679 }
 0x59b   : > { %v6616_v8 = vpop.permute.xlu1 %2895 }
 0x59f   : > { %v6620_v23 = vpop.permute.xlu1 %2897 }
 0x5a3   : > { %v6624_v29 = vpop.permute.xlu1 %2899 }
 0x5a7   : > { %v6628_v62 = vpop.permute.xlu1 %2901 }
 0x5ab   : > { %v6632_v20 = vpop.permute.xlu1 %2903 }
 0x5af   : > { %v6634_v48 = vpop.permute.xlu1 %2905 }
 0x5b3   : > { %v6636_v30 = vpop.permute.xlu1 %2673 }
 0x5b4   : > { %8219 = vst [vmem:[#allocation182_spill] sm:$0xff] %v6636_v30 }
 0x5b7   : > { %v6638_v36 = vpop.permute.xlu1 %2677 }
 0x5bb   : > { %v6645_v56 = vpop.permute.xlu1 %2681 }
 0x5bf   : > { %v6649_v44 = vpop.permute.xlu1 %2683 }
 0x5c0   : > { %8220 = vst [vmem:[#allocation183_spill] sm:$0xff] %v6649_v44 }
 0x5cb   : > { %v2064_v12 = vpop.xlane.xlu0 %2063 }
 0x5cc   : > { %4403 = vlog2.f32 %v2064_v12 }
 0x5d6   : > { %v4404_v34 = vpop.eup %4403  ;;  %v2060_v21 = vpop.xlane.xlu0 %2059 }
 0x5d7   : > { %v2096_v0 = vmul.f32 0.6931472, %v4404_v34  ;;  %4405 = vlog2.f32 %v2060_v21 }
 0x5d9   : > { %v6641_v37 = vsub.f32 %v6501_v63, %v2096_v0  ;;  %v6661_v63 = vpop.permute.xlu1 %2685 }
 0x5da   : > { %v2066_v61 = vpop.xlane.xlu0 %2065  ;;  %8222 = vst [vmem:[#allocation185_spill] sm:$0xff] %v6661_v63  ;;  %v8224_v63 = vld [vmem:[#allocation142_spill] sm:$0xff] }
 0x5db   : > { %4407 = vlog2.f32 %v2066_v61  ;;  %3215 = vrot.lane.b32.xlu1 %v6641_v37, %s4574_s24  ;;  %v3181_v44 = vadd.f32 %v8224_v63, %v6641_v37 }
 0x5dd   : > { %v3197_v47 = vsub.f32 %v3181_v44, %v6584_v60 }
 0x5df   : > { %2783 = vrot.lane.b32.xlu1 %v6641_v37, %s4572_s21 }
 0x5e1   : > { %v4406_v12 = vpop.eup %4405 }
 0x5e2   : > { %v2092_v30 = vmul.f32 0.6931472, %v4406_v12 }
 0x5e4   : > { %v6652_v21 = vsub.f32 %v6521_v43, %v2092_v30  ;;  %v2925_v30 = vsub.f32 %v6641_v37, %v6584_v60 }
 0x5e5   : > { %v4408_v34 = vpop.eup %4407 }
 0x5e6   : > { %8221 = vst [vmem:[#allocation184_spill] sm:$0xff] %v6652_v21  ;;  %v2098_v0 = vmul.f32 0.6931472, %v4408_v34  ;;  %2779 = vrot.lane.b32.xlu1 %v6652_v21, %s4572_s21  ;;  %3211 = vrot.lane.b32.xlu0 %v6652_v21, %s4574_s24 }
 0x5e8   : > { %v6659_v61 = vsub.f32 %v6533_v24, %v2098_v0 }
 0x5ea   : > { %3217 = vrot.lane.b32.xlu0 %v6659_v61, %s4574_s24  ;;  %v2926_v63 = vsub.f32 %v6659_v61, %v6593_v9 }
 0x5eb   : > { %v2062_v43 = vpop.xlane.xlu1 %2061 }
 0x5ec   : > { %4409 = vlog2.f32 %v2062_v43  ;;  %v2923_v43 = vsub.f32 %v6652_v21, %v6572_v42 }
 0x5ee   : > { %2959 = vrot.lane.b32.xlu0 %v2925_v30, %s4576_s16 }
 0x5ef   : > { %v2072_v12 = vpop.xlane.xlu1 %2071 }
 0x5f0   : > { %4411 = vlog2.f32 %v2072_v12  ;;  %v8225_v12 = vld [vmem:[#allocation154_spill] sm:$0xff] }
 0x5f2   : > { %2785 = vrot.lane.b32.xlu0 %v6659_v61, %s4572_s21 }
 0x5f3   : > { %v2068_v30 = vpop.xlane.xlu1 %2067 }
 0x5f4   : > { %4413 = vlog2.f32 %v2068_v30  ;;  %v8227_v30 = vld [vmem:[#allocation136_spill] sm:$0xff] }
 0x5f6   : > { %v4410_v34 = vpop.eup %4409 }
 0x5f7   : > { %v2094_v24 = vmul.f32 0.6931472, %v4410_v34  ;;  %v3179_v34 = vadd.f32 %v8225_v12, %v6652_v21 }
 0x5f9   : > { %v6671_v0 = vsub.f32 %v6537_v54, %v2094_v24  ;;  %v3195_v54 = vsub.f32 %v3179_v34, %v6572_v42  ;;  %v8226_v24 = vld [vmem:[#allocation144_spill] sm:$0xff] }
 0x5fa   : > { %v3182_v28 = vadd.f32 %v8226_v24, %v6659_v61  ;;  %v4412_v19 = vpop.eup %4411 }
 0x5fb   : > { %8223 = vst [vmem:[#allocation186_spill] sm:$0xff] %v6671_v0  ;;  %3213 = vrot.lane.b32.xlu1 %v6671_v0, %s4574_s24  ;;  %2781 = vrot.lane.b32.xlu0 %v6671_v0, %s4572_s21  ;;  %v2104_v44 = vmul.f32 0.6931472, %v4412_v19  ;;  %v2924_v60 = vsub.f32 %v6671_v0, %v6577_v40  ;;  %v3180_v42 = vadd.f32 %v8227_v30, %v6671_v0 }
 0x5fd   : > { %v3196_v12 = vsub.f32 %v3180_v42, %v6577_v40  ;;  %v2080_v40 = vpop.xlane.xlu1 %2079 }
 0x5fe   : > { %v4414_v34 = vpop.eup %4413 }
 0x5ff   : > { %2955 = vrot.lane.b32.xlu1 %v2923_v43, %s4576_s16  ;;  %3279 = vrot.lane.b32.xlu0 %v3197_v47, %s4572_s21  ;;  %v3198_v47 = vsub.f32 %v3182_v28, %v6593_v9  ;;  %v6701_v43 = vsub.f32 %v6541_v18, %v2104_v44  ;;  %v2100_v19 = vmul.f32 0.6931472, %v4414_v34  ;;  %v8228_v34 = vld [vmem:[#allocation153_spill] sm:$0xff] }
 0x601   : > { %v6710_v28 = vsub.f32 %v6547_v10, %v2100_v19 }
 0x603   : > { %3275 = vrot.lane.b32.xlu0 %v3195_v54, %s4572_s21  ;;  %2961 = vrot.lane.b32.xlu1 %v2926_v63, %s4576_s16 }
 0x607   : > { %2957 = vrot.lane.b32.xlu0 %v2924_v60, %s4576_s16  ;;  %3281 = vrot.lane.b32.xlu1 %v3198_v47, %s4572_s21  ;;  %v2076_v60 = vpop.xlane.xlu1 %2075 }
 0x60b   : > { %2791 = vrot.lane.b32.xlu0 %v6701_v43, %s4572_s21  ;;  %3277 = vrot.lane.b32.xlu1 %v3196_v12, %s4572_s21  ;;  %v2929_v12 = vsub.f32 %v6701_v43, %v6608_v7 }
 0x60f   : > { %3223 = vrot.lane.b32.xlu1 %v6701_v43, %s4574_s24 }
 0x613   : > { %v2074_v9 = vpop.xlane.xlu0 %2073  ;;  %3219 = vrot.lane.b32.xlu1 %v6710_v28, %s4574_s24 }
 0x614   : > { %4415 = vlog2.f32 %v2074_v9 }
 0x617   : > { %v2070_v18 = vpop.xlane.xlu0 %2069  ;;  %2787 = vrot.lane.b32.xlu1 %v6710_v28, %s4572_s21 }
 0x618   : > { %4417 = vlog2.f32 %v2070_v18  ;;  %v8229_v18 = vld [vmem:[#allocation148_spill] sm:$0xff] }
 0x619   : > { %4419 = vlog2.f32 %v2080_v40 }
 0x61b   : > { %v2082_v54 = vpop.xlane.xlu0 %2081 }
 0x61c   : > { %4421 = vlog2.f32 %v2082_v54 }
 0x61d   : > { %4423 = vlog2.f32 %v2076_v60 }
 0x61e   : > { %v4416_v63 = vpop.eup %4415 }
 0x61f   : > { %v2106_v24 = vmul.f32 0.6931472, %v4416_v63  ;;  %v2078_v30 = vpop.xlane.xlu0 %2077  ;;  %v2088_v63 = vpop.xlane.xlu1 %2087 }
 0x620   : > { %4425 = vlog2.f32 %v2078_v30 }
 0x621   : > { %v6717_v44 = vsub.f32 %v6575_v25, %v2106_v24  ;;  %4427 = vlog2.f32 %v2088_v63 }
 0x622   : > { %v4418_v10 = vpop.eup %4417 }
 0x623   : > { %v2102_v47 = vmul.f32 0.6931472, %v4418_v10  ;;  %3225 = vrot.lane.b32.xlu0 %v6717_v44, %s4574_s24  ;;  %v3186_v19 = vadd.f32 %v8228_v34, %v6717_v44  ;;  %v4420_v9 = vpop.eup %4419 }
 0x624   : > { %v2112_v10 = vmul.f32 0.6931472, %v4420_v9 }
 0x625   : > { %v6722_v42 = vsub.f32 %v6581_v6, %v2102_v47  ;;  %v3202_v6 = vsub.f32 %v3186_v19, %v6610_v45  ;;  %v2084_v19 = vpop.xlane.xlu1 %2083 }
 0x626   : > { %v4422_v54 = vpop.eup %4421  ;;  %4429 = vlog2.f32 %v2084_v19 }
 0x627   : > { %2967 = vrot.lane.b32.xlu0 %v2929_v12, %s4576_s16  ;;  %v2928_v25 = vsub.f32 %v6722_v42, %v6606_v15  ;;  %v3184_v40 = vadd.f32 %v8229_v18, %v6722_v42  ;;  %v4424_v24 = vpop.eup %4423  ;;  %v2114_v60 = vmul.f32 0.6931472, %v4422_v54  ;;  %v2927_v12 = vsub.f32 %v6710_v28, %v6600_v13  ;;  %v2090_v54 = vpop.xlane.xlu0 %2089 }
 0x628   : > { %v2108_v34 = vmul.f32 0.6931472, %v4424_v24  ;;  %v8231_v24 = vld [vmem:[#allocation174_spill] sm:$0xff]  ;;  %4431 = vlog2.f32 %v2090_v54 }
 0x629   : > { %2965 = vrot.lane.b32.xlu1 %v2928_v25, %s4576_s16  ;;  %v3200_v47 = vsub.f32 %v3184_v40, %v6606_v15  ;;  %v6745_v25 = vsub.f32 %v6551_v32, %v2112_v10  ;;  %v6748_v9 = vsub.f32 %v6587_v38, %v2114_v60  ;;  %v8230_v15 = vld [vmem:[#allocation152_spill] sm:$0xff]  ;;  %v2930_v60 = vsub.f32 %v6717_v44, %v6610_v45 }
 0x62a   : > { %v4426_v30 = vpop.eup %4425  ;;  %v3185_v18 = vadd.f32 %v8230_v15, %v6701_v43  ;;  %v6756_v40 = vsub.f32 %v6555_v14, %v2108_v34 }
 0x62b   : > { %2793 = vrot.lane.b32.xlu0 %v6717_v44, %s4572_s21  ;;  %v3190_v38 = vadd.f32 %v6245_v17, %v6748_v9  ;;  %v4428_v10 = vpop.eup %4427  ;;  %v8232_v17 = vld [vmem:[#allocation146_spill] sm:$0xff] }
 0x62c   : > { %v3201_v63 = vsub.f32 %v3185_v18, %v6608_v7  ;;  %v2931_v54 = vsub.f32 %v6756_v40, %v6612_v53 }
 0x62d   : > { %3289 = vrot.lane.b32.xlu1 %v3202_v6, %s4572_s21  ;;  %v2110_v6 = vmul.f32 0.6931472, %v4426_v30  ;;  %v3206_v14 = vsub.f32 %v3190_v38, %v6620_v23  ;;  %v2120_v30 = vmul.f32 0.6931472, %v4428_v10  ;;  %v8233_v38 = vld [vmem:[#allocation60_spill] sm:$0xff]  ;;  %v8235_v10 = vld [vmem:[#allocation155_spill] sm:$0xff] }
 0x62f   : > { %3221 = vrot.lane.b32.xlu0 %v6722_v42, %s4574_s24  ;;  %v6759_v32 = vsub.f32 %v6591_v16, %v2110_v6  ;;  %v6782_v6 = vsub.f32 %v6559_v5, %v2120_v30 }
 0x630   : > { %v4430_v34 = vpop.eup %4429 }
 0x631   : > { %3285 = vrot.lane.b32.xlu1 %v3200_v47, %s4572_s21  ;;  %v3188_v16 = vadd.f32 %v8231_v24, %v6759_v32  ;;  %v3183_v47 = vadd.f32 %v8232_v17, %v6710_v28  ;;  %v2116_v45 = vmul.f32 0.6931472, %v4430_v34  ;;  %v8234_v24 = vld [vmem:[#allocation65_spill] sm:$0xff] }
 0x632   : > { %v4432_v18 = vpop.eup %4431 }
 0x633   : > { %2963 = vrot.lane.b32.xlu0 %v2927_v12, %s4576_s16  ;;  %v2086_v12 = vpop.xlane.xlu0 %2085  ;;  %v3204_v7 = vsub.f32 %v3188_v16, %v6614_v55  ;;  %v3199_v19 = vsub.f32 %v3183_v47, %v6600_v13  ;;  %v6788_v15 = vsub.f32 %v6563_v27, %v2116_v45  ;;  %v2122_v13 = vmul.f32 0.6931472, %v4432_v18 }
 0x634   : > { %4433 = vlog2.f32 %v2086_v12  ;;  %v3189_v27 = vadd.f32 %v6207_v3, %v6745_v25 }
 0x635   : > { %3231 = vrot.lane.b32.xlu1 %v6745_v25, %s4574_s24  ;;  %v3191_v18 = vadd.f32 %v6283_v4, %v6788_v15  ;;  %v2932_v4 = vsub.f32 %v6759_v32, %v6614_v55 }
 0x636   : > { %v3205_v16 = vsub.f32 %v3189_v27, %v6616_v8 }
 0x637   : > { %2789 = vrot.lane.b32.xlu0 %v6722_v42, %s4572_s21 }
 0x639   : > { %3227 = vrot.lane.b32.xlu1 %v6756_v40, %s4574_s24 }
 0x63b   : > { %3287 = vrot.lane.b32.xlu0 %v3201_v63, %s4572_s21  ;;  %v6803_v63 = vsub.f32 %v6597_v33, %v2122_v13  ;;  %v8236_v33 = vld [vmem:[#allocation74_spill] sm:$0xff]  ;;  %v8237_v13 = vld [vmem:[#allocation75_spill] sm:$0xff] }
 0x63d   : > { %3297 = vrot.lane.b32.xlu1 %v3206_v14, %s4572_s21  ;;  %v3194_v3 = vadd.f32 %v6379_v35, %v6803_v63 }
 0x63e   : > { %v4434_v5 = vpop.eup %4433 }
 0x63f   : > { %2969 = vrot.lane.b32.xlu0 %v2930_v60, %s4576_s16  ;;  %v2118_v14 = vmul.f32 0.6931472, %v4434_v5  ;;  %v3187_v60 = vadd.f32 %v8235_v10, %v6756_v40  ;;  %v3210_v30 = vsub.f32 %v3194_v3, %v6634_v48 }
 0x641   : > { %3293 = vrot.lane.b32.xlu1 %v3204_v7, %s4572_s21  ;;  %v6812_v17 = vsub.f32 %v6603_v1, %v2118_v14  ;;  %v3203_v47 = vsub.f32 %v3187_v60, %v6612_v53  ;;  %v6827_v1 = vpop.f32.mrb[12].mxu0  ;;  %v3193_v53 = vadd.f32 %v6346_v58, %v6782_v6  ;;  %v8238_v58 = vld [vmem:[#allocation72_spill] sm:$0xff]  ;;  %v8241_v60 = vld [vmem:[#allocation31_spill] sm:$0xff] }
 0x642   : > { %v6832_v34 = vpop.f32.mrb[13].mxu0  ;;  %vm3101_vm3 = vcmp.eq.s32.totalorder %v8241_v60, 255  ;;  %vm3085_vm2 = vcmp.eq.s32.totalorder %v8241_v60, %v6431_v41  ;;  %v8246_v60 = vld [vmem:[#allocation175_spill] sm:$0xff] }
 0x643   : > { %3283 = vrot.lane.b32.xlu0 %v3199_v19, %s4572_s21  ;;  %v3192_v12 = vadd.f32 %v6317_v39, %v6812_v17  ;;  %v3209_v45 = vsub.f32 %v3193_v53, %v6632_v20  ;;  %v8243_v53 = vld [vmem:[#allocation36_spill] sm:$0xff] }
 0x644   : > { %vm3102_vm7 = vcmp.eq.s32.totalorder %v8243_v53, 255 }
 0x645   : > { %3239 = vrot.lane.b32.xlu1 %v6782_v6, %s4574_s24  ;;  %v3208_v35 = vsub.f32 %v3192_v12, %v6628_v62 }
 0x647   : > { %3233 = vrot.lane.b32.xlu0 %v6748_v9, %s4574_s24 }
 0x649   : > { %3235 = vrot.lane.b32.xlu1 %v6788_v15, %s4574_s24 }
 0x64b   : > { %3229 = vrot.lane.b32.xlu0 %v6759_v32, %s4574_s24 }
 0x64d   : > { %2687 = vrot.lane.b32.xlu1 %v8233_v38, %s4574_s24  ;;  %v3216_v39 = vpop.permute.xlu1 %3215  ;;  %v3207_v38 = vsub.f32 %v3191_v18, %v6624_v29  ;;  %v8245_v18 = vld [vmem:[#allocation27_spill] sm:$0xff] }
 0x64f   : > { %2971 = vrot.lane.b32.xlu0 %v2931_v54, %s4576_s16 }
 0x651   : > { %2689 = vrot.lane.b32.xlu1 %v8234_v24, %s4574_s24  ;;  %v6850_v54 = vpop.permute.xlu1 %2783  ;;  %v6861_v24 = vpop.f32.mrb[14].mxu0 }
 0x653   : > { %3295 = vrot.lane.b32.xlu0 %v3205_v16, %s4572_s21 }
 0x655   : > { %2691 = vrot.lane.b32.xlu1 %v8236_v33, %s4574_s24 }
 0x657   : > { %3291 = vrot.lane.b32.xlu0 %v3203_v47, %s4572_s21 }
 0x658   : > { %v6824_v7 = vpop.permute.xlu0 %3211  ;;  %v6853_v27 = vpop.permute.xlu1 %2779 }
 0x659   : > { %3305 = vrot.lane.b32.xlu1 %v3210_v30, %s4572_s21  ;;  %8239 = vst [vmem:[#allocation142_spill] sm:$0xff] %v6853_v27  ;;  %v2933_v30 = vsub.f32 %v6745_v25, %v6616_v8  ;;  %v2934_v8 = vsub.f32 %v6748_v9, %v6620_v23  ;;  %v8261_v27 = vld [vmem:[#allocation111_spill] sm:$0xff] }
 0x65b   : > { %3241 = vrot.lane.b32.xlu0 %v6803_v63, %s4574_s24 }
 0x65c   : > { %v3218_v19 = vpop.permute.xlu0 %3217 }
 0x65d   : > { %3301 = vrot.lane.b32.xlu1 %v3208_v35, %s4572_s21 }
 0x65f   : > { %3237 = vrot.lane.b32.xlu0 %v6812_v17, %s4574_s24 }
 0x660   : > { %v6845_v5 = vpop.permute.xlu0 %2959 }
 0x661   : > { %2693 = vrot.lane.b32.xlu1 %v8237_v13, %s4574_s24  ;;  %v2938_v13 = vsub.f32 %v6803_v63, %v6634_v48 }
 0x663   : > { %3303 = vrot.lane.b32.xlu0 %v3209_v45, %s4572_s21 }
 0x664   : > { %v6855_v14 = vpop.permute.xlu0 %2785 }
 0x665   : > { %2695 = vrot.lane.b32.xlu1 %v8238_v58, %s4574_s24 }
 0x667   : > { %3299 = vrot.lane.b32.xlu0 %v3207_v38, %s4572_s21 }
 0x66b   : > { %2795 = vrot.lane.b32.xlu0 %v6756_v40, %s4572_s21 }
 0x66d   : > { %v3214_v16 = vpop.permute.xlu1 %3213  ;;  %v6864_v10 = vpop.permute.xlu0 %2781 }
 0x66e   : > { %8240 = vst [vmem:[#allocation154_spill] sm:$0xff] %v6864_v10 }
 0x66f   : > { %2973 = vrot.lane.b32.xlu0 %v2932_v4, %s4576_s16  ;;  %v6895_v4 = vpop.f32.mrb[15].mxu0 }
 0x671   : > { %v6867_v3 = vpop.permute.xlu1 %2955  ;;  %v3280_v33 = vpop.permute.xlu0 %3279 }
 0x672   : > { %8242 = vst [vmem:[#allocation144_spill] sm:$0xff] %v6867_v3  ;;  %v3325_v47 = vsel %vm3101_vm3, %v3216_v39, %v3280_v33  ;;  %v8244_v39 = vld [vmem:[#allocation70_spill] sm:$0xff]  ;;  %vm3086_vm3 = vcmp.eq.s32.totalorder %v8243_v53, %v6239_v22  ;;  %v8247_v22 = vld [vmem:[#allocation35_spill] sm:$0xff] }
 0x673   : > { %2797 = vrot.lane.b32.xlu0 %v6759_v32, %s4572_s21  ;;  %v3341_v55 = vsel %vm3085_vm2, %v6641_v37, %v3325_v47  ;;  %vm3100_vm2 = vcmp.eq.s32.totalorder %v8245_v18, 255  ;;  %vm3099_vm1 = vcmp.eq.s32.totalorder %v8247_v22, 255 }
 0x674   : > { %v3373_v12 = vmul.f32 0.8996094, %v3341_v55 }
 0x675   : > { %v6876_v35 = vpop.permute.xlu1 %2961  ;;  %v3276_v48 = vpop.permute.xlu0 %3275 }
 0x676   : > { %3407 = vrot.lane.b32.xlu1 %v3373_v12, %s4572_s21  ;;  %v3323_v55 = vsel %vm3099_vm1, %v6824_v7, %v3276_v48 }
 0x677   : > { %2975 = vrot.lane.b32.xlu0 %v2933_v30, %s4576_s16 }
 0x679   : > { %v3282_v45 = vpop.permute.xlu1 %3281  ;;  %v6912_v12 = vpop.permute.xlu0 %2957 }
 0x67a   : > { %v3326_v41 = vsel %vm3102_vm7, %v3218_v19, %v3282_v45  ;;  %2697 = vrot.lane.b32.xlu1 %v8244_v39, %s4574_s24  ;;  %vm3084_vm7 = vcmp.eq.s32.totalorder %v8245_v18, %v8246_v60  ;;  %8248 = vst [vmem:[#allocation136_spill] sm:$0xff] %v6912_v12  ;;  %v8250_v39 = vld [vmem:[#allocation131_spill] sm:$0xff]  ;;  %v8257_v60 = vld [vmem:[#allocation118_spill] sm:$0xff] }
 0x67b   : > { %2799 = vrot.lane.b32.xlu0 %v6745_v25, %s4572_s21  ;;  %v3342_v38 = vsel %vm3086_vm3, %v6659_v61, %v3326_v41  ;;  %v2936_v41 = vsub.f32 %v6812_v17, %v6628_v62 }
 0x67c   : > { %v3374_v23 = vmul.f32 0.8996094, %v3342_v38  ;;  %v8251_v38 = vld [vmem:[#allocation172_spill] sm:$0xff] }
 0x67d   : > { %v3278_v58 = vpop.permute.xlu1 %3277 }
 0x67e   : > { %v3324_v19 = vsel %vm3100_vm2, %v3214_v16, %v3278_v58  ;;  %2985 = vrot.lane.b32.xlu1 %v2938_v13, %s4576_s16  ;;  %v2935_v16 = vsub.f32 %v6788_v15, %v6624_v29  ;;  %vm3083_vm2 = vcmp.eq.s32.totalorder %v8247_v22, %v6408_v52  ;;  %v6917_v29 = vpop.permute.xlu0 %2791  ;;  %v6924_v52 = vld [vmem:[#allocation6] ss:$0 sm:$0xff]  ;;  %v2641_v58 = vsub.f32 256.0, %v8251_v38 }
 0x67f   : > { %2977 = vrot.lane.b32.xlu0 %v2934_v8, %s4576_s16  ;;  %v3340_v33 = vsel %vm3084_vm7, %v6671_v0, %v3324_v19  ;;  %v3339_v30 = vsel %vm3083_vm2, %v6652_v21, %v3323_v55  ;;  %8249 = vst [vmem:[#allocation153_spill] sm:$0xff] %v6917_v29  ;;  %v6928_v18 = vadd.f32 %v6924_v52, %v8250_v39  ;;  %v8252_v19 = vld [vmem:[#allocation119_spill] sm:$0xff]  ;;  %v8256_v38 = vld [vmem:[#allocation168_spill] sm:$0xff] }
 0x680   : > { %v3372_v47 = vmul.f32 0.8996094, %v3340_v33  ;;  %v3371_v45 = vmul.f32 0.8996094, %v3339_v30  ;;  %v2937_v22 = vsub.f32 %v6782_v6, %v6632_v20  ;;  %v8258_v20 = vld [vmem:[#allocation34_spill] sm:$0xff]  ;;  %v8300_v21 = vld [vmem:[#allocation156_spill] sm:$0xff] }
 0x681   : > { %v3224_v53 = vpop.permute.xlu1 %3223  ;;  %v2721_v13 = vsub.f32 %v6928_v18, %v6630_v49 }
 0x682   : > { %3409 = vrot.lane.b32.xlu1 %v3374_v23, %s4572_s21  ;;  %v2737_v23 = vsel %vm2145_vm12, 0.0, %v8252_v19  ;;  %v2639_v19 = vsub.f32 256.0, %v8256_v38 }
 0x683   : > { %2801 = vrot.lane.b32.xlu0 %v6748_v9, %s4572_s21  ;;  %v2753_v48 = vsub.f32 %v2721_v13, %v2737_v23  ;;  %v2735_v13 = vsel %vm2143_vm15, 0.0, %v8257_v60 }
 0x685   : > { %v6919_v7 = vpop.permute.xlu1 %3219 }
 0x686   : > { %3405 = vrot.lane.b32.xlu1 %v3372_v47, %s4572_s21 }
 0x687   : > { %2979 = vrot.lane.b32.xlu0 %v2935_v16, %s4576_s16 }
 0x689   : > { %v2788_v62 = vpop.permute.xlu1 %2787 }
 0x68b   : > { %2803 = vrot.lane.b32.xlu0 %v6788_v15, %s4572_s21 }
 0x68f   : > { %3403 = vrot.lane.b32.xlu0 %v3371_v45, %s4572_s21 }
 0x693   : > { %2981 = vrot.lane.b32.xlu0 %v2936_v41, %s4576_s16  ;;  %v8255_v41 = vld [vmem:[#allocation162_spill] sm:$0xff] }
 0x694   : > { %v2719_v39 = vsub.f32 %v8255_v41, %v6626_v31  ;;  %v2736_v31 = vsel %vm2144_vm13, 0.0, %v8261_v27  ;;  %v8264_v27 = vld [vmem:[#allocation132_spill] sm:$0xff] }
 0x695   : > { %v6930_v8 = vpop.permute.xlu0 %3225 }
 0x696   : > { %v2751_v29 = vsub.f32 %v2719_v39, %v2735_v13  ;;  %v8263_v13 = vld [vmem:[#allocation48_spill] sm:$0xff] }
 0x697   : > { %2805 = vrot.lane.b32.xlu0 %v6812_v17, %s4572_s21  ;;  %vm3105_vm1 = vcmp.eq.s32.totalorder %v8263_v13, 255 }
 0x699   : > { %v2968_v33 = vpop.permute.xlu0 %2967 }
 0x69a   : > { %v3009_v16 = vmul.f32 %v2968_v33, %v2641_v58  ;;  %v8259_v58 = vld [vmem:[#allocation178_spill] sm:$0xff] }
 0x69b   : > { %v2966_v47 = vpop.permute.xlu1 %2965  ;;  %2983 = vrot.lane.b32.xlu0 %v2937_v22, %s4576_s16  ;;  %v2640_v23 = vsub.f32 256.0, %v8259_v58  ;;  %v8260_v22 = vld [vmem:[#allocation151_spill] sm:$0xff] }
 0x69c   : > { %v6943_v49 = vadd.f32 %v3009_v16, %v2753_v48  ;;  %v2720_v48 = vsub.f32 %v8260_v22, %v6638_v36  ;;  %v2831_v16 = vadd.f32 %v2788_v62, %v6710_v28 }
 0x69d   : > { %v2794_v55 = vpop.permute.xlu0 %2793  ;;  %v3008_v38 = vmul.f32 %v2966_v47, %v2640_v23  ;;  %v6972_v47 = vadd.f32 %v6924_v52, %v8264_v27  ;;  %v2642_v23 = vsub.f32 256.0, %v6312_v2 }
 0x69e   : > { %8254 = vst [vmem:[#allocation148_spill] sm:$0xff] %v6943_v49  ;;  %v2752_v60 = vsub.f32 %v2720_v48, %v2736_v31  ;;  %v2847_v58 = vsel %vm2143_vm15, %v2788_v62, %v2831_v16  ;;  %vm3089_vm15 = vcmp.eq.s32.totalorder %v8263_v13, %v6466_v50  ;;  %v8265_v48 = vld [vmem:[#allocation112_spill] sm:$0xff]  ;;  %v8267_v50 = vld [vmem:[#allocation51_spill] sm:$0xff]  ;;  %v8298_v16 = vld [vmem:[#allocation49_spill] sm:$0xff] }
 0x69f   : > { %v3290_v30 = vpop.permute.xlu1 %3289  ;;  %2807 = vrot.lane.b32.xlu0 %v6782_v6, %s4572_s21  ;;  %v2738_v31 = vsel %vm2146_vm11, 0.0, %v8265_v48 }
 0x6a0   : > { %v3024_v12 = vadd.f32 %v3008_v38, %v2752_v60 }
 0x6a1   : > { %v3222_v45 = vpop.permute.xlu0 %3221 }
 0x6a3   : > { %v3286_v33 = vpop.permute.xlu1 %3285 }
 0x6a5   : > { %v2964_v49 = vpop.permute.xlu0 %2963 }
 0x6a6   : > { %v3007_v41 = vmul.f32 %v2964_v49, %v2639_v19 }
 0x6a7   : > { %v6960_v3 = vpop.permute.xlu1 %3231 }
 0x6a8   : > { %v3023_v10 = vadd.f32 %v3007_v41, %v2751_v29 }
 0x6a9   : > { %v2790_v0 = vpop.permute.xlu0 %2789 }
 0x6aa   : > { %v2832_v36 = vadd.f32 %v2790_v0, %v6722_v42  ;;  %v6965_v22 = vadd.f32 %v3023_v10, %v2847_v58  ;;  %v2722_v10 = vsub.f32 %v6972_v47, %v6645_v56 }
 0x6ab   : > { %v6967_v39 = vpop.permute.xlu1 %3227 }
 0x6ac   : > { %v2848_v29 = vsel %vm2144_vm13, %v2790_v0, %v2832_v36  ;;  %v2754_v58 = vsub.f32 %v2722_v10, %v2738_v31  ;;  %vm3106_vm13 = vcmp.eq.s32.totalorder %v8267_v50, 255  ;;  %v8270_v31 = vld [vmem:[#allocation43_spill] sm:$0xff] }
 0x6ad   : > { %v6976_v49 = vadd.f32 %v3024_v12, %v2848_v29  ;;  %v3288_v62 = vpop.permute.xlu0 %3287  ;;  %v2834_v12 = vadd.f32 %v2794_v55, %v6717_v44  ;;  %v3330_v29 = vsel %vm3106_vm13, %v6930_v8, %v3290_v30 }
 0x6ae   : > { %v3329_v19 = vsel %vm3105_vm1, %v3224_v53, %v3288_v62  ;;  %v8268_v53 = vld [vmem:[#allocation40_spill] sm:$0xff]  ;;  %vm3110_vm1 = vcmp.eq.s32.totalorder %v8270_v31, 255 }
 0x6af   : > { %v3345_v41 = vsel %vm3089_vm15, %v6701_v43, %v3329_v19  ;;  %v3298_v38 = vpop.permute.xlu1 %3297  ;;  %vm3103_vm3 = vcmp.eq.s32.totalorder %v8268_v53, 255  ;;  %v2850_v13 = vsel %vm2146_vm11, %v2794_v55, %v2834_v12  ;;  %vm3087_vm7 = vcmp.eq.s32.totalorder %v8268_v53, %v6453_v26  ;;  %v8269_v19 = vld [vmem:[#allocation44_spill] sm:$0xff]  ;;  %v8272_v12 = vld [vmem:[#allocation179_spill] sm:$0xff] }
 0x6b0   : > { %v3377_v0 = vmul.f32 0.8996094, %v3345_v41  ;;  %vm3104_vm2 = vcmp.eq.s32.totalorder %v8269_v19, 255  ;;  %v8271_v41 = vld [vmem:[#allocation180_spill] sm:$0xff]  ;;  %vm3094_vm15 = vcmp.eq.s32.totalorder %v8270_v31, %v6371_v11  ;;  %vm3088_vm13 = vcmp.eq.s32.totalorder %v8269_v19, %v8272_v12 }
 0x6b1   : > { %v2970_v60 = vpop.permute.xlu0 %2969  ;;  %vm3090_vm11 = vcmp.eq.s32.totalorder %v8267_v50, %v8271_v41  ;;  %v7028_v50 = vadd.f32 %v6924_v52, %v6523_v57  ;;  %v8276_v57 = vld [vmem:[#allocation124_spill] sm:$0xff] }
 0x6b2   : > { %v3010_v36 = vmul.f32 %v2970_v60, %v2642_v23  ;;  %3415 = vrot.lane.b32.xlu1 %v3377_v0, %s4572_s21  ;;  %v3346_v26 = vsel %vm3090_vm11, %v6717_v44, %v3330_v29  ;;  %v7017_v60 = vadd.f32 %v6924_v52, %v6512_v59  ;;  %v7042_v29 = vadd.f32 %v6924_v52, %v6832_v34  ;;  %v8297_v53 = vld [vmem:[#allocation120_spill] sm:$0xff] }
 0x6b3   : > { %v3294_v56 = vpop.permute.xlu1 %3293  ;;  %v3378_v44 = vmul.f32 0.8996094, %v3346_v26 }
 0x6b4   : > { %v3026_v2 = vadd.f32 %v3010_v36, %v2754_v58 }
 0x6b5   : > { %v3284_v27 = vpop.permute.xlu0 %3283 }
 0x6b6   : > { %v3327_v62 = vsel %vm3103_vm3, %v6919_v7, %v3284_v27  ;;  %v6997_v10 = vadd.f32 %v3026_v2, %v2850_v13  ;;  %v3328_v7 = vsel %vm3104_vm2, %v3222_v45, %v3286_v33  ;;  %v8273_v45 = vld [vmem:[#allocation125_spill] sm:$0xff]  ;;  %v8275_v13 = vld [vmem:[#allocation55_spill] sm:$0xff] }
 0x6b7   : > { %v3343_v23 = vsel %vm3087_vm7, %v6710_v28, %v3327_v62  ;;  %v7001_v48 = vpop.permute.xlu1 %3239  ;;  %v3344_v36 = vsel %vm3088_vm13, %v6722_v42, %v3328_v7  ;;  %4435 = vlog2.f32 %v8273_v45  ;;  %vm3109_vm3 = vcmp.eq.s32.totalorder %v8275_v13, 255 }
 0x6b8   : > { %v3375_v55 = vmul.f32 0.8996094, %v3343_v23  ;;  %v3376_v59 = vmul.f32 0.8996094, %v3344_v36  ;;  %vm3093_vm7 = vcmp.eq.s32.totalorder %v8275_v13, %v6481_v46  ;;  %v8277_v23 = vld [vmem:[#allocation39_spill] sm:$0xff] }
 0x6b9   : > { %v3234_v0 = vpop.permute.xlu0 %3233  ;;  %vm3108_vm2 = vcmp.eq.s32.totalorder %v8277_v23, 255  ;;  %v8279_v46 = vld [vmem:[#allocation171_spill] sm:$0xff] }
 0x6ba   : > { %v3334_v8 = vsel %vm3110_vm1, %v3234_v0, %v3298_v38  ;;  %3411 = vrot.lane.b32.xlu1 %v3375_v55, %s4572_s21  ;;  %v8274_v38 = vld [vmem:[#allocation93_spill] sm:$0xff] }
 0x6bb   : > { %v3350_v28 = vsel %vm3094_vm15, %v6748_v9, %v3334_v8  ;;  %v7011_v30 = vpop.permute.xlu1 %3235  ;;  %4437 = vlog2.f32 %v8274_v38  ;;  %v8278_v55 = vld [vmem:[#allocation53_spill] sm:$0xff] }
 0x6bc   : > { %v3382_v58 = vmul.f32 0.8996094, %v3350_v28  ;;  %4439 = vlog2.f32 %v8276_v57  ;;  %vm3107_vm1 = vcmp.eq.s32.totalorder %v8278_v55, 255  ;;  %vm3091_vm11 = vcmp.eq.s32.totalorder %v8278_v55, %v8279_v46  ;;  %v8282_v57 = vld [vmem:[#allocation47_spill] sm:$0xff]  ;;  %v8292_v0 = vld [vmem:[#allocation57_spill] sm:$0xff] }
 0x6bd   : > { %v3230_v11 = vpop.permute.xlu0 %3229  ;;  %4441 = vlog2.f32 %v8154_v51  ;;  %vm3112_vm13 = vcmp.eq.s32.totalorder %v8282_v57, 255 }
 0x6be   : > { %3417 = vrot.lane.b32.xlu1 %v3378_v44, %s4572_s21  ;;  %3425 = vrot.lane.b32.xlu0 %v3382_v58, %s4572_s21  ;;  %v8280_v58 = vld [vmem:[#allocation133_spill] sm:$0xff] }
 0x6bf   : > { %v7023_v33 = vpop.permute.xlu1 %2687  ;;  %vm3092_vm15 = vcmp.eq.s32.totalorder %v8277_v23, %v8280_v58  ;;  %v8283_v23 = vld [vmem:[#allocation95_spill] sm:$0xff]  ;;  %v7081_v58 = vadd.f32 %v6924_v52, %v6827_v1 }
 0x6c1   : > { %v7032_v42 = vpop.permute.xlu0 %2971  ;;  %v4436_v34 = vpop.eup %4435 }
 0x6c2   : > { %3413 = vrot.lane.b32.xlu1 %v3376_v59, %s4572_s21  ;;  %v1443_v28 = vmul.f32 0.6931472, %v4436_v34 }
 0x6c3   : > { %v7035_v2 = vpop.permute.xlu1 %2689 }
 0x6c5   : > { %v3296_v62 = vpop.permute.xlu0 %3295  ;;  %v4438_v8 = vpop.eup %4437 }
 0x6c6   : > { %v3333_v19 = vsel %vm3109_vm3, %v6960_v3, %v3296_v62  ;;  %v3332_v3 = vsel %vm3108_vm2, %v3230_v11, %v3294_v56  ;;  %v1445_v45 = vmul.f32 0.6931472, %v4438_v8  ;;  %v4440_v13 = vpop.eup %4439  ;;  %v8281_v56 = vld [vmem:[#allocation97_spill] sm:$0xff] }
 0x6c7   : > { %v3349_v31 = vsel %vm3093_vm7, %v6745_v25, %v3333_v19  ;;  %v7051_v41 = vpop.permute.xlu1 %2691  ;;  %v3348_v38 = vsel %vm3092_vm15, %v6759_v32, %v3332_v3  ;;  %v1468_v11 = vadd.f32 %v1443_v28, %v8281_v56  ;;  %v7069_v19 = vadd.f32 %v6924_v52, %v6895_v4 }
 0x6c8   : > { %v3381_v26 = vmul.f32 0.8996094, %v3349_v31  ;;  %v3380_v62 = vmul.f32 0.8996094, %v3348_v38  ;;  %v4442_v31 = vpop.eup %4441  ;;  %v1469_v55 = vadd.f32 %v1445_v45, %v8283_v23  ;;  %v1447_v8 = vmul.f32 0.6931472, %v4440_v13 }
 0x6c9   : > { %v3292_v7 = vpop.permute.xlu0 %3291  ;;  %v1640_v3 = vmul.f32 256.0, %v1468_v11  ;;  %v1449_v4 = vmul.f32 0.6931472, %v4442_v31  ;;  %v8287_v38 = vld [vmem:[#allocation135_spill] sm:$0xff] }
 0x6ca   : > { %v3331_v51 = vsel %vm3107_vm1, %v6967_v39, %v3292_v7  ;;  %3423 = vrot.lane.b32.xlu1 %v3381_v26, %s4572_s21  ;;  %v8284_v26 = vld [vmem:[#allocation92_spill] sm:$0xff]  ;;  %v1641_v45 = vmul.f32 256.0, %v1469_v55  ;;  %v1626_v13 = vadd.f32 %v6924_v52, %v8287_v38  ;;  %vm3111_vm1 = vcmp.eq.s32.totalorder %v8292_v0, 255 }
 0x6cb   : > { %v3347_v12 = vsel %vm3091_vm11, %v6756_v40, %v3331_v51  ;;  %v3306_v44 = vpop.permute.xlu1 %3305  ;;  %v1688_v7 = vsub.f32 %v8284_v26, %v1468_v11  ;;  %v8285_v51 = vld [vmem:[#allocation50_spill] sm:$0xff]  ;;  %v1656_v1 = vsub.f32 %v6928_v18, %v1640_v3  ;;  %v8290_v26 = vld [vmem:[#allocation173_spill] sm:$0xff]  ;;  %v8296_v3 = vld [vmem:[#allocation183_spill] sm:$0xff] }
 0x6cc   : > { %v3379_v36 = vmul.f32 0.8996094, %v3347_v12  ;;  %vm3114_vm3 = vcmp.eq.s32.totalorder %v8285_v51, 255  ;;  %v8286_v12 = vld [vmem:[#allocation139_spill] sm:$0xff]  ;;  %v8295_v18 = vld [vmem:[#allocation170_spill] sm:$0xff] }
 0x6cd   : > { %v3242_v59 = vpop.permute.xlu0 %3241  ;;  %vm3096_vm7 = vcmp.eq.s32.totalorder %v8282_v57, %v8286_v12  ;;  %v2643_v12 = vsub.f32 256.0, %v8290_v26  ;;  %vm3095_vm15 = vcmp.eq.s32.totalorder %v8292_v0, %v8295_v18 }
 0x6ce   : > { %3419 = vrot.lane.b32.xlu1 %v3379_v36, %s4572_s21  ;;  %v3338_v31 = vsel %vm3114_vm3, %v3242_v59, %v3306_v44  ;;  %v8291_v36 = vld [vmem:[#allocation58_spill] sm:$0xff]  ;;  %v1657_v59 = vsub.f32 %v6972_v47, %v1641_v45  ;;  %v1672_v47 = vmul.f32 0.000390625, %v1656_v1 }
 0x6cf   : > { %v3302_v39 = vpop.permute.xlu1 %3301  ;;  %vm3113_vm2 = vcmp.eq.s32.totalorder %v8291_v36, 255  ;;  %v3011_v0 = vmul.f32 %v7032_v42, %v2643_v12  ;;  %v8302_v42 = vld [vmem:[#allocation167_spill] sm:$0xff] }
 0x6d0   : > { %v1673_v44 = vmul.f32 0.000390625, %v1657_v59  ;;  %v2637_v12 = vsub.f32 256.0, %v8302_v42  ;;  %v8303_v59 = vld [vmem:[#allocation94_spill] sm:$0xff]  ;;  %v8310_v42 = vld [vmem:[#allocation113_spill] sm:$0xff] }
 0x6d1   : > { %v3238_v34 = vpop.permute.xlu0 %3237 }
 0x6d2   : > { %v3336_v46 = vsel %vm3112_vm13, %v3238_v34, %v3302_v39  ;;  %3421 = vrot.lane.b32.xlu1 %v3380_v62, %s4572_s21  ;;  %v1704_v39 = vmul.f32 0.8996094, %v1688_v7  ;;  %v8288_v62 = vld [vmem:[#allocation106_spill] sm:$0xff] }
 0x6d3   : > { %v7075_v28 = vpop.permute.xlu1 %2693  ;;  %v3352_v56 = vsel %vm3096_vm7, %v6812_v17, %v3336_v46  ;;  %v1689_v23 = vsub.f32 %v8288_v62, %v1469_v55  ;;  %v8289_v34 = vld [vmem:[#allocation82_spill] sm:$0xff]  ;;  %v8293_v46 = vld [vmem:[#allocation140_spill] sm:$0xff]  ;;  %v2723_v62 = vsub.f32 %v1626_v13, %v8296_v3  ;;  %vm3579_vm7 = vcmask 15368  }
 0x6d4   : > { %v1470_v57 = vadd.f32 %v1447_v8, %v8289_v34  ;;  %vm3098_vm11 = vcmp.eq.s32.totalorder %v8285_v51, %v8293_v46  ;;  %v8294_v55 = vld [vmem:[#allocation88_spill] sm:$0xff]  ;;  %v3384_v8 = vmul.f32 0.8996094, %v3352_v56  ;;  %v2739_v51 = vsel %vm2147_vm8, 0.0, %v8297_v53 }
 0x6d5   : > { %v3304_v11 = vpop.permute.xlu0 %3303  ;;  %v1471_v7 = vadd.f32 %v1449_v4, %v8294_v55  ;;  %v3354_v34 = vsel %vm3098_vm11, %v6803_v63, %v3338_v31  ;;  %v1705_v45 = vmul.f32 0.8996094, %v1689_v23  ;;  %v8299_v55 = vld [vmem:[#allocation163_spill] sm:$0xff]  ;;  %v2755_v53 = vsub.f32 %v2723_v62, %v2739_v51  ;;  %v8301_v23 = vld [vmem:[#allocation86_spill] sm:$0xff] }
 0x6d6   : > { %2809 = vrot.lane.b32.xlu1 %v6803_v63, %s4572_s21  ;;  %v1642_v27 = vmul.f32 256.0, %v1470_v57  ;;  %v3337_v4 = vsel %vm3113_vm2, %v7001_v48, %v3304_v11  ;;  %vm3097_vm13 = vcmp.eq.s32.totalorder %v8291_v36, %v8299_v55  ;;  %v3386_v18 = vmul.f32 0.8996094, %v3354_v34  ;;  %v8304_v51 = vld [vmem:[#allocation134_spill] sm:$0xff] }
 0x6d7   : > { %v7096_v38 = vpop.permute.xlu1 %2695  ;;  %v1643_v31 = vmul.f32 256.0, %v1471_v7  ;;  %v1627_v48 = vadd.f32 %v6924_v52, %v8300_v21  ;;  %v1720_v36 = vadd.f32 %v1704_v39, %v1672_v47  ;;  %v1691_v62 = vsub.f32 %v8303_v59, %v1471_v7  ;;  %v8311_v59 = vld [vmem:[#allocation33_spill] sm:$0xff] }
 0x6d8   : > { %v1658_v1 = vsub.f32 %v1626_v13, %v1642_v27  ;;  %v3027_v34 = vadd.f32 %v3011_v0, %v2755_v53  ;;  %v2644_v21 = vsub.f32 256.0, %v8304_v51  ;;  %v1721_v55 = vadd.f32 %v1705_v45, %v1673_v44 }
 0x6d9   : > { %v3300_v26 = vpop.permute.xlu0 %3299  ;;  %v1659_v27 = vsub.f32 %v1627_v48, %v1643_v31  ;;  %v2740_v31 = vsel %vm2148_vm9, 0.0, %v8310_v42  ;;  %v1736_v45 = vsub.f32 0.0, %v1720_v36  ;;  %v1707_v51 = vmul.f32 0.8996094, %v1691_v62  ;;  %v8314_v36 = vld [vmem:[#allocation109_spill] sm:$0xff]  ;;  %v8323_v42 = vld [vmem:[#allocation28_spill] sm:$0xff] }
 0x6da   : > { %v3335_v56 = vsel %vm3111_vm1, %v7011_v30, %v3300_v26  ;;  %3429 = vrot.lane.b32.xlu1 %v3384_v8, %s4572_s21  ;;  %v3353_v30 = vsel %vm3097_vm13, %v6782_v6, %v3337_v4  ;;  %v1690_v8 = vsub.f32 %v8301_v23, %v1470_v57  ;;  %v8306_v4 = vld [vmem:[#allocation129_spill] sm:$0xff]  ;;  %v8308_v23 = vld [vmem:[#allocation26_spill] sm:$0xff]  ;;  %v1674_v0 = vmul.f32 0.000390625, %v1658_v1  ;;  %v8312_v1 = vld [vmem:[#allocation176_spill] sm:$0xff] }
 0x6db   : > { %v3351_v46 = vsel %vm3095_vm15, %v6788_v15, %v3335_v56  ;;  %v8305_v56 = vld [vmem:[#allocation138_spill] sm:$0xff]  ;;  %v3385_v13 = vmul.f32 0.8996094, %v3353_v30  ;;  %v3005_v30 = vmul.f32 %v6845_v5, %v2637_v12  ;;  %v8313_v5 = vld [vmem:[#allocation177_spill] sm:$0xff]  ;;  %v2732_v62 = vsel %vm2140_vm10, 0.0, %v8314_v36 }
 0x6dc   : > { %v3383_v3 = vmul.f32 0.8996094, %v3351_v46  ;;  %v2717_v46 = vsub.f32 %v8306_v4, %v8305_v56  ;;  %v1706_v53 = vmul.f32 0.8996094, %v1690_v8  ;;  %v1737_v56 = vsub.f32 0.0, %v1721_v55  ;;  %v8318_v55 = vld [vmem:[#allocation121_spill] sm:$0xff] }
 0x6dd   : > { %v2796_v11 = vpop.permute.xlu0 %2795  ;;  %v2638_v8 = vsub.f32 256.0, %v8312_v1  ;;  %v2645_v12 = vsub.f32 256.0, %v8313_v5  ;;  %v8324_v5 = vld [vmem:[#allocation166_spill] sm:$0xff]  ;;  %vm8391_vm11 = vcmp.eq.s32.totalorder %v8308_v23, 4294967295  ;;  %vm8394_vm13 = vcmp.eq.s32.totalorder %v8323_v42, 4294967295 }
 0x6de   : > { %v2835_v26 = vadd.f32 %v2796_v11, %v6756_v40  ;;  %3433 = vrot.lane.b32.xlu1 %v3386_v18, %s4572_s21  ;;  %3427 = vrot.lane.b32.xlu0 %v3383_v3, %s4572_s21  ;;  %v8307_v40 = vld [vmem:[#allocation117_spill] sm:$0xff]  ;;  %v2636_v36 = vsub.f32 256.0, %v8324_v5  ;;  %v8334_v5 = vld [vmem:[#allocation186_spill] sm:$0xff]  ;;  %vm8393_vm15 = vmmov %vm8391_vm11 }
 0x6df   : > { %v2733_v18 = vsel %vm2141_vm0, 0.0, %v8307_v40  ;;  %v8309_v3 = vld [vmem:[#allocation185_spill] sm:$0xff]  ;;  %v3006_v1 = vmul.f32 %v6876_v35, %v2638_v8  ;;  %v2830_v35 = vadd.f32 %v6855_v14, %v6659_v61  ;;  %v8330_v61 = vld [vmem:[#allocation164_spill] sm:$0xff] }
 0x6e0   : > { %v2851_v57 = vsel %vm2147_vm8, %v2796_v11, %v2835_v26  ;;  %v2724_v39 = vsub.f32 %v1627_v48, %v8309_v3  ;;  %v2749_v11 = vsub.f32 %v2717_v46, %v2733_v18  ;;  %v1675_v26 = vmul.f32 0.000390625, %v1659_v27  ;;  %v8316_v46 = vld [vmem:[#allocation182_spill] sm:$0xff] }
 0x6e1   : > { %v7136_v47 = vadd.f32 %v3027_v34, %v2851_v57  ;;  %v2974_v7 = vpop.permute.xlu0 %2973  ;;  %v2829_v34 = vadd.f32 %v6850_v54, %v6641_v37  ;;  %v1722_v57 = vadd.f32 %v1706_v53, %v1674_v0  ;;  %v8317_v27 = vld [vmem:[#allocation130_spill] sm:$0xff]  ;;  %v8319_v37 = vld [vmem:[#allocation52_spill] sm:$0xff]  ;;  %v2741_v18 = vsel %vm2149_vm6, 0.0, %v8318_v55 }
 0x6e2   : > { %3431 = vrot.lane.b32.xlu0 %v3385_v13, %s4572_s21  ;;  %v3012_v44 = vmul.f32 %v2974_v7, %v2644_v21  ;;  %v2756_v48 = vsub.f32 %v2724_v39, %v2740_v31  ;;  %v3021_v40 = vadd.f32 %v3005_v30, %v2749_v11  ;;  %v8315_v21 = vld [vmem:[#allocation25_spill] sm:$0xff]  ;;  %v2718_v13 = vsub.f32 %v8317_v27, %v8316_v46  ;;  %v8321_v0 = vld [vmem:[#allocation160_spill] sm:$0xff] }
 0x6e3   : > { %v8320_v7 = vld [vmem:[#allocation149_spill] sm:$0xff]  ;;  %v1723_v30 = vadd.f32 %v1707_v51, %v1675_v26  ;;  %v2845_v11 = vsel %vm2141_vm0, %v6850_v54, %v2829_v34  ;;  %v1738_v46 = vsub.f32 0.0, %v1722_v57  ;;  %v8325_v27 = vsub.f32 %v7017_v60, %v7023_v33 }
 0x6e4   : > { %v3028_v39 = vadd.f32 %v3012_v44, %v2756_v48  ;;  %v2716_v53 = vsub.f32 %v8321_v0, %v8320_v7  ;;  %v3037_v51 = vadd.f32 %v3021_v40, %v2845_v11  ;;  %v7177_v54 = vadd.f32 %v6924_v52, %v6861_v24  ;;  %v8327_v0 = vld [vmem:[#allocation128_spill] sm:$0xff]  ;;  %v8329_v24 = vld [vmem:[#allocation158_spill] sm:$0xff]  ;;  %v8333_v11 = vld [vmem:[#allocation145_spill] sm:$0xff] }
 0x6e5   : > { %v2798_v4 = vpop.permute.xlu0 %2797  ;;  %v2757_v55 = vsub.f32 %v8325_v27, %v2741_v18  ;;  %v1739_v57 = vsub.f32 0.0, %v1723_v30  ;;  %v2646_v52 = vsub.f32 256.0, %v8329_v24  ;;  %vm8386_vm3 = vcmp.eq.s32.totalorder %v8315_v21, 4294967295 }
 0x6e6   : > { %v2836_v3 = vadd.f32 %v2798_v4, %v6759_v32  ;;  %1774 = vrot.lane.b32.xlu0 %v1736_v45, %s4574_s24  ;;  %v8322_v32 = vld [vmem:[#allocation110_spill] sm:$0xff]  ;;  %v2748_v8 = vsub.f32 %v2716_v53, %v2732_v62  ;;  %v8332_v53 = vld [vmem:[#allocation37_spill] sm:$0xff]  ;;  %vm8388_vm2 = vmmov %vm8386_vm3 }
 0x6e7   : > { %v2734_v31 = vsel %vm2142_vm14, 0.0, %v8322_v32  ;;  %v8331_v62 = vld [vmem:[#allocation114_spill] sm:$0xff] }
 0x6e8   : > { %v2852_v45 = vsel %vm2148_vm9, %v2798_v4, %v2836_v3  ;;  %v3408_v7 = vpop.permute.xlu1 %3407  ;;  %v2750_v4 = vsub.f32 %v2718_v13, %v2734_v31  ;;  %v2746_v13 = vsel %vm2154_vm5, 0.0, %v8327_v0  ;;  %v2635_v31 = vsub.f32 256.0, %v8330_v61  ;;  %v8336_v0 = vld [vmem:[#allocation137_spill] sm:$0xff] }
 0x6e9   : > { %v7169_v44 = vadd.f32 %v3028_v39, %v2852_v45  ;;  %v2976_v48 = vpop.permute.xlu0 %2975  ;;  %v8326_v39 = vld [vmem:[#allocation136_spill] sm:$0xff]  ;;  %v2742_v30 = vsel %vm2150_vm4, 0.0, %v8331_v62  ;;  %v8338_v61 = vsub.f32 %v7028_v50, %v7035_v2 }
 0x6ea   : > { %v3013_v26 = vmul.f32 %v2976_v48, %v2645_v12  ;;  %1776 = vrot.lane.b32.xlu0 %v1737_v56, %s4574_s24  ;;  %v3022_v3 = vadd.f32 %v3006_v1, %v2750_v4  ;;  %v3004_v33 = vmul.f32 %v8326_v39, %v2636_v36  ;;  %v3357_v12 = vmul.f32 0.000390625, %v3037_v51  ;;  %v8328_v56 = vld [vmem:[#allocation45_spill] sm:$0xff]  ;;  %v8335_v36 = vld [vmem:[#allocation154_spill] sm:$0xff] }
 0x6eb   : > { %v2650_v1 = vsub.f32 256.0, %v8333_v11  ;;  %v2828_v48 = vadd.f32 %v8335_v36, %v8334_v5 }
 0x6ec   : > { %v3029_v34 = vadd.f32 %v3013_v26, %v2757_v55  ;;  %v2698_v32 = vpop.permute.xlu1 %2697  ;;  %v3020_v55 = vadd.f32 %v3004_v33, %v2748_v8  ;;  %v8342_v33 = vld [vmem:[#allocation144_spill] sm:$0xff] }
 0x6ed   : > { %v2800_v18 = vpop.permute.xlu0 %2799  ;;  %v2730_v45 = vsub.f32 %v7177_v54, %v2698_v32  ;;  %v8337_v32 = vld [vmem:[#allocation141_spill] sm:$0xff] }
 0x6ee   : > { %v2837_v40 = vadd.f32 %v2800_v18, %v6745_v25  ;;  %1778 = vrot.lane.b32.xlu0 %v1738_v46, %s4574_s24  ;;  %v2846_v25 = vsel %vm2142_vm14, %v6855_v14, %v2830_v35  ;;  %v3453_v46 = vadd.f32 %v3408_v7, %v3357_v12  ;;  %v2715_v24 = vsub.f32 %v8337_v32, %v8336_v0  ;;  %v8339_v7 = vld [vmem:[#allocation116_spill] sm:$0xff] }
 0x6ef   : > { %v2762_v51 = vsub.f32 %v2730_v45, %v2746_v13  ;;  %v3038_v39 = vadd.f32 %v3022_v3, %v2846_v25  ;;  %v2758_v14 = vsub.f32 %v8338_v61, %v2742_v30  ;;  %v8340_v12 = vld [vmem:[#allocation32_spill] sm:$0xff]  ;;  %v2844_v3 = vsel %vm2140_vm10, %v8335_v36, %v2828_v48 }
 0x6f0   : > { %v2853_v27 = vsel %vm2149_vm6, %v2800_v18, %v2837_v40  ;;  %v2986_v62 = vpop.permute.xlu1 %2985  ;;  %vm8341_vm6 = vcmp.eq.s32.totalorder %v8340_v12, 255  ;;  %v3003_v18 = vmul.f32 %v8342_v33, %v2635_v31  ;;  %v3469_v40 = vsub.f32 0.0, %v3453_v46  ;;  %v8346_v31 = vld [vmem:[#allocation77_spill] sm:$0xff]  ;;  %v8347_v46 = vld [vmem:[#allocation54_spill] sm:$0xff] }
 0x6f1   : > { %v7201_v26 = vadd.f32 %v3029_v34, %v2853_v27  ;;  %v2978_v4 = vpop.permute.xlu0 %2977  ;;  %v2731_v8 = vsel %vm8341_vm6, 0.0, %v8339_v7  ;;  %v3018_v34 = vmul.f32 %v2986_v62, %v2650_v1  ;;  %v3036_v30 = vadd.f32 %v3020_v55, %v2844_v3  ;;  %v8343_v1 = vld [vmem:[#allocation159_spill] sm:$0xff]  ;;  %v8344_v27 = vld [vmem:[#allocation184_spill] sm:$0xff]  ;;  %vm8350_vm14 = vmmov %vm8341_vm6 }
 0x6f2   : > { %v3014_v35 = vmul.f32 %v2978_v4, %v2646_v52  ;;  %1780 = vrot.lane.b32.xlu0 %v1739_v57, %s4574_s24  ;;  %v3358_v52 = vmul.f32 0.000390625, %v3038_v39  ;;  %v2747_v11 = vsub.f32 %v2715_v24, %v2731_v8  ;;  %v2647_v5 = vsub.f32 256.0, %v8343_v1  ;;  %v8345_v4 = vld [vmem:[#allocation142_spill] sm:$0xff]  ;;  %v8354_v1 = vld [vmem:[#allocation127_spill] sm:$0xff]  ;;  %vm8396_vm6 = vmmov %vm8394_vm13 }
 0x6f3   : > { %v7216_v45 = vadd.f32 %v3018_v34, %v2762_v51  ;;  %v2827_v36 = vadd.f32 %v8345_v4, %v8344_v27  ;;  %vm8348_vm9 = vcmp.eq.s32.totalorder %v8347_v46, 255  ;;  %v3356_v24 = vmul.f32 0.000390625, %v3036_v30  ;;  %v8355_v27 = vld [vmem:[#allocation101_spill] sm:$0xff] }
 0x6f4   : > { %v3030_v13 = vadd.f32 %v3014_v35, %v2758_v14  ;;  %v3410_v25 = vpop.permute.xlu1 %3409  ;;  %v2743_v51 = vsel %vm8348_vm9, 0.0, %v8346_v31  ;;  %v3019_v0 = vadd.f32 %v3003_v18, %v2747_v11  ;;  %v8349_v61 = vsub.f32 %v7042_v29, %v7051_v41  ;;  %v8357_v31 = vld [vmem:[#allocation76_spill] sm:$0xff] }
 0x6f5   : > { %v2802_v2 = vpop.permute.xlu0 %2801  ;;  %v3454_v48 = vadd.f32 %v3410_v25, %v3358_v52  ;;  %v2843_v7 = vsel %vm8350_vm14, %v8345_v4, %v2827_v36  ;;  %v8353_v25 = vld [vmem:[#allocation80_spill] sm:$0xff]  ;;  %v8356_v36 = vld [vmem:[#allocation153_spill] sm:$0xff] }
 0x6f6   : > { %v2838_v57 = vadd.f32 %v2802_v2, %v6748_v9  ;;  %3503 = vrot.lane.b32.xlu0 %v3469_v40, %s4574_s24  ;;  %v2759_v14 = vsub.f32 %v8349_v61, %v2743_v51  ;;  %v3035_v3 = vadd.f32 %v3019_v0, %v2843_v7  ;;  %v8358_v0 = vld [vmem:[#allocation126_spill] sm:$0xff] }
 0x6f7   : > { %v3470_v9 = vsub.f32 0.0, %v3454_v48  ;;  %v2833_v48 = vadd.f32 %v8356_v36, %v6701_v43 }
 0x6f8   : > { %v2854_v55 = vsel %vm2150_vm4, %v2802_v2, %v2838_v57  ;;  %v3406_v62 = vpop.permute.xlu1 %3405  ;;  %vm8351_vm4 = vmmov %vm8348_vm9  ;;  %v8352_v57 = vld [vmem:[#allocation123_spill] sm:$0xff]  ;;  %vm8397_vm9 = vcmp.eq.s32.totalorder %v8258_v20, 4294967295 }
 0x6f9   : > { %v7228_v39 = vadd.f32 %v3030_v13, %v2854_v55  ;;  %v2980_v32 = vpop.permute.xlu0 %2979  ;;  %v3452_v8 = vadd.f32 %v3406_v62, %v3356_v24  ;;  %3505 = vrot.lane.b32.xlu1 %v3470_v9, %s4574_s24  ;;  %v3355_v13 = vmul.f32 0.000390625, %v3035_v3  ;;  %4443 = vlog2.f32 %v8352_v57  ;;  %v8361_v62 = vld [vmem:[#allocation81_spill] sm:$0xff]  ;;  %vm8399_vm14 = vmmov %vm8397_vm9 }
 0x6fa   : > { %v3015_v35 = vmul.f32 %v2980_v32, %v2647_v5  ;;  %4445 = vlog2.f32 %v8353_v25  ;;  %v8359_v32 = vld [vmem:[#allocation42_spill] sm:$0xff]  ;;  %v2849_v24 = vsel %vm2145_vm12, %v8356_v36, %v2833_v48 }
 0x6fb   : > { %v3468_v33 = vsub.f32 0.0, %v3452_v8  ;;  %4447 = vlog2.f32 %v8354_v1 }
 0x6fc   : > { %v3031_v34 = vadd.f32 %v3015_v35, %v2759_v14  ;;  %4449 = vlog2.f32 %v8355_v27  ;;  %v8360_v14 = vld [vmem:[#allocation148_spill] sm:$0xff] }
 0x6fd   : > { %v2804_v18 = vpop.permute.xlu0 %2803  ;;  %3501 = vrot.lane.b32.xlu1 %v3468_v33, %s4574_s24  ;;  %4451 = vlog2.f32 %v8358_v0  ;;  %v3041_v35 = vadd.f32 %v8360_v14, %v2849_v24  ;;  %v8363_v33 = vld [vmem:[#allocation85_spill] sm:$0xff] }
 0x6fe   : > { %v2839_v40 = vadd.f32 %v2804_v18, %v6788_v15 }
 0x700   : > { %v2855_v41 = vsel %vm8351_vm4, %v2804_v18, %v2839_v40  ;;  %v3361_v40 = vmul.f32 0.000390625, %v3041_v35  ;;  %v8367_v35 = vld [vmem:[#allocation99_spill] sm:$0xff] }
 0x701   : > { %v7241_v2 = vadd.f32 %v3031_v34, %v2855_v41  ;;  %v3404_v52 = vpop.permute.xlu0 %3403  ;;  %v8362_v34 = vld [vmem:[#allocation96_spill] sm:$0xff] }
 0x702   : > { %v3451_v30 = vadd.f32 %v3404_v52, %v3355_v13  ;;  %4453 = vlog2.f32 %v8362_v34  ;;  %v8364_v13 = vld [vmem:[#allocation103_spill] sm:$0xff] }
 0x703   : > { %v4444_v15 = vpop.eup %4443 }
 0x704   : > { %v3467_v11 = vsub.f32 0.0, %v3451_v30  ;;  %v1451_v5 = vmul.f32 0.6931472, %v4444_v15  ;;  %v4446_v4 = vpop.eup %4445 }
 0x705   : > { %v1453_v55 = vmul.f32 0.6931472, %v4446_v4  ;;  %v4448_v9 = vpop.eup %4447 }
 0x706   : > { %3499 = vrot.lane.b32.xlu0 %v3467_v11, %s4574_s24  ;;  %v1472_v51 = vadd.f32 %v1451_v5, %v8357_v31  ;;  %v1455_v8 = vmul.f32 0.6931472, %v4448_v9  ;;  %v4450_v3 = vpop.eup %4449  ;;  %v8365_v5 = vld [vmem:[#allocation90_spill] sm:$0xff] }
 0x707   : > { %v1473_v7 = vadd.f32 %v1453_v55, %v8361_v62  ;;  %v4452_v11 = vpop.eup %4451  ;;  %v1457_v57 = vmul.f32 0.6931472, %v4450_v3  ;;  %v7265_v55 = vpop.permute.xlu0 %2981 }
 0x708   : > { %v1644_v61 = vmul.f32 256.0, %v1472_v51  ;;  %v1692_v18 = vsub.f32 %v8363_v33, %v1472_v51  ;;  %v1474_v52 = vadd.f32 %v1455_v8, %v8364_v13  ;;  %v1459_v48 = vmul.f32 0.6931472, %v4452_v11  ;;  %v8368_v8 = vld [vmem:[#allocation105_spill] sm:$0xff] }
 0x709   : > { %v1645_v41 = vmul.f32 256.0, %v1473_v7  ;;  %v1693_v27 = vsub.f32 %v8365_v5, %v1473_v7 }
 0x70a   : > { %v1660_v43 = vsub.f32 %v7017_v60, %v1644_v61  ;;  %v1708_v15 = vmul.f32 0.8996094, %v1692_v18  ;;  %v1646_v31 = vmul.f32 256.0, %v1474_v52  ;;  %v8366_v60 = vld [vmem:[#allocation104_spill] sm:$0xff]  ;;  %v3359_v61 = vmul.f32 0.000390625, %v6965_v22 }
 0x70b   : > { %v1661_v36 = vsub.f32 %v7028_v50, %v1645_v41  ;;  %v1475_v0 = vadd.f32 %v1457_v57, %v8366_v60  ;;  %v1709_v24 = vmul.f32 0.8996094, %v1693_v27  ;;  %v1476_v62 = vadd.f32 %v1459_v48, %v8367_v35  ;;  %v7272_v22 = vpop.permute.xlu0 %2805 }
 0x70c   : > { %v1676_v1 = vmul.f32 0.000390625, %v1660_v43  ;;  %v4454_v51 = vpop.eup %4453  ;;  %v1662_v7 = vsub.f32 %v7042_v29, %v1646_v31  ;;  %v1694_v50 = vsub.f32 %v8368_v8, %v1474_v52  ;;  %v3362_v41 = vmul.f32 0.000390625, %v6997_v10  ;;  %v8370_v52 = vld [vmem:[#allocation107_spill] sm:$0xff] }
 0x70d   : > { %v1677_v14 = vmul.f32 0.000390625, %v1661_v36  ;;  %v1461_v3 = vmul.f32 0.6931472, %v4454_v51  ;;  %v1647_v43 = vmul.f32 256.0, %v1475_v0  ;;  %v1695_v5 = vsub.f32 %v8370_v52, %v1475_v0  ;;  %v8371_v31 = vld [vmem:[#allocation115_spill] sm:$0xff] }
 0x70e   : > { %v1724_v9 = vadd.f32 %v1708_v15, %v1676_v1  ;;  %v1678_v11 = vmul.f32 0.000390625, %v1662_v7  ;;  %v1710_v57 = vmul.f32 0.8996094, %v1694_v50  ;;  %v8369_v1 = vld [vmem:[#allocation98_spill] sm:$0xff]  ;;  %v1696_v60 = vsub.f32 %v8371_v31, %v1476_v62 }
 0x70f   : > { %v1725_v13 = vadd.f32 %v1709_v24, %v1677_v14  ;;  %v1477_v15 = vadd.f32 %v1461_v3, %v8369_v1  ;;  %v1663_v29 = vsub.f32 %v7069_v19, %v1647_v43  ;;  %v3360_v36 = vmul.f32 0.000390625, %v6976_v49  ;;  %v2984_v0 = vpop.permute.xlu0 %2983  ;;  %v8372_v3 = vld [vmem:[#allocation108_spill] sm:$0xff] }
 0x710   : > { %v1740_v18 = vsub.f32 0.0, %v1724_v9  ;;  %v1726_v51 = vadd.f32 %v1710_v57, %v1678_v11  ;;  %v1711_v14 = vmul.f32 0.8996094, %v1695_v5  ;;  %v1712_v50 = vmul.f32 0.8996094, %v1696_v60 }
 0x711   : > { %v1741_v10 = vsub.f32 0.0, %v1725_v13  ;;  %v1649_v24 = vmul.f32 256.0, %v1477_v15  ;;  %v1697_v43 = vsub.f32 %v8372_v3, %v1477_v15  ;;  %v3366_v5 = vmul.f32 0.000390625, %v7228_v39  ;;  %v8380_v3 = vld [vmem:[#allocation41_spill] sm:$0xff] }
 0x712   : > { %v1742_v49 = vsub.f32 0.0, %v1726_v51  ;;  %v3364_v60 = vmul.f32 0.000390625, %v7169_v44  ;;  %v8375_v51 = vld [vmem:[#allocation56_spill] sm:$0xff]  ;;  %v4577_v44 = vmov 1   ;;  %vm8381_vm0 = vcmp.eq.s32.totalorder %v8380_v3, 255 }
 0x713   : > { %vm8376_vm10 = vcmp.eq.s32.totalorder %v8375_v51, 255  ;;  %4193 = vset.pattern.permute.xlu0 %v4577_v44  ;;  %4194 = vset.pattern.permute.xlu1 %v4577_v44  ;;  %vm8384_vm8 = vmmov %vm8381_vm0 }
 0x714   : > { %vm8382_vm12 = vmmov %vm8376_vm10 }
 0x724   : > { %v3416_v30 = vpop.permute.xlu1 %3415 }
 0x725   : > { %v3457_v25 = vadd.f32 %v3416_v30, %v3361_v40  ;;  %v1648_v30 = vmul.f32 256.0, %v1476_v62 }
 0x727   : > { %v3473_v4 = vsub.f32 0.0, %v3457_v25  ;;  %v1664_v48 = vsub.f32 %v7081_v58, %v1648_v30  ;;  %v1713_v30 = vmul.f32 0.8996094, %v1697_v43 }
 0x729   : > { %3511 = vrot.lane.b32.xlu1 %v3473_v4, %s4574_s24  ;;  %v1680_v8 = vmul.f32 0.000390625, %v1664_v48  ;;  %v8373_v48 = vld [vmem:[#allocation161_spill] sm:$0xff] }
 0x72a   : > { %v2649_v31 = vsub.f32 256.0, %v8373_v48  ;;  %v4578_v48 = vmov 1.0  }
 0x72c   : > { %v3412_v34 = vpop.permute.xlu1 %3411 }
 0x72d   : > { %v3455_v33 = vadd.f32 %v3412_v34, %v3359_v61  ;;  %v1679_v61 = vmul.f32 0.000390625, %v1663_v29  ;;  %v1665_v34 = vsub.f32 %v7177_v54, %v1649_v24  ;;  %v3363_v54 = vmul.f32 0.000390625, %v7136_v47  ;;  %v8374_v47 = vld [vmem:[#allocation102_spill] sm:$0xff] }
 0x72e   : > { %v2745_v39 = vsel %vm8376_vm10, 0.0, %v8374_v47  ;;  %v8387_v47 = vld [vmem:[#allocation147_spill] sm:$0xff] }
 0x72f   : > { %v3471_v40 = vsub.f32 0.0, %v3455_v33  ;;  %v1727_v62 = vadd.f32 %v1711_v14, %v1679_v61  ;;  %v3365_v33 = vmul.f32 0.000390625, %v7201_v26  ;;  %v8377_v14 = vsub.f32 %v7081_v58, %v7096_v38 }
 0x730   : > { %v3418_v25 = vpop.permute.xlu1 %3417 }
 0x731   : > { %v3458_v27 = vadd.f32 %v3418_v25, %v3362_v41  ;;  %3507 = vrot.lane.b32.xlu0 %v3471_v40, %s4574_s24  ;;  %v1728_v40 = vadd.f32 %v1712_v50, %v1680_v8  ;;  %v2808_v41 = vpop.permute.xlu0 %2807  ;;  %v1743_v11 = vsub.f32 0.0, %v1727_v62  ;;  %v8378_v8 = vld [vmem:[#allocation143_spill] sm:$0xff]  ;;  %v8383_v62 = vsub.f32 %v7069_v19, %v7075_v28 }
 0x732   : > { %v2841_v61 = vadd.f32 %v2808_v41, %v6782_v6  ;;  %v2648_v50 = vsub.f32 256.0, %v8378_v8  ;;  %v3367_v19 = vmul.f32 0.000390625, %v7241_v2 }
 0x733   : > { %v3474_v4 = vsub.f32 0.0, %v3458_v27  ;;  %v1744_v29 = vsub.f32 0.0, %v1728_v40 }
 0x734   : > { %v3414_v9 = vpop.permute.xlu1 %3413  ;;  %v2857_v6 = vsel %vm8382_vm12, %v2808_v41, %v2841_v61  ;;  %v3016_v40 = vmul.f32 %v7265_v55, %v2648_v50 }
 0x735   : > { %v3456_v35 = vadd.f32 %v3414_v9, %v3360_v36  ;;  %3513 = vrot.lane.b32.xlu1 %v3474_v4, %s4574_s24  ;;  %1782 = vrot.lane.b32.xlu0 %v1740_v18, %s4574_s24  ;;  %v1681_v18 = vmul.f32 0.000390625, %v1665_v34  ;;  %v3426_v1 = vpop.permute.xlu0 %3425  ;;  %v8379_v34 = vld [vmem:[#allocation122_spill] sm:$0xff] }
 0x736   : > { %v3462_v26 = vadd.f32 %v3426_v1, %v3366_v5  ;;  %v2744_v43 = vsel %vm8381_vm0, 0.0, %v8379_v34  ;;  %v8392_v34 = vld [vmem:[#allocation169_spill] sm:$0xff]  ;;  %vm8404_vm0 = vcmp.eq.s32.totalorder %v8359_v32, 4294967295 }
 0x737   : > { %v3472_v7 = vsub.f32 0.0, %v3456_v35  ;;  %v1729_v52 = vadd.f32 %v1713_v30, %v1681_v18  ;;  %v2761_v35 = vsub.f32 %v8377_v14, %v2745_v39  ;;  %v1811_v39 = vsel %vm8388_vm2, 0.0, %v8387_v47  ;;  %v8389_v14 = vld [vmem:[#allocation165_spill] sm:$0xff]  ;;  %vm8405_vm12 = vmmov %vm8404_vm0  ;;  %v8406_v47 = vld [vmem:[#allocation46_spill] sm:$0xff] }
 0x738   : > { %v3478_v9 = vsub.f32 0.0, %v3462_v26  ;;  %v3581_v44 = vsel %vm3579_vm7, %v1811_v39, 0.0  ;;  %vm8410_vm2 = vcmp.eq.s32.totalorder %v8311_v59, 4294967295 }
 0x739   : > { %3509 = vrot.lane.b32.xlu1 %v3472_v7, %s4574_s24  ;;  %1784 = vrot.lane.b32.xlu0 %v1741_v10, %s4574_s24  ;;  %v1745_v10 = vsub.f32 0.0, %v1729_v52  ;;  %v3017_v7 = vmul.f32 %v2984_v0, %v2649_v31  ;;  %v2840_v0 = vadd.f32 %v7272_v22, %v6812_v17 }
 0x73b   : > { %v3033_v58 = vadd.f32 %v3017_v7, %v2761_v35  ;;  %v2856_v41 = vsel %vm8384_vm8, %v7272_v22, %v2840_v0  ;;  %v3565_v7 = vsel %vm8391_vm11, 0.0, %v4578_v48  ;;  %vm8407_vm8 = vcmp.eq.s32.totalorder %v8406_v47, 4294967295 }
 0x73c   : > { %v3424_v13 = vpop.permute.xlu1 %3423  ;;  %vm8411_vm11 = vcmp.eq.s32.totalorder %v8315_v21, 4294967295 }
 0x73d   : > { %v3461_v57 = vadd.f32 %v3424_v13, %v3365_v33  ;;  %1786 = vrot.lane.b32.xlu0 %v1742_v49, %s4574_s24  ;;  %v2760_v33 = vsub.f32 %v8383_v62, %v2744_v43  ;;  %v3049_v13 = vadd.f32 %v3033_v58, %v2857_v6  ;;  %v1812_v43 = vsel %vm8393_vm15, 0.0, %v8392_v34 }
 0x73e   : > { %v3566_v58 = vsel %vm8394_vm13, 0.0, %v4578_v48  ;;  %vm8412_vm15 = vcmp.eq.s32.totalorder %v8319_v37, 4294967295 }
 0x73f   : > { %v3477_v25 = vsub.f32 0.0, %v3461_v57  ;;  %v3369_v57 = vmul.f32 0.000390625, %v3049_v13  ;;  %v8395_v13 = vld [vmem:[#allocation181_spill] sm:$0xff] }
 0x740   : > { %v3420_v15 = vpop.permute.xlu1 %3419 }
 0x741   : > { %v3459_v27 = vadd.f32 %v3420_v15, %v3363_v54  ;;  %3519 = vrot.lane.b32.xlu1 %v3477_v25, %s4574_s24  ;;  %1788 = vrot.lane.b32.xlu0 %v1743_v11, %s4574_s24  ;;  %v3032_v11 = vadd.f32 %v3016_v40, %v2760_v33  ;;  %v3583_v33 = vsel %vm3579_vm7, %v1812_v43, 0.0  ;;  %v3659_v40 = vsel %vm3579_vm7, %v3566_v58, 0.0 }
 0x743   : > { %v3475_v4 = vsub.f32 0.0, %v3459_v27  ;;  %v3048_v54 = vadd.f32 %v3032_v11, %v2856_v41  ;;  %v3567_v41 = vsel %vm8397_vm9, 0.0, %v4578_v48  ;;  %vm8415_vm9 = vmmov %vm8410_vm2 }
 0x744   : > { %v3422_v36 = vpop.permute.xlu1 %3421 }
 0x745   : > { %3515 = vrot.lane.b32.xlu1 %v3475_v4, %s4574_s24  ;;  %1790 = vrot.lane.b32.xlu0 %v1744_v29, %s4574_s24  ;;  %v3460_v24 = vadd.f32 %v3422_v36, %v3364_v60  ;;  %v3368_v29 = vmul.f32 0.000390625, %v3048_v54  ;;  %v3564_v60 = vsel %vm8386_vm3, 0.0, %v4578_v48  ;;  %v3661_v54 = vsel %vm3579_vm7, %v3567_v41, 0.0  ;;  %vm8409_vm3 = vmmov %vm8407_vm8 }
 0x746   : > { %v3655_v61 = vsel %vm3579_vm7, %v3564_v60, 0.0 }
 0x747   : > { %v3476_v49 = vsub.f32 0.0, %v3460_v24 }
 0x748   : > { %v2810_v38 = vpop.permute.xlu1 %2809 }
 0x749   : > { %1792 = vrot.lane.b32.xlu0 %v1745_v10, %s4574_s24  ;;  %3521 = vrot.lane.b32.xlu1 %v3478_v9, %s4574_s24  ;;  %v2842_v18 = vadd.f32 %v2810_v38, %v6803_v63 }
 0x74b   : > { %v2858_v25 = vsel %vm2154_vm5, %v2810_v38, %v2842_v18  ;;  %vm8385_vm5 = vcmp.eq.s32.totalorder %v8340_v12, 4294967295  ;;  %v1813_v18 = vsel %vm8396_vm6, 0.0, %v8395_v13  ;;  %vm8414_vm6 = vcmp.eq.s32.totalorder %v8332_v53, 4294967295 }
 0x74c   : > { %v3430_v1 = vpop.permute.xlu1 %3429  ;;  %v3050_v55 = vadd.f32 %v7216_v45, %v2858_v25  ;;  %v3563_v31 = vsel %vm8385_vm5, 0.0, %v4578_v48  ;;  %vm8390_vm1 = vmmov %vm8385_vm5  ;;  %v3585_v25 = vsel %vm3579_vm7, %v1813_v18, 0.0  ;;  %vm8408_vm5 = vcmp.eq.s32.totalorder %v8298_v16, 4294967295 }
 0x74d   : > { %3517 = vrot.lane.b32.xlu1 %v3476_v49, %s4574_s24  ;;  %v3464_v52 = vadd.f32 %v3430_v1, %v3368_v29  ;;  %v3654_v24 = vsel %vm3579_vm7, %v3563_v31, 0.0  ;;  %v1810_v35 = vsel %vm8390_vm1, 0.0, %v8389_v14  ;;  %v3657_v49 = vsel %vm3579_vm7, %v3565_v7, 0.0  ;;  %vm8413_vm13 = vmmov %vm8408_vm5 }
 0x74e   : > { %v3370_v22 = vmul.f32 0.000390625, %v3050_v55  ;;  %v3656_v8 = vadd.f32 %v3655_v61, %v3654_v24  ;;  %v3580_v50 = vsel %vm3579_vm7, %v1810_v35, 0.0  ;;  %v8400_v55 = vld [vmem:[#allocation38_spill] sm:$0xff]  ;;  %v3569_v31 = vsel %vm8405_vm12, 0.0, %v4578_v48 }
 0x74f   : > { %v3480_v26 = vsub.f32 0.0, %v3464_v52  ;;  %v3582_v6 = vadd.f32 %v3581_v44, %v3580_v50  ;;  %vm8401_vm4 = vcmp.eq.s32.totalorder %v8400_v55, 4294967295  ;;  %v3665_v7 = vsel %vm3579_vm7, %v3569_v31, 0.0 }
 0x750   : > { %v3428_v30 = vpop.permute.xlu0 %3427  ;;  %v3434_v27 = vpop.permute.xlu1 %3433  ;;  %v3658_v62 = vadd.f32 %v3657_v49, %v3656_v8  ;;  %vm8403_vm10 = vmmov %vm8401_vm4  ;;  %v3570_v8 = vsel %vm8409_vm3, 0.0, %v4578_v48  ;;  %v3571_v13 = vsel %vm8413_vm13, 0.0, %v4578_v48  ;;  %vm8420_vm12 = vcmp.eq.s32.totalorder %v8323_v42, 4294967295 }
 0x751   : > { %v3463_v15 = vadd.f32 %v3428_v30, %v3367_v19  ;;  %v3466_v4 = vadd.f32 %v3434_v27, %v3370_v22  ;;  %v3584_v30 = vadd.f32 %v3583_v33, %v3582_v6  ;;  %v8402_v27 = vld [vmem:[#allocation157_spill] sm:$0xff]  ;;  %vm8423_vm3 = vcmp.eq.s32.totalorder %v8375_v51, 4294967295 }
 0x753   : > { %v3479_v5 = vsub.f32 0.0, %v3463_v15  ;;  %v3482_v2 = vsub.f32 0.0, %v3466_v4  ;;  %v3586_v19 = vadd.f32 %v3585_v25, %v3584_v30  ;;  %v3568_v15 = vsel %vm8401_vm4, 0.0, %v4578_v48 }
 0x754   : > { %v3432_v17 = vpop.permute.xlu0 %3431  ;;  %vm8417_vm4 = vcmp.eq.s32.totalorder %v8347_v46, 4294967295 }
 0x755   : > { %v3465_v28 = vadd.f32 %v3432_v17, %v3369_v57  ;;  %v3660_v57 = vadd.f32 %v3659_v40, %v3658_v62  ;;  %v3667_v62 = vsel %vm3579_vm7, %v3570_v8, 0.0 }
 0x757   : > { %v3481_v63 = vsub.f32 0.0, %v3465_v28  ;;  %v8398_v28 = vld [vmem:[#allocation150_spill] sm:$0xff]  ;;  %v3662_v29 = vadd.f32 %v3661_v54, %v3660_v57  ;;  %v3669_v54 = vsel %vm3579_vm7, %v3571_v13, 0.0 }
 0x758   : > { %v1775_v36 = vpop.permute.xlu0 %1774  ;;  %v1814_v1 = vsel %vm8399_vm14, 0.0, %v8398_v28  ;;  %vm8416_vm14 = vcmp.eq.s32.totalorder %v8308_v23, 4294967295 }
 0x759   : > { %3527 = vrot.lane.b32.xlu1 %v3481_v63, %s4574_s24  ;;  %v3587_v52 = vsel %vm3579_vm7, %v1814_v1, 0.0 }
 0x75a   : > { %v3588_v4 = vadd.f32 %v3587_v52, %v3586_v19 }
 0x75c   : > { %v1777_v45 = vpop.permute.xlu0 %1776 }
 0x75d   : > { %3523 = vrot.lane.b32.xlu1 %v3479_v5, %s4574_s24  ;;  %v3663_v5 = vsel %vm3579_vm7, %v3568_v15, 0.0  ;;  %v1817_v39 = vsel %vm8407_vm8, 0.0, %v1777_v45  ;;  %vm8421_vm8 = vcmp.eq.s32.totalorder %v8258_v20, 4294967295 }
 0x75e   : > { %v3664_v24 = vadd.f32 %v3663_v5, %v3662_v29  ;;  %v3593_v50 = vsel %vm3579_vm7, %v1817_v39, 0.0 }
 0x760   : > { %v1779_v10 = vpop.permute.xlu0 %1778  ;;  %v3666_v6 = vadd.f32 %v3665_v7, %v3664_v24 }
 0x761   : > { %3525 = vrot.lane.b32.xlu1 %v3480_v26, %s4574_s24  ;;  %v1815_v26 = vsel %vm8403_vm10, 0.0, %v8402_v27  ;;  %vm8418_vm10 = vcmp.eq.s32.totalorder %v8380_v3, 4294967295 }
 0x762   : > { %v3589_v61 = vsel %vm3579_vm7, %v1815_v26, 0.0  ;;  %v3668_v57 = vadd.f32 %v3667_v62, %v3666_v6  ;;  %vm8428_vm13 = vmmov %vm8418_vm10 }
 0x763   : > { %v3590_v44 = vadd.f32 %v3589_v61, %v3588_v4 }
 0x764   : > { %v1781_v9 = vpop.permute.xlu0 %1780  ;;  %v3670_v4 = vadd.f32 %v3669_v54, %v3668_v57 }
 0x765   : > { %3529 = vrot.lane.b32.xlu1 %v3482_v2, %s4574_s24  ;;  %v1816_v2 = vsel %vm8404_vm0, 0.0, %v1775_v36  ;;  %v1818_v36 = vsel %vm8408_vm5, 0.0, %v1779_v10  ;;  %v1819_v34 = vsel %vm8410_vm2, 0.0, %v1781_v9  ;;  %vm8419_vm0 = vmmov %vm8412_vm15  ;;  %vm8422_vm5 = vcmp.eq.s32.totalorder %v8400_v55, 4294967295 }
 0x766   : > { %v3591_v14 = vsel %vm3579_vm7, %v1816_v2, 0.0  ;;  %v3595_v58 = vsel %vm3579_vm7, %v1818_v36, 0.0  ;;  %v3597_v9 = vsel %vm3579_vm7, %v1819_v34, 0.0  ;;  %v3573_v23 = vsel %vm8419_vm0, 0.0, %v4578_v48  ;;  %vm8424_vm2 = vmmov %vm8414_vm6 }
 0x767   : > { %v3592_v49 = vadd.f32 %v3591_v14, %v3590_v44  ;;  %v3574_v55 = vsel %vm8424_vm2, 0.0, %v4578_v48 }
 0x768   : > { %v3504_v38 = vpop.permute.xlu0 %3503 }
 0x769   : > { %v3594_v10 = vadd.f32 %v3593_v50, %v3592_v49  ;;  %v3549_v28 = vsel %vm8416_vm14, 0.0, %v3504_v38  ;;  %vm8431_vm14 = vcmp.eq.s32.totalorder %v8311_v59, 4294967295 }
 0x76a   : > { %v3620_v2 = vsel %vm3579_vm7, %v3549_v28, 0.0 }
 0x76b   : > { %v7357_v0 = vpop.permute.xlu1 %3505  ;;  %v3596_v41 = vadd.f32 %v3595_v58, %v3594_v10 }
 0x76d   : > { %v3598_v19 = vadd.f32 %v3597_v9, %v3596_v41  ;;  %v3675_v9 = vsel %vm3579_vm7, %v3574_v55, 0.0 }
 0x76f   : > { %v3502_v17 = vpop.permute.xlu1 %3501 }
 0x770   : > { %v3548_v33 = vsel %vm8411_vm11, 0.0, %v3502_v17  ;;  %v3572_v17 = vsel %vm8415_vm9, 0.0, %v4578_v48  ;;  %vm8426_vm11 = vcmp.eq.s32.totalorder %v8359_v32, 4294967295  ;;  %vm8430_vm9 = vcmp.eq.s32.totalorder %v8298_v16, 4294967295 }
 0x771   : > { %v3618_v21 = vsel %vm3579_vm7, %v3548_v33, 0.0  ;;  %v3671_v38 = vsel %vm3579_vm7, %v3572_v17, 0.0  ;;  %v3576_v17 = vsel %vm8428_vm13, 0.0, %v4578_v48 }
 0x778   : > { %v3500_v11 = vpop.permute.xlu0 %3499 }
 0x779   : > { %v3547_v43 = vsel %vm8390_vm1, 0.0, %v3500_v11  ;;  %vm8425_vm1 = vcmp.eq.s32.totalorder %v8328_v56, 4294967295  ;;  %v8440_v56 = vlaneseq }
 0x77a   : > { %v3617_v12 = vsel %vm3579_vm7, %v3547_v43, 0.0 }
 0x77b   : > { %v3619_v1 = vadd.f32 %v3618_v21, %v3617_v12 }
 0x77d   : > { %v3621_v39 = vadd.f32 %v3620_v2, %v3619_v1 }
 0x79b   : > { %v7376_v22 = vpop.permute.xlu1 %3511 }
 0x79c   : > { %v3553_v12 = vsel %vm8426_vm11, 0.0, %v7376_v22 }
 0x79d   : > { %v3628_v21 = vsel %vm3579_vm7, %v3553_v12, 0.0 }
 0x7a3   : > { %v3508_v63 = vpop.permute.xlu0 %3507 }
 0x7a4   : > { %v3551_v24 = vsel %vm8421_vm8, 0.0, %v3508_v63  ;;  %v3673_v63 = vsel %vm3579_vm7, %v3573_v23, 0.0 }
 0x7a7   : > { %v1783_v60 = vpop.permute.xlu0 %1782  ;;  %v7391_v35 = vpop.permute.xlu1 %3513 }
 0x7a8   : > { %v1820_v40 = vsel %vm8412_vm15, 0.0, %v1783_v60  ;;  %v3550_v60 = vsel %vm8420_vm12, 0.0, %v7357_v0  ;;  %v3624_v0 = vsel %vm3579_vm7, %v3551_v24, 0.0  ;;  %vm8427_vm15 = vmmov %vm8417_vm4 }
 0x7a9   : > { %v3599_v25 = vsel %vm3579_vm7, %v1820_v40, 0.0  ;;  %v3622_v42 = vsel %vm3579_vm7, %v3550_v60, 0.0  ;;  %v3575_v41 = vsel %vm8427_vm15, 0.0, %v4578_v48  ;;  %vm8435_vm12 = vmmov %vm8424_vm2 }
 0x7aa   : > { %v3600_v27 = vadd.f32 %v3599_v25, %v3598_v19  ;;  %v3623_v49 = vadd.f32 %v3622_v42, %v3621_v39  ;;  %v3677_v54 = vsel %vm3579_vm7, %v3575_v41, 0.0  ;;  %vm8436_vm8 = vmmov %vm8427_vm15 }
 0x7ab   : > { %v1785_v45 = vpop.permute.xlu0 %1784  ;;  %v3510_v18 = vpop.permute.xlu1 %3509 }
 0x7ac   : > { %v1821_v11 = vsel %vm8414_vm6, 0.0, %v1785_v45  ;;  %v3552_v36 = vsel %vm8422_vm5, 0.0, %v3510_v18  ;;  %v3672_v45 = vadd.f32 %v3671_v38, %v3670_v4  ;;  %v3625_v62 = vadd.f32 %v3624_v0, %v3623_v49  ;;  %vm8437_vm5 = vmmov %vm8423_vm3 }
 0x7ad   : > { %v3601_v29 = vsel %vm3579_vm7, %v1821_v11, 0.0  ;;  %v3626_v43 = vsel %vm3579_vm7, %v3552_v36, 0.0  ;;  %vm8429_vm6 = vcmp.eq.s32.totalorder %v8406_v47, 4294967295 }
 0x7ae   : > { %v3602_v61 = vadd.f32 %v3601_v29, %v3600_v27  ;;  %v3674_v40 = vadd.f32 %v3673_v63, %v3672_v45  ;;  %v3627_v18 = vadd.f32 %v3626_v43, %v3625_v62  ;;  %v3554_v32 = vsel %vm8429_vm6, 0.0, %v7391_v35 }
 0x7af   : > { %v1787_v30 = vpop.permute.xlu0 %1786 }
 0x7b0   : > { %v1822_v15 = vsel %vm8417_vm4, 0.0, %v1787_v30  ;;  %v3676_v57 = vadd.f32 %v3675_v9, %v3674_v40  ;;  %v3629_v22 = vadd.f32 %v3628_v21, %v3627_v18  ;;  %vm8432_vm4 = vmmov %vm8423_vm3  ;;  %v8441_v21 = vld [vmem:[#allocation61_spill] sm:$0xff] }
 0x7b1   : > { %v3603_v31 = vsel %vm3579_vm7, %v1822_v15, 0.0  ;;  %v3577_v47 = vsel %vm8432_vm4, 0.0, %v4578_v48  ;;  %vm3694_vm11 = vcmp.eq.s32.totalorder %v8441_v21, 0  ;;  %vm3710_vm15 = vcmp.eq.s32.totalorder %v8441_v21, 2 }
 0x7b2   : > { %v3604_v8 = vadd.f32 %v3603_v31, %v3602_v61  ;;  %v3678_v29 = vadd.f32 %v3677_v54, %v3676_v57  ;;  %v3681_v59 = vsel %vm3579_vm7, %v3577_v47, 0.0  ;;  %v3692_v57 = vshrl.u32 %v8440_v56, 7 }
 0x7b3   : > { %v7428_v52 = vpop.permute.xlu1 %3519  ;;  %v1789_v5 = vpop.permute.xlu0 %1788 }
 0x7b4   : > { %v1823_v26 = vsel %vm8418_vm10, 0.0, %v1789_v5  ;;  %v3630_v5 = vsel %vm3579_vm7, %v3554_v32, 0.0  ;;  %vm8433_vm10 = vmmov %vm8419_vm0 }
 0x7b5   : > { %v3605_v14 = vsel %vm3579_vm7, %v1823_v26, 0.0  ;;  %v3679_v26 = vsel %vm3579_vm7, %v3576_v17, 0.0  ;;  %v3631_v4 = vadd.f32 %v3630_v5, %v3629_v22  ;;  %v3557_v38 = vsel %vm8433_vm10, 0.0, %v7428_v52  ;;  %vm8434_vm0 = vmmov %vm8425_vm1 }
 0x7b6   : > { %v3606_v34 = vadd.f32 %v3605_v14, %v3604_v8  ;;  %v3680_v23 = vadd.f32 %v3679_v26, %v3678_v29  ;;  %v3578_v24 = vsel %vm8434_vm0, 0.0, %v4578_v48  ;;  %vm8439_vm2 = vmmov %vm8434_vm0 }
 0x7b7   : > { %v3516_v7 = vpop.permute.xlu1 %3515  ;;  %v1791_v44 = vpop.permute.xlu0 %1790 }
 0x7b8   : > { %v1824_v50 = vsel %vm8423_vm3, 0.0, %v1791_v44  ;;  %v3555_v19 = vsel %vm8430_vm9, 0.0, %v3516_v7  ;;  %v3682_v14 = vadd.f32 %v3681_v59, %v3680_v23  ;;  %v3636_v7 = vsel %vm3579_vm7, %v3557_v38, 0.0  ;;  %vm8438_vm3 = vmmov %vm8428_vm13 }
 0x7b9   : > { %v3607_v20 = vsel %vm3579_vm7, %v1824_v50, 0.0  ;;  %v3632_v27 = vsel %vm3579_vm7, %v3555_v19, 0.0  ;;  %v3683_v44 = vsel %vm3579_vm7, %v3578_v24, 0.0 }
 0x7ba   : > { %v3608_v10 = vadd.f32 %v3607_v20, %v3606_v34  ;;  %v3633_v35 = vadd.f32 %v3632_v27, %v3631_v4  ;;  %v3684_v52 = vadd.f32 %v3683_v44, %v3682_v14 }
 0x7bb   : > { %v3522_v6 = vpop.permute.xlu1 %3521  ;;  %v1793_v58 = vpop.permute.xlu0 %1792 }
 0x7bc   : > { %v1825_v33 = vsel %vm8425_vm1, 0.0, %v1793_v58  ;;  %v3558_v36 = vsel %vm8435_vm12, 0.0, %v3522_v6  ;;  %v3685_v49 = vrot.slane %v3684_v52, 4  ;;  %vm3693_vm1 = vcmp.eq.s32.totalorder %v3692_v57, 0 }
 0x7bd   : > { %v3609_v13 = vsel %vm3579_vm7, %v1825_v33, 0.0  ;;  %v3638_v45 = vsel %vm3579_vm7, %v3558_v36, 0.0  ;;  %vm3695_vm13 = vmand %vm3693_vm1, %vm3694_vm11 }
 0x7be   : > { %v3610_v30 = vadd.f32 %v3609_v13, %v3608_v10  ;;  %v3686_v62 = vadd.f32 %v3685_v49, %v3684_v52  ;;  %vm3711_vm9 = vmand %vm3693_vm1, %vm3710_vm15 }
 0x7bf   : > { %v3518_v25 = vpop.permute.xlu1 %3517 }
 0x7c0   : > { %v3611_v11 = vrot.slane %v3610_v30, 4  ;;  %v3556_v15 = vsel %vm8431_vm14, 0.0, %v3518_v25  ;;  %v3687_v40 = vrot.slane %v3686_v62, 2 }
 0x7c1   : > { %v3634_v16 = vsel %vm3579_vm7, %v3556_v15, 0.0 }
 0x7c2   : > { %v3612_v28 = vadd.f32 %v3611_v11, %v3610_v30  ;;  %v3635_v60 = vadd.f32 %v3634_v16, %v3633_v35  ;;  %v3688_v9 = vadd.f32 %v3687_v40, %v3686_v62 }
 0x7c4   : > { %v3613_v1 = vrot.slane %v3612_v28, 2  ;;  %v3637_v8 = vadd.f32 %v3636_v7, %v3635_v60  ;;  %v3689_v30 = vrot.slane %v3688_v9, 1 }
 0x7c6   : > { %v3614_v2 = vadd.f32 %v3613_v1, %v3612_v28  ;;  %v3639_v42 = vadd.f32 %v3638_v45, %v3637_v8  ;;  %v3690_v11 = vadd.f32 %v3689_v30, %v3688_v9 }
 0x7c8   : > { %v3615_v31 = vrot.slane %v3614_v2, 1 }
 0x7ca   : > { %v3616_v39 = vadd.f32 %v3615_v31, %v3614_v2 }
 0x7cb   : > { %v3528_v61 = vpop.permute.xlu1 %3527 }
 0x7cc   : > { %3698 = vperm.xlu0 %4193, %v3616_v39   ;;  %v3561_v20 = vsel %vm8437_vm5, 0.0, %v3528_v61 }
 0x7cd   : > { %v3644_v46 = vsel %vm3579_vm7, %v3561_v20, 0.0 }
 0x7cf   : > { %v3524_v50 = vpop.permute.xlu1 %3523 }
 0x7d0   : > { %v3559_v37 = vsel %vm8436_vm8, 0.0, %v3524_v50 }
 0x7d1   : > { %v3640_v48 = vsel %vm3579_vm7, %v3559_v37, 0.0 }
 0x7d2   : > { %v3641_v63 = vadd.f32 %v3640_v48, %v3639_v42 }
 0x7d3   : > { %v3526_v0 = vpop.permute.xlu1 %3525 }
 0x7d4   : > { %v3560_v53 = vsel %vm8438_vm3, 0.0, %v3526_v0 }
 0x7d5   : > { %v3642_v34 = vsel %vm3579_vm7, %v3560_v53, 0.0 }
 0x7d6   : > { %v3643_v55 = vadd.f32 %v3642_v34, %v3641_v63 }
 0x7d7   : > { %v3530_v43 = vpop.permute.xlu1 %3529 }
 0x7d8   : > { %v3562_v6 = vsel %vm8439_vm2, 0.0, %v3530_v43  ;;  %v3645_v58 = vadd.f32 %v3644_v46, %v3643_v55 }
 0x7d9   : > { %v3646_v10 = vsel %vm3579_vm7, %v3562_v6, 0.0  ;;  %vm3702_vm7 = vcmp.eq.s32.totalorder %v8441_v21, 1 }
 0x7da   : > { %v3647_v51 = vadd.f32 %v3646_v10, %v3645_v58  ;;  %vm3703_vm6 = vmand %vm3693_vm1, %vm3702_vm7 }
 0x7dc   : > { %v3648_v33 = vrot.slane %v3647_v51, 4 }
 0x7de   : > { %v3649_v13 = vadd.f32 %v3648_v33, %v3647_v51 }
 0x7e0   : > { %v3650_v3 = vrot.slane %v3649_v13, 2 }
 0x7e2   : > { %v3651_v12 = vadd.f32 %v3650_v3, %v3649_v13 }
 0x7e4   : > { %v3652_v18 = vrot.slane %v3651_v12, 1 }
 0x7e6   : > { %v3653_v41 = vadd.f32 %v3652_v18, %v3651_v12 }
 0x7e8   : > { %3706 = vperm.xlu1 %4194, %v3653_v41  }
 0x7ec   : > { %3714 = vperm.xlu1 %4194, %v3690_v11  }
 0x84b   : > { %v3699_v25 = vpop.permute.xlu0 %3698 }
 0x84c   : > { %v3701_v54 = vsel %vm3695_vm13, %v3699_v25, 0.0 }
 0x867   : > { %v3707_v17 = vpop.permute.xlu1 %3706 }
 0x868   : > { %v3709_v32 = vsel %vm3703_vm6, %v3707_v17, %v3701_v54 }
 0x86b   : > { %v3715_v22 = vpop.permute.xlu1 %3714 }
 0x86c   : > { %v3717_v19 = vsel %vm3711_vm9, %v3715_v22, %v3709_v32 }
 0x86d   : > { %3718 = vst [vmem:[%s413_s9] sm:$0xff] %v3717_v19 }
 0x86e PF: > { %s3900_s21 = sshll.u32 %s4554_s13, 7  ;;  %s3733_s23 = sshll.u32 %s413_s9, 4  ;;  %s3734_s23 = int_to_ptr.vmem [resolvable:$true] %s3733_s23 }
 0x86f   : > { %s7519_s17 = scalar_lea.hbm %s7584_s8, %s3900_s21  ;;  %s8442_s10 = sand.u32 1, %s4534_s30  }
 0x870   : > { %s3720_s19 = scalar_lea.sflag [#allocation9], %s8442_s10  ;;  %s4456_s11 = scalar_lea.vmem %s3734_s23, 128 }
 0x871   : > { %p4457_p7 = scmp.ne.s32.totalorder %s3734_s23, %s4456_s11  ;;  %s4579_s14 = smov [#allocation8]  }
 0x872   : > { %s4460_s7 = sshll.u32 %s4579_s14, 4  ;;  %s4461_s7 = int_to_ptr.vmem [resolvable:$false] %s4460_s7 }
 0x873   : > { %p4458_p8 = pnand %p4457_p7, %p4707_p10  ;;  %s4462_s4 = scalar_lea.vmem %s4461_s7, 256 }
 0x874   : > { %p4463_p11 = scmp.lt.s32.totalorder %s3734_s23, %s4461_s7  ;;  %p4464_p13 = scmp.lt.s32.totalorder %s4462_s4, %s4456_s11 }
 0x875   : > { %p4459_p9 = pneg %p4458_p8 }
 0x876   : > { %p4465_p0 = por %p4464_p13, %p4463_p11 }
 0x878   : > { %p4466_p1 = pnand %p4465_p0, %p4459_p9 }
 0x87a   : > { %4469 = shalt.err (!%p4466_p1)
}
 0x87b   : > { %s4470_s9 = scalar_lea.hbm %s7519_s17, 128  ;;  %s4474_s18 = scalar_lea.hbm %s7584_s8, 256 }
 0x87c   : > { %p4471_p2 = scmp.ne.s32.totalorder %s7519_s17, %s4470_s9  ;;  %p4475_p5 = scmp.lt.u32.totalorder %s7519_s17, %s7584_s8 }
 0x87d   : > { %p4476_p6 = scmp.lt.u32.totalorder %s4474_s18, %s4470_s9  ;;  %p4478_p8 = scmp.lt.u32.totalorder %s4470_s9, %s7519_s17 }
 0x87e   : > { %p4472_p3 = pnand %p4471_p2, %p4707_p10 }
 0x87f   : > { %p4477_p7 = por %p4476_p6, %p4475_p5 }
 0x880   : > { %p4473_p4 = pneg %p4472_p3 }
 0x881   : > { %p4479_p9 = por %p4478_p8, %p4477_p7 }
 0x883   : > { %p4480_p11 = pnand %p4479_p9, %p4473_p4 }
 0x885   : > { %4483 = shalt.err (!%p4480_p11)
}
 0x886   : > { %4017 = dma.vmem_to_hbm [thread:$0]  (%p4707_p10), %s3734_s23, 128, %s7519_s17, %s3720_s19  }
 0x887 PF: > { %p4023_p13 = scmp.ge.s32.totalorder %s4566_s15, 2  ;;  %s3745_s22 = sand.u32 1, %s4530_s29  }
 0x888   : > { %s3746_s16 = scalar_lea.sflag [#allocation9], %s3745_s22 }
 0x889   : > { %p4020_p0 = pnand %p4023_p13, %p4714_p12 }
 0x88b   : > { %4525 = dma.done.wait (!%p4020_p0), %s3746_s16, 128  }
 0x88c   : > { %4527 = vsyncadd (!%p4020_p0), %s3746_s16, 4294967168  ;;  %s23_s15 = sadd.s32 1, %s4566_s15   ;;  %s8443_s21 = sld [smem:[#allocation11_spill]] }
 0x88d   : > { %p20_p1 = scmp.ge.s32.totalorder %s23_s15, 6   ;;  %s8444_s9 = sld [smem:[#allocation18_spill]] }
 0x88e   : > { %s8445_s10 = sld [smem:[#allocation12_spill]]  ;;  %s8446_s11 = sld [smem:[#allocation17_spill]] }
 0x88f   : > { %s8447_s12 = sld [smem:[#allocation13_spill]]  ;;  %s8448_s13 = sld [smem:[#allocation14_spill]] }
 0x890   : > { %s8449_s14 = sld [smem:[#allocation15_spill]]  ;;  %s8450_s7 = sld [smem:[#allocation16_spill]] }
 0x891   : > { %s8451_s29 = smov %s4534_s30  ;;  %22 = sbr.rel (!%p20_p1) target bundleno = 9 (0x9), region = 150 }
 0x892   : > { %s8452_s30 = smov %s8443_s21 }
 0x898   :  { %3751 = vsyncpa [#allocation9], 1 }
 0x899   :  { %3753 = vsyncpa [#allocation9 + $0x1], 1 }

</bundles_post_ra>
